<compile_context>
chip_gen: v7x
topology: tpu7x:2x2x1
jax: 0.10.0
libtpu: 0.0.40
codegen_flags: <defaults>
</compile_context>

<pallas_src>
import math

import jax
import jax.numpy as jnp
from jax.experimental import pallas as pl
from jax.experimental.pallas import tpu as pltpu

DROP_P = 0.1                              # torch.dropout(attn_weight, 0.1, True)
KEEP_SCALE = 1.0 / (1.0 - DROP_P)         # 1/(1-p) rescale for kept elements
# int32 threshold T such that P(u >= T) = 1 - DROP_P for u uniform over all int32 values.
DROP_THRESH = -(2 ** 31) + int(round(DROP_P * 2.0 ** 32))   # == -1717986918


def _recip(x):
    # EUP vrcp (approx) is effectively free on TPU; fall back to a plain divide when the
    # default backend is not TPU (e.g. the CPU interpret-mode correctness check).
    if jax.default_backend() == "tpu":
        return pl.reciprocal(x, approx=True)
    return 1.0 / x


def attn_kernel(q_ref, k_ref, v_ref, mask_ref, bits_ref, o_ref):
    # One grid step = one batch element; all H heads processed with batched einsums.
    q = q_ref[0]            # (H, S, D) f32
    k = k_ref[0]            # (H, S, D) f32
    v = v_ref[0]            # (H, S, D) f32
    mask = mask_ref[0, 0]   # (S, S)    f32, broadcast over heads
    bits = bits_ref[0]      # (H, S, S) int32 uniform random bits

    d = q.shape[-1]
    # Fold 1/sqrt(d) into Q (touches S*D elements instead of S*S).
    qs = q * (1.0 / math.sqrt(d))

    # QK^T: contract the last dims of both operands -> no explicit transpose of K.
    s = jnp.einsum("hqd,hkd->hqk", qs, k, preferred_element_type=jnp.float32)
    s = s + mask[None, :, :]

    # Numerically-stable softmax over the last dim.
    m_row = jnp.max(s, axis=-1, keepdims=True)
    p = jnp.exp(s - m_row)
    denom = jnp.sum(p, axis=-1, keepdims=True)
    # Per-row reciprocal with the dropout 1/(1-p) rescale folded in (S x 1, not S x S).
    inv = _recip(denom) * KEEP_SCALE

    # Dropout keep-test entirely in the integer domain: keep with prob 0.9.
    keep = bits >= DROP_THRESH
    w = jnp.where(keep, p * inv, 0.0)

    # attn_weight @ value
    o_ref[0] = jnp.einsum("hqk,hkd->hqd", w, v, preferred_element_type=jnp.float32)


def sdpa_dropout(query, key, value, attn_mask, dropout_bits):
    B, H, S, D = query.shape

    qkv_spec = pl.BlockSpec((1, H, S, D), lambda b: (b, 0, 0, 0))
    mask_spec = pl.BlockSpec((1, 1, S, S), lambda b: (0, 0, 0, 0))
    bits_spec = pl.BlockSpec((1, H, S, S), lambda b: (b, 0, 0, 0))
    out_spec = pl.BlockSpec((1, H, S, D), lambda b: (b, 0, 0, 0))

    return pl.pallas_call(
        attn_kernel,
        out_shape=jax.ShapeDtypeStruct((B, H, S, D), jnp.float32),
        grid_spec=pltpu.PrefetchScalarGridSpec(
            num_scalar_prefetch=0,
            grid=(B,),
            in_specs=[qkv_spec, qkv_spec, qkv_spec, mask_spec, bits_spec],
            out_specs=out_spec,
        ),
        compiler_params=pltpu.CompilerParams(
            dimension_semantics=("parallel",),
        ),
    )(query, key, value, attn_mask, dropout_bits)


def reference(query, key, value, attn_mask, dropout_bits):
    # Pure-JAX reference with the SAME dropout mask (deterministic comparison).
    d = query.shape[-1]
    qk = jnp.einsum("bhqd,bhkd->bhqk", query, key,
                    precision=jax.lax.Precision.HIGHEST) / math.sqrt(d)
    qk = qk + attn_mask
    w = jax.nn.softmax(qk, axis=-1)
    keep = dropout_bits >= DROP_THRESH
    w = jnp.where(keep, w * KEEP_SCALE, 0.0)
    return jnp.einsum("bhqk,bhkd->bhqd", w, value,
                      precision=jax.lax.Precision.HIGHEST)


if __name__ == "__main__":
    # Small shapes consistent with the module's (batch, heads, seq, head_dim) forward.
    # S and D are multiples of 128 so stores are lane-dense and MXU tiles are full-width.
    B, H, S, D = 2, 4, 128, 128

    root = jax.random.PRNGKey(0)
    kq, kk, kv, km, kd = jax.random.split(root, 5)
    query = jax.random.normal(kq, (B, H, S, D), dtype=jnp.float32)
    key = jax.random.normal(kk, (B, H, S, D), dtype=jnp.float32)
    value = jax.random.normal(kv, (B, H, S, D), dtype=jnp.float32)
    attn_mask = jax.random.normal(km, (1, 1, S, S), dtype=jnp.float32)

    # Uniform int32 bits driving the dropout keep-test (generated once, outside the kernel).
    bits_u32 = jax.random.bits(kd, (B, H, S, S), dtype=jnp.uint32)
    dropout_bits = jax.lax.bitcast_convert_type(bits_u32, jnp.int32)

    out = sdpa_dropout(query, key, value, attn_mask, dropout_bits)
    out = jax.block_until_ready(out)

    ref = jax.block_until_ready(reference(query, key, value, attn_mask, dropout_bits))

    assert out.shape == (B, H, S, D)
    assert bool(jnp.all(jnp.isfinite(out)))
    max_err = float(jnp.max(jnp.abs(out - ref)))
    assert max_err < 5e-2, f"max abs error vs reference: {max_err}"
    print("KERNEL_OK")
</pallas_src>

<mosaic_0001>
module attributes {stable_mosaic.version = 11 : i64} {
  func.func @attn_kernel(%arg0: i32, %arg1: memref<1x4x128x128xf32, #tpu.memory_space<vmem>>, %arg2: memref<1x4x128x128xf32, #tpu.memory_space<vmem>>, %arg3: memref<1x4x128x128xf32, #tpu.memory_space<vmem>>, %arg4: memref<1x1x128x128xf32, #tpu.memory_space<vmem>>, %arg5: memref<1x4x128x128xi32, #tpu.memory_space<vmem>>, %arg6: memref<1x4x128x128xf32, #tpu.memory_space<vmem>>) attributes {dimension_semantics = [#tpu.dimension_semantics<parallel>], iteration_bounds = array<i64: 2>, scalar_prefetch = 0 : i64, scratch_operands = 0 : i64, tpu.core_type = #tpu.core_type<tc>, window_params = [{transform_indices = @transform_0, window_bounds = array<i64: 1, 4, 128, 128>}, {transform_indices = @transform_1, window_bounds = array<i64: 1, 4, 128, 128>}, {transform_indices = @transform_2, window_bounds = array<i64: 1, 4, 128, 128>}, {pipeline_mode = #tpu.pipeline_mode<synchronous>, transform_indices = @transform_3, window_bounds = array<i64: 1, 1, 128, 128>}, {transform_indices = @transform_4, window_bounds = array<i64: 1, 4, 128, 128>}, {transform_indices = @transform_5, window_bounds = array<i64: 1, 4, 128, 128>}]} {
    %c0 = arith.constant 0 : index
    %c0_0 = arith.constant 0 : index
    %c0_1 = arith.constant 0 : index
    %c0_2 = arith.constant 0 : index
    %0 = vector.load %arg1[%c0, %c0_0, %c0_1, %c0_2] : memref<1x4x128x128xf32, #tpu.memory_space<vmem>>, vector<1x4x128x128xf32>
    %1 = vector.shape_cast %0 : vector<1x4x128x128xf32> to vector<4x128x128xf32>
    %c0_3 = arith.constant 0 : index
    %c0_4 = arith.constant 0 : index
    %c0_5 = arith.constant 0 : index
    %c0_6 = arith.constant 0 : index
    %2 = vector.load %arg2[%c0_3, %c0_4, %c0_5, %c0_6] : memref<1x4x128x128xf32, #tpu.memory_space<vmem>>, vector<1x4x128x128xf32>
    %3 = vector.shape_cast %2 : vector<1x4x128x128xf32> to vector<4x128x128xf32>
    %c0_7 = arith.constant 0 : index
    %c0_8 = arith.constant 0 : index
    %c0_9 = arith.constant 0 : index
    %c0_10 = arith.constant 0 : index
    %4 = vector.load %arg3[%c0_7, %c0_8, %c0_9, %c0_10] : memref<1x4x128x128xf32, #tpu.memory_space<vmem>>, vector<1x4x128x128xf32>
    %5 = vector.shape_cast %4 : vector<1x4x128x128xf32> to vector<4x128x128xf32>
    %c0_11 = arith.constant 0 : index
    %c0_12 = arith.constant 0 : index
    %c0_13 = arith.constant 0 : index
    %c0_14 = arith.constant 0 : index
    %6 = vector.load %arg4[%c0_11, %c0_12, %c0_13, %c0_14] : memref<1x1x128x128xf32, #tpu.memory_space<vmem>>, vector<1x1x128x128xf32>
    %7 = vector.shape_cast %6 : vector<1x1x128x128xf32> to vector<128x128xf32>
    %c0_15 = arith.constant 0 : index
    %c0_16 = arith.constant 0 : index
    %c0_17 = arith.constant 0 : index
    %c0_18 = arith.constant 0 : index
    %8 = vector.load %arg5[%c0_15, %c0_16, %c0_17, %c0_18] : memref<1x4x128x128xi32, #tpu.memory_space<vmem>>, vector<1x4x128x128xi32>
    %9 = vector.shape_cast %8 : vector<1x4x128x128xi32> to vector<4x128x128xi32>
    %cst = arith.constant 0.0883883461 : f32
    %10 = vector.broadcast %cst : f32 to vector<4x128x128xf32>
    %11 = arith.mulf %1, %10 : vector<4x128x128xf32>
    "tpu.trace_start"() <{level = 10 : i32, message = "hqd,hkd->hqk"}> : () -> ()
    %cst_19 = arith.constant dense<0.000000e+00> : vector<4x128x128xf32>
    %12 = tpu.matmul %11, %3, %cst_19 {dimension_numbers = #tpu.dot_dimension_numbers<[2], [2], [1], [1], [0, 0, 0, 1, 1, 1], [0], [0]>} : vector<4x128x128xf32>, vector<4x128x128xf32>, vector<4x128x128xf32> -> vector<4x128x128xf32>
    "tpu.trace_stop"() : () -> ()
    %13 = vector.shape_cast %7 : vector<128x128xf32> to vector<1x128x128xf32>
    %14 = vector.broadcast %13 : vector<1x128x128xf32> to vector<4x128x128xf32>
    %15 = arith.addf %12, %14 : vector<4x128x128xf32>
    %cst_20 = arith.constant dense<0xFF800000> : vector<4x128xf32>
    %16 = vector.multi_reduction <maximumf>, %15, %cst_20 [2] : vector<4x128x128xf32> to vector<4x128xf32>
    %17 = vector.shape_cast %16 : vector<4x128xf32> to vector<4x128x1xf32>
    %18 = vector.broadcast %17 : vector<4x128x1xf32> to vector<4x128x128xf32>
    %19 = arith.subf %15, %18 : vector<4x128x128xf32>
    %20 = math.exp %19 : vector<4x128x128xf32>
    %cst_21 = arith.constant dense<0.000000e+00> : vector<4x128xf32>
    %21 = vector.multi_reduction <add>, %20, %cst_21 [2] : vector<4x128x128xf32> to vector<4x128xf32>
    %22 = vector.shape_cast %21 : vector<4x128xf32> to vector<4x128x1xf32>
    %cst_22 = arith.constant 1.000000e+00 : f32
    %23 = vector.broadcast %cst_22 : f32 to vector<4x128x1xf32>
    %24 = arith.divf %23, %22 : vector<4x128x1xf32>
    %cst_23 = arith.constant 1.11111116 : f32
    %25 = vector.broadcast %cst_23 : f32 to vector<4x128x1xf32>
    %26 = arith.mulf %24, %25 : vector<4x128x1xf32>
    %c-1717986918_i32 = arith.constant -1717986918 : i32
    %27 = vector.broadcast %c-1717986918_i32 : i32 to vector<4x128x128xi32>
    %28 = arith.cmpi sge, %9, %27 : vector<4x128x128xi32>
    %29 = vector.broadcast %26 : vector<4x128x1xf32> to vector<4x128x128xf32>
    %30 = arith.mulf %20, %29 : vector<4x128x128xf32>
    %cst_24 = arith.constant 0.000000e+00 : f32
    %31 = vector.broadcast %cst_24 : f32 to vector<4x128x128xf32>
    %32 = arith.select %28, %30, %31 : vector<4x128x128xi1>, vector<4x128x128xf32>
    "tpu.trace_start"() <{level = 10 : i32, message = "hqk,hkd->hqd"}> : () -> ()
    %cst_25 = arith.constant dense<0.000000e+00> : vector<4x128x128xf32>
    %33 = tpu.matmul %32, %5, %cst_25 {dimension_numbers = #tpu.dot_dimension_numbers<[2], [1], [1], [2], [0, 0, 0, 1, 1, 2], [0], [0]>} : vector<4x128x128xf32>, vector<4x128x128xf32>, vector<4x128x128xf32> -> vector<4x128x128xf32>
    "tpu.trace_stop"() : () -> ()
    %c0_26 = arith.constant 0 : index
    %c0_27 = arith.constant 0 : index
    %c0_28 = arith.constant 0 : index
    %c0_29 = arith.constant 0 : index
    %34 = vector.load %arg6[%c0_26, %c0_27, %c0_28, %c0_29] : memref<1x4x128x128xf32, #tpu.memory_space<vmem>>, vector<1x4x128x128xf32>
    %35 = vector.shape_cast %34 : vector<1x4x128x128xf32> to vector<4x128x128xf32>
    %36 = vector.shape_cast %33 : vector<4x128x128xf32> to vector<1x4x128x128xf32>
    tpu.vector_store %arg6[%c0_26, %c0_27, %c0_28, %c0_29], %36 {strides = array<i32>} : memref<1x4x128x128xf32, #tpu.memory_space<vmem>>, vector<1x4x128x128xf32>,
    return
  }
  func.func @transform_0(%arg0: i32) -> (i32, i32, i32, i32) {
    %c0_i32 = arith.constant 0 : i32
    %c0_i32_0 = arith.constant 0 : i32
    %c0_i32_1 = arith.constant 0 : i32
    %c0_i32_2 = arith.constant 0 : i32
    return %arg0, %c0_i32, %c0_i32_0, %c0_i32_1 : i32, i32, i32, i32
  }
  func.func @transform_1(%arg0: i32) -> (i32, i32, i32, i32) {
    %c0_i32 = arith.constant 0 : i32
    %c0_i32_0 = arith.constant 0 : i32
    %c0_i32_1 = arith.constant 0 : i32
    %c0_i32_2 = arith.constant 0 : i32
    return %arg0, %c0_i32, %c0_i32_0, %c0_i32_1 : i32, i32, i32, i32
  }
  func.func @transform_2(%arg0: i32) -> (i32, i32, i32, i32) {
    %c0_i32 = arith.constant 0 : i32
    %c0_i32_0 = arith.constant 0 : i32
    %c0_i32_1 = arith.constant 0 : i32
    %c0_i32_2 = arith.constant 0 : i32
    return %arg0, %c0_i32, %c0_i32_0, %c0_i32_1 : i32, i32, i32, i32
  }
  func.func @transform_3(%arg0: i32) -> (i32, i32, i32, i32) {
    %c0_i32 = arith.constant 0 : i32
    %c0_i32_0 = arith.constant 0 : i32
    %c0_i32_1 = arith.constant 0 : i32
    %c0_i32_2 = arith.constant 0 : i32
    %c0_i32_3 = arith.constant 0 : i32
    return %c0_i32, %c0_i32_0, %c0_i32_1, %c0_i32_2 : i32, i32, i32, i32
  }
  func.func @transform_4(%arg0: i32) -> (i32, i32, i32, i32) {
    %c0_i32 = arith.constant 0 : i32
    %c0_i32_0 = arith.constant 0 : i32
    %c0_i32_1 = arith.constant 0 : i32
    %c0_i32_2 = arith.constant 0 : i32
    return %arg0, %c0_i32, %c0_i32_0, %c0_i32_1 : i32, i32, i32, i32
  }
  func.func @transform_5(%arg0: i32) -> (i32, i32, i32, i32) {
    %c0_i32 = arith.constant 0 : i32
    %c0_i32_0 = arith.constant 0 : i32
    %c0_i32_1 = arith.constant 0 : i32
    %c0_i32_2 = arith.constant 0 : i32
    return %arg0, %c0_i32, %c0_i32_0, %c0_i32_1 : i32, i32, i32, i32
  }
}

</mosaic_0001>

<bundles_post_ra>
// kernel: tpu_custom_call.1
= control target key start
LH: loop header
LB: loop body
LE: loop exit
PB: predicated region body
PF: predicated region fallthrough
CT: control target
= control target key end

     0   :  { %s5887_s0 = inlined_call_operand.hbm [shape: f32[2,4,128,128], index: 0, kind: input, shape index: {}]   ;;  %s5888_s1 = inlined_call_operand.hbm [shape: f32[2,4,128,128], index: 1, kind: input, shape index: {}]   ;;  %s5889_s2 = inlined_call_operand.hbm [shape: f32[2,4,128,128], index: 2, kind: input, shape index: {}]   ;;  %s5890_s3 = inlined_call_operand.hbm [shape: f32[1,1,128,128], index: 3, kind: input, shape index: {}]   ;;  %s5891_s4 = inlined_call_operand.hbm [shape: s32[2,4,128,128], index: 4, kind: input, shape index: {}]   ;;  %s5892_s5 = inlined_call_operand.hbm [shape: f32[2,4,128,128], index: 5, kind: output, shape index: {}]  }
   0x1   :  { %5946 = sst [smem:[#allocation44_spill]] %s5887_s0 }
   0x2   :  { %5947 = sst [smem:[#allocation45_spill]] %s5888_s1 }
   0x3   :  { %5948 = sst [smem:[#allocation46_spill]] %s5889_s2 }
   0x4   :  { %10 = vsyncpa [#allocation3], 0 }
   0x5   :  { %12 = vsyncpa [#allocation3 + $0x1], 0 }
   0x6   :  { %13 = vsyncpa [#allocation6], 0 }
   0x7   :  { %15 = vsyncpa [#allocation6 + $0x1], 0 }
   0x8   :  { %16 = vsyncpa [#allocation9], 0 }
   0x9   :  { %17 = vsyncpa [#allocation4], 0 }
   0xa   :  { %19 = vsyncpa [#allocation4 + $0x1], 0  ;;  %s4581_s18 = smov 0   ;;  %s4583_s19 = smov 0  }
   0xb   :  { %s4585_s20 = smov 0   ;;  %s4587_s21 = smov 0  }
   0xc LB: > { %5949 = sst [smem:[#allocation17_spill]] %s4535_s20  ;;  %s4602_s22 = sadd.s32 1, %s4539_s21   ;;  %s4539_s21 = sphi %s4587_s21, %s6049_s21   ;;  %s4535_s20 = sphi %s4585_s20, %s6051_s20   ;;  %s4531_s19 = sphi %s4583_s19, %s6053_s19   ;;  %s4527_s18 = sphi %s4581_s18, %s6052_s18  }
   0xd   : > { %5950 = sst [smem:[#allocation18_spill]] %s4539_s21  ;;  %s32_s23 = sadd.s32 1, %s4535_s20 }
   0xe   : > { %5951 = sst [smem:[#allocation19_spill]] %s4602_s22  ;;  %s29_s24 = ssub.s32 %s4539_s21, %s4602_s22 }
   0xf   : > { %p5893_p0 = scmp.ne.s32.totalorder %s4535_s20, %s4531_s19  ;;  %p30_p1 = scmp.eq.s32.totalorder %s29_s24, 0 }
  0x10   : > { %p40_p2 = scmp.eq.s32.totalorder %s4539_s21, 0  ;;  %p4017_p5 = scmp.lt.s32.totalorder %s4539_s21, 2 }
  0x11   : > { %s4611_s25 = scalar_select %p30_p1, %s4535_s20, %s32_s23  }
  0x12   : > { %p41_p3 = por %p40_p2, %p5893_p0  ;;  %s207_s26 = sand.u32 1, %s4539_s21  }
  0x13   : > { %5952 = sst [smem:[#allocation20_spill]] %s4611_s25  ;;  %s209_s27 = sand.u32 1, %s4535_s20  }
  0x14   : > { %s4620_s28 = sshll.u32 %s209_s27, 9  ;;  %s4623_s29 = sshll.u32 %s4539_s21, 13 }
  0x15   : > { %s5953_s0 = sld [smem:[#allocation44_spill]]  ;;  %s211_s8 = scalar_lea.vmem [#allocation2], %s4620_s28 }
  0x16   : > { %s218_s9 = sshll.u32 %s211_s8, 4  ;;  %p4632_p6 = pnand %p4017_p5, %p41_p3  ;;  %s4636_s9 = int_to_ptr.vmem [resolvable:$true] %s218_s9 }
  0x17   : > { %s4640_s11 = scalar_lea.sflag [#allocation3], %s207_s26 }
  0x18   : > { %s5954_s10 = scalar_select %p4632_p6, 1, 0 }
  0x19   : > { %p4646_p8 = pneg %p4632_p6 }
  0x1b   : > { %s4629_s7 = scalar_lea.hbm %s5953_s0, %s4623_s29  ;;  %s4318_s16 = scalar_lea.hbm %s5953_s0, 16384 }
  0x1c   : > { %s4313_s12 = scalar_lea.hbm %s4629_s7, 8192  ;;  %p4319_p11 = scmp.lt.u32.totalorder %s4629_s7, %s5953_s0 }
  0x1d   : > { %p4314_p7 = scmp.ne.s32.totalorder %s4629_s7, %s4313_s12  ;;  %p4320_p12 = scmp.lt.u32.totalorder %s4318_s16, %s4313_s12 }
  0x1e   : > { %s5955_s13 = scalar_select %p4646_p8, 1, 0 }
  0x1f   : > { %p4316_p9 = pnand %p4646_p8, %p4314_p7  ;;  %p4321_p13 = por %p4320_p12, %p4319_p11 }
  0x20   : > { %p4322_p1 = scmp.lt.u32.totalorder %s4313_s12, %s4629_s7 }
  0x21   : > { %p4317_p10 = pneg %p4316_p9 }
  0x22   : > { %p4323_p2 = por %p4322_p1, %p4321_p13 }
  0x24   : > { %p4324_p3 = pnand %p4323_p2, %p4317_p10 }
  0x26   : > { %4327 = shalt.err (!%p4324_p3)
}
  0x27   : > { %s4328_s24 = scalar_lea.vmem %s4636_s9, 8192  ;;  %s4541_s27 = smov [#allocation2]  }
  0x28   : > { %p4329_p5 = scmp.ne.s32.totalorder %s4636_s9, %s4328_s24  ;;  %s4333_s30 = sshll.u32 %s4541_s27, 4  ;;  %s4334_s30 = int_to_ptr.vmem [resolvable:$false] %s4333_s30 }
  0x29   : > { %s4335_s6 = scalar_lea.vmem %s4334_s30, 16384  ;;  %p4336_p4 = scmp.lt.s32.totalorder %s4636_s9, %s4334_s30 }
  0x2a   : > { %p4331_p7 = pnand %p4329_p5, %p4646_p8  ;;  %p4337_p0 = scmp.lt.s32.totalorder %s4335_s6, %s4328_s24 }
  0x2c   : > { %p4332_p9 = pneg %p4331_p7  ;;  %p4338_p11 = por %p4337_p0, %p4336_p4 }
  0x2e   : > { %p4339_p12 = pnand %p4338_p11, %p4332_p9 }
  0x30   : > { %4342 = shalt.err (!%p4339_p12)
}
  0x31   : > { %s5894_s8 = smov 128   ;;  %s5896_s12 = smov 8  }
  0x32   : > { %4002 = dma.hbm_to_vmem [thread:$0]  (!%p4632_p6), %s4629_s7, 8192, %s4636_s9, %s4640_s11, %s5894_s8, %s5894_s8, %s5896_s12  }
  0x33   : > { %s5956_s1 = sld [smem:[#allocation45_spill]]  ;;  %s232_s17 = scalar_lea.vmem [#allocation5], %s4620_s28 }
  0x34   : > { %s239_s23 = sshll.u32 %s232_s17, 4  ;;  %s4684_s24 = scalar_lea.sflag [#allocation6], %s207_s26  ;;  %s4680_s23 = int_to_ptr.vmem [resolvable:$true] %s239_s23 }
  0x39   : > { %s4677_s16 = scalar_lea.hbm %s5956_s1, %s4623_s29  ;;  %s4348_s30 = scalar_lea.hbm %s5956_s1, 16384 }
  0x3a   : > { %s4343_s27 = scalar_lea.hbm %s4677_s16, 8192  ;;  %p4349_p13 = scmp.lt.u32.totalorder %s4677_s16, %s5956_s1 }
  0x3b   : > { %p4344_p0 = scmp.ne.s32.totalorder %s4677_s16, %s4343_s27  ;;  %p4350_p1 = scmp.lt.u32.totalorder %s4348_s30, %s4343_s27 }
  0x3c   : > { %p4352_p3 = scmp.lt.u32.totalorder %s4343_s27, %s4677_s16 }
  0x3d   : > { %p4346_p4 = pnand %p4344_p0, %p4646_p8  ;;  %p4351_p2 = por %p4350_p1, %p4349_p13 }
  0x3f   : > { %p4347_p10 = pneg %p4346_p4  ;;  %p4353_p5 = por %p4352_p3, %p4351_p2 }
  0x41   : > { %p4354_p7 = pnand %p4353_p5, %p4347_p10 }
  0x43   : > { %4357 = shalt.err (!%p4354_p7)
}
  0x44   : > { %s4358_s26 = scalar_lea.vmem %s4680_s23, 8192  ;;  %s4544_s15 = smov [#allocation5]  }
  0x45   : > { %p4359_p9 = scmp.ne.s32.totalorder %s4680_s23, %s4358_s26  ;;  %s4363_s17 = sshll.u32 %s4544_s15, 4  ;;  %s4364_s17 = int_to_ptr.vmem [resolvable:$false] %s4363_s17 }
  0x46   : > { %s4365_s7 = scalar_lea.vmem %s4364_s17, 16384  ;;  %p4366_p0 = scmp.lt.s32.totalorder %s4680_s23, %s4364_s17 }
  0x47   : > { %p4361_p11 = pnand %p4359_p9, %p4646_p8  ;;  %p4367_p4 = scmp.lt.s32.totalorder %s4365_s7, %s4358_s26 }
  0x49   : > { %p4362_p12 = pneg %p4361_p11  ;;  %p4368_p13 = por %p4367_p4, %p4366_p0 }
  0x4b   : > { %p4369_p1 = pnand %p4368_p13, %p4362_p12 }
  0x4d   : > { %4372 = shalt.err (!%p4369_p1)
}
  0x4e   : > { %4005 = dma.hbm_to_vmem [thread:$0]  (!%p4632_p6), %s4677_s16, 8192, %s4680_s23, %s4684_s24, %s5894_s8, %s5894_s8, %s5896_s12  }
  0x4f   : > { %s4712_s27 = sadd.s32 4294967295, %s4539_s21   ;;  %s2924_s9 = sadd.s32 4294967294, %s4539_s21  }
  0x50   : > { %p45_p10 = scmp.ne.s32.totalorder %s4531_s19, %s4527_s18  ;;  %p5898_p2 = scmp.eq.s32.totalorder %s4712_s27, 0 }
  0x51   : > { %p168_p3 = scmp.eq.s32.totalorder %s4712_s27, 1  ;;  %p174_p5 = scmp.eq.s32.totalorder %s2924_s9, 1 }
  0x52   : > { %p2925_p7 = scmp.ge.s32.totalorder %s4539_s21, 1  ;;  %p4722_p9 = por %p5898_p2, %p45_p10 }
  0x53   : > { %p5958_p11 = scmp.ne.s32.totalorder %s4535_s20, %s4531_s19  ;;  %p4733_p0 = por %p174_p5, %p45_p10 }
  0x54   : > { %s5957_s30 = scalar_select %p4722_p9, 1, 0 }
  0x55   : > { %p4729_p12 = por %p168_p3, %p5958_p11  ;;  %p181_p4 = scmp.lt.s32.totalorder %s4539_s21, 3 }
  0x56   : > { %s5960_s23 = scalar_select %p4733_p0, 1, 0 }
  0x57   : > { %s5959_s16 = scalar_select %p4729_p12, 1, 0 }
  0x58   : > { %5961 = sst [smem:[#allocation21_spill]] %s5960_s23  ;;  %p4738_p13 = pnand %p2925_p7, %p181_p4 }
  0x59   : > { %s4545_s14 = smov [#allocation8]   ;;  %s5963_s2 = sld [smem:[#allocation46_spill]] }
  0x5a   : > { %s5962_s6 = scalar_select %p4738_p13, 1, 0 }
  0x5b   : > { %s193_s26 = sshll.u32 %s4545_s14, 4  ;;  %p3995_p1 = pneg %p4738_p13  ;;  %s4742_s26 = int_to_ptr.vmem [resolvable:$true] %s193_s26 }
  0x5c   : > { %s253_s9 = scalar_lea.vmem [#allocation7], %s4620_s28 }
  0x5d   : > { %s260_s8 = sshll.u32 %s253_s9, 4  ;;  %p4755_p10 = pnand %p3995_p1, %p5898_p2  ;;  %s4759_s8 = int_to_ptr.vmem [resolvable:$true] %s260_s8 }
  0x5f   : > { %s4750_s7 = scalar_lea.hbm %s5963_s2, %s4623_s29  ;;  %s4378_s0 = scalar_lea.hbm %s5963_s2, 16384 }
  0x60   : > { %s5964_s12 = scalar_select %p4755_p10, 1, 0 }
  0x61   : > { %s4373_s14 = scalar_lea.hbm %s4750_s7, 8192  ;;  %p4379_p11 = scmp.lt.u32.totalorder %s4750_s7, %s5963_s2 }
  0x62   : > { %p4374_p3 = scmp.ne.s32.totalorder %s4750_s7, %s4373_s14  ;;  %p4380_p4 = scmp.lt.u32.totalorder %s4378_s0, %s4373_s14 }
  0x63   : > { %p4382_p2 = scmp.lt.u32.totalorder %s4373_s14, %s4750_s7 }
  0x64   : > { %p4376_p5 = pnand %p4374_p3, %p4646_p8  ;;  %p4381_p1 = por %p4380_p4, %p4379_p11 }
  0x66   : > { %p4377_p7 = pneg %p4376_p5  ;;  %p4383_p0 = por %p4382_p2, %p4381_p1 }
  0x68   : > { %p4384_p12 = pnand %p4383_p0, %p4377_p7 }
  0x6a   : > { %4387 = shalt.err (!%p4384_p12)
}
  0x6b   : > { %s4388_s9 = scalar_lea.vmem %s4759_s8, 8192  ;;  %s4546_s15 = smov [#allocation7]  }
  0x6c   : > { %p4389_p3 = scmp.ne.s32.totalorder %s4759_s8, %s4388_s9  ;;  %s4393_s17 = sshll.u32 %s4546_s15, 4  ;;  %s4394_s17 = int_to_ptr.vmem [resolvable:$false] %s4393_s17 }
  0x6d   : > { %s4395_s1 = scalar_lea.vmem %s4394_s17, 16384  ;;  %p4396_p13 = scmp.lt.s32.totalorder %s4759_s8, %s4394_s17 }
  0x6e   : > { %p4391_p5 = pnand %p4389_p3, %p4646_p8  ;;  %p4397_p10 = scmp.lt.s32.totalorder %s4395_s1, %s4388_s9 }
  0x70   : > { %p4392_p9 = pneg %p4391_p5  ;;  %p4398_p11 = por %p4397_p10, %p4396_p13 }
  0x72   : > { %p4399_p4 = pnand %p4398_p11, %p4392_p9 }
  0x74   : > { %4402 = shalt.err (!%p4399_p4)
}
  0x75   : > { %s5965_s0 = smov 8   ;;  %s5966_s25 = smov 128  }
  0x76   : > { %4008 = dma.hbm_to_vmem [thread:$0]  (!%p4632_p6), %s4750_s7, 8192, %s4759_s8, %s4684_s24, %s5966_s25, %s5966_s25, %s5965_s0  }
  0x77   : > { %s4790_s2 = scalar_lea.hbm %s5891_s4, %s4623_s29  ;;  %s4403_s1 = scalar_lea.hbm %s5890_s3, 2048 }
  0x78   : > { %p4404_p2 = scmp.ne.s32.totalorder %s5890_s3, %s4403_s1  ;;  %p5967_p9 = scmp.ne.s32.totalorder %s5964_s12, 0 }
  0x79   : > { %p4410_p10 = scmp.lt.u32.totalorder %s4403_s1, %s5890_s3 }
  0x7a   : > { %p4405_p12 = pneg %p5967_p9 }
  0x7c   : > { %p4406_p0 = pnand %p4405_p12, %p4404_p2 }
  0x7e   : > { %p4407_p13 = pneg %p4406_p0 }
  0x80   : > { %p4412_p7 = pnand %p4410_p10, %p4407_p13 }
  0x82   : > { %4415 = shalt.err (!%p4412_p7)
}
  0x83   : > { %s4416_s29 = scalar_lea.vmem %s4742_s26, 2048  ;;  %p4424_p11 = scmp.lt.s32.totalorder %s4742_s26, %s4742_s26 }
  0x84   : > { %p4417_p1 = scmp.ne.s32.totalorder %s4742_s26, %s4416_s29  ;;  %p4425_p4 = scmp.lt.s32.totalorder %s4416_s29, %s4416_s29 }
  0x86   : > { %p4419_p3 = pnand %p4417_p1, %p4405_p12  ;;  %p4426_p6 = por %p4425_p4, %p4424_p11 }
  0x88   : > { %p4420_p5 = pneg %p4419_p3 }
  0x8a   : > { %p4427_p8 = pnand %p4426_p6, %p4420_p5 }
  0x8c   : > { %4430 = shalt.err (!%p4427_p8)
}
  0x8d   : > { %3998 = dma.hbm_to_vmem [thread:$0]  (!%p5967_p9), %s5890_s3, 2048, %s4742_s26, [#allocation9], %s5966_s25, %s5966_s25, %s5965_s0  }
  0x8e   : > { %s274_s22 = scalar_lea.vmem [#allocation10], %s4620_s28  ;;  %s4431_s24 = scalar_lea.hbm %s4790_s2, 8192 }
  0x8f   : > { %s281_s8 = sshll.u32 %s274_s22, 4  ;;  %p4432_p6 = scmp.ne.s32.totalorder %s4790_s2, %s4431_s24  ;;  %s4817_s8 = int_to_ptr.vmem [resolvable:$true] %s281_s8 }
  0x90   : > { %p5968_p8 = scmp.ne.s32.totalorder %s5955_s13, 0  ;;  %s4436_s7 = scalar_lea.hbm %s5891_s4, 16384 }
  0x91   : > { %p4437_p0 = scmp.lt.u32.totalorder %s4790_s2, %s5891_s4  ;;  %p4438_p13 = scmp.lt.u32.totalorder %s4436_s7, %s4431_s24 }
  0x92   : > { %p4434_p2 = pnand %p4432_p6, %p5968_p8  ;;  %p4440_p9 = scmp.lt.u32.totalorder %s4431_s24, %s4790_s2 }
  0x93   : > { %p4439_p10 = por %p4438_p13, %p4437_p0 }
  0x94   : > { %p4435_p12 = pneg %p4434_p2 }
  0x95   : > { %p4441_p7 = por %p4440_p9, %p4439_p10 }
  0x97   : > { %p4442_p1 = pnand %p4441_p7, %p4435_p12 }
  0x99   : > { %4445 = shalt.err (!%p4442_p1)
}
  0x9a   : > { %s4446_s28 = scalar_lea.vmem %s4817_s8, 8192  ;;  %s4547_s26 = smov [#allocation10]  }
  0x9b   : > { %p4447_p3 = scmp.ne.s32.totalorder %s4817_s8, %s4446_s28  ;;  %s4451_s9 = sshll.u32 %s4547_s26, 4  ;;  %s4452_s9 = int_to_ptr.vmem [resolvable:$false] %s4451_s9 }
  0x9c   : > { %s4453_s17 = scalar_lea.vmem %s4452_s9, 16384  ;;  %p4454_p4 = scmp.lt.s32.totalorder %s4817_s8, %s4452_s9 }
  0x9d   : > { %p4449_p5 = pnand %p4447_p3, %p5968_p8  ;;  %p4455_p6 = scmp.lt.s32.totalorder %s4453_s17, %s4446_s28 }
  0x9f   : > { %p4450_p11 = pneg %p4449_p5  ;;  %p4456_p2 = por %p4455_p6, %p4454_p4 }
  0xa1   : > { %p4457_p0 = pnand %p4456_p2, %p4450_p11 }
  0xa3   : > { %4460 = shalt.err (!%p4457_p0)
}
  0xa4   : > { %p5969_p12 = scmp.ne.s32.totalorder %s5954_s10, 0  ;;  %p5970_p8 = scmp.ne.s32.totalorder %s5962_s6, 0 }
  0xa6   : > { %4011 = dma.hbm_to_vmem [thread:$0]  (!%p5969_p12), %s4790_s2, 8192, %s4817_s8, %s4640_s11, %s5966_s25, %s5966_s25, %s5965_s0  }
  0xa7   : > { %293 = sbr.rel (%p5970_p8) target bundleno = 1140 (0x474), region = 40 }
  0xae   : > { %s295_s13 = sand.u32 1, %s4712_s27   ;;  %s297_s1 = sand.u32 1, %s4531_s19  }
  0xaf   : > { %s4850_s29 = sshll.u32 %s297_s1, 9  ;;  %s296_s10 = scalar_lea.sflag [#allocation3], %s295_s13 }
  0xb0   : > { %s4853_s20 = scalar_lea.vmem [#allocation2], %s4850_s29  ;;  %p5971_p13 = scmp.ne.s32.totalorder %s5957_s30, 0 }
  0xb2   : > { %4506 = dma.done.wait (%p5971_p13), %s296_s10, 8192  }
  0xb3   : > { %4508 = vsyncadd (%p5971_p13), %s296_s10, 4294959104  ;;  %s305_s2 = scalar_lea.sflag [#allocation6], %s295_s13  ;;  %s4860_s11 = scalar_lea.vmem [#allocation5], %s4850_s29 }
  0xb4   : > { %4510 = dma.done.wait (%p5971_p13), %s305_s2, 16384  }
  0xb5   : > { %4512 = vsyncadd (%p5971_p13), %s305_s2, 4294950912  ;;  %s4867_s6 = scalar_lea.vmem [#allocation7], %s4850_s29  ;;  %p5972_p10 = scmp.eq.s32.totalorder %s4712_s27, 0 }
  0xb7   : > { %4514 = dma.done.wait (%p5972_p10), [#allocation9], 2048   ;;  %p5973_p9 = pmov %p5972_p10 }
  0xb8   : > { %s4874_s0 = scalar_lea.vmem [#allocation10], %s4850_s29 }
  0xb9   : > { %4516 = vsyncadd (%p5973_p9), [#allocation9], 4294965248 }
  0xba   : > { %4518 = dma.done.wait (%p5971_p13), %s296_s10, 8192  }
  0xbb   : > { %4520 = vsyncadd (%p5971_p13), %s296_s10, 4294959104  ;;  %v436_v0 = vld [vmem:[%s4860_s11] sm:$0xff]  ;;  %v437_v1 = vld [vmem:[%s4860_s11 + $0x8] sm:$0xff]  ;;  %s5768_s30 = scalar_lea.vmem [#allocation11], %s4850_s29  ;;  %s3020_s25 = sshll.u32 %s4712_s27, 13 }
  0xbc   : > { %v452_v2 = vld [vmem:[%s4860_s11 + $0x80] sm:$0xff]  ;;  %v3725_v3 = vpack.c.bf16 %v437_v1, %v436_v0  ;;  %v453_v4 = vld [vmem:[%s4860_s11 + $0x88] sm:$0xff]  ;;  %v438_v5 = vld [vmem:[%s4860_s11 + $0x10] sm:$0xff]  ;;  %s2778_s21 = sshll.u32 %s5768_s30, 4  ;;  %s5835_s24 = scalar_lea.hbm %s5892_s5, %s3020_s25  ;;  %s5837_s21 = int_to_ptr.vmem [resolvable:$true] %s2778_s21 }
  0xbd   : > { %v439_v6 = vld [vmem:[%s4860_s11 + $0x18] sm:$0xff]  ;;  %v3757_v7 = vpack.c.bf16 %v453_v4, %v452_v2  ;;  %v454_v9 = vld [vmem:[%s4860_s11 + $0x90] sm:$0xff]  ;;  %v440_v12 = vld [vmem:[%s4860_s11 + $0x20] sm:$0xff]  ;;  %s5845_s27 = scalar_lea.sflag [#allocation4], %s297_s1  ;;  %s4461_s12 = scalar_lea.vmem %s5837_s21, 8192 }
  0xbe   : > { %v3729_v8 = vpack.c.bf16 %v439_v6, %v438_v5  ;;  %v455_v10 = vld [vmem:[%s4860_s11 + $0x98] sm:$0xff]  ;;  %3726 = vmatprep.subr.bf16.mxu0 %v3725_v3  ;;  %v441_v13 = vld [vmem:[%s4860_s11 + $0x28] sm:$0xff]  ;;  %v456_v14 = vld [vmem:[%s4860_s11 + $0xa0] sm:$0xff]  ;;  %p4462_p7 = scmp.ne.s32.totalorder %s5837_s21, %s4461_s12  ;;  %p6044_p1 = scmp.ne.s32.totalorder %s5959_s16, 0 }
  0xbf   : > { %v3761_v11 = vpack.c.bf16 %v455_v10, %v454_v9  ;;  %3758 = vmatprep.subr.bf16.mxu1 %v3757_v7  ;;  %3728 = vmatpush3.bf16.xpose.msra.mxu0 %v3725_v3  ;;  %v457_v15 = vld [vmem:[%s4860_s11 + $0xa8] sm:$0xff]  ;;  %v3733_v16 = vpack.c.bf16 %v441_v13, %v440_v12  ;;  %v372_v18 = vld [vmem:[%s4853_s20] sm:$0xff]  ;;  %v442_v22 = vld [vmem:[%s4860_s11 + $0x30] sm:$0xff]  ;;  %s4548_s23 = smov [#allocation11]  }
  0xc0   : > { %3760 = vmatpush3.bf16.xpose.msra.mxu1 %v3757_v7  ;;  %3730 = vmatprep.subr.bf16.mxu0 %v3729_v8  ;;  %v3765_v17 = vpack.c.bf16 %v457_v15, %v456_v14  ;;  %v644_v19 = vmul.f32 0.088388346, %v372_v18  ;;  %v388_v20 = vld [vmem:[%s4853_s20 + $0x80] sm:$0xff]  ;;  %v443_v23 = vld [vmem:[%s4860_s11 + $0x38] sm:$0xff]  ;;  %v458_v24 = vld [vmem:[%s4860_s11 + $0xb0] sm:$0xff]  ;;  %p4463_p3 = pnand %p4462_p7, %p6044_p1  ;;  %s4465_s7 = sshll.u32 %s4548_s23, 4  ;;  %s4466_s7 = int_to_ptr.vmem [resolvable:$false] %s4465_s7 }
  0xc1   : > { %3762 = vmatprep.subr.bf16.mxu1 %v3761_v11  ;;  %v660_v21 = vmul.f32 0.088388346, %v388_v20  ;;  %v459_v25 = vld [vmem:[%s4860_s11 + $0xb8] sm:$0xff]  ;;  %v3737_v26 = vpack.c.bf16 %v443_v23, %v442_v22  ;;  %v444_v28 = vld [vmem:[%s4860_s11 + $0x40] sm:$0xff]  ;;  %v445_v29 = vld [vmem:[%s4860_s11 + $0x48] sm:$0xff]  ;;  %s4467_s14 = scalar_lea.vmem %s4466_s7, 16384  ;;  %p4468_p11 = scmp.lt.s32.totalorder %s5837_s21, %s4466_s7 }
  0xc2   : > { %3309 = vmatprep.mubr.f32.mxu0 %v644_v19  ;;  %v3769_v27 = vpack.c.bf16 %v459_v25, %v458_v24  ;;  %v460_v30 = vld [vmem:[%s4860_s11 + $0xc0] sm:$0xff]  ;;  %v461_v31 = vld [vmem:[%s4860_s11 + $0xc8] sm:$0xff]  ;;  %v3741_v32 = vpack.c.bf16 %v445_v29, %v444_v28  ;;  %v446_v34 = vld [vmem:[%s4860_s11 + $0x50] sm:$0xff]  ;;  %p4464_p5 = pneg %p4463_p3  ;;  %p4469_p4 = scmp.lt.s32.totalorder %s4467_s14, %s4461_s12 }
  0xc3   : > { %3365 = vmatprep.mubr.f32.mxu1 %v660_v21  ;;  %v3773_v33 = vpack.c.bf16 %v461_v31, %v460_v30  ;;  %v447_v35 = vld [vmem:[%s4860_s11 + $0x58] sm:$0xff]  ;;  %v462_v36 = vld [vmem:[%s4860_s11 + $0xd0] sm:$0xff]  ;;  %v448_v40 = vld [vmem:[%s4860_s11 + $0x60] sm:$0xff] }
  0xc4   : > { %v463_v37 = vld [vmem:[%s4860_s11 + $0xd8] sm:$0xff]  ;;  %v3745_v38 = vpack.c.bf16 %v447_v35, %v446_v34  ;;  %v449_v41 = vld [vmem:[%s4860_s11 + $0x68] sm:$0xff]  ;;  %v464_v42 = vld [vmem:[%s4860_s11 + $0xe0] sm:$0xff]  ;;  %p4470_p6 = por %p4469_p4, %p4468_p11 }
  0xc5   : > { %v3777_v39 = vpack.c.bf16 %v463_v37, %v462_v36  ;;  %v465_v43 = vld [vmem:[%s4860_s11 + $0xe8] sm:$0xff]  ;;  %v3749_v44 = vpack.c.bf16 %v449_v41, %v448_v40  ;;  %v450_v46 = vld [vmem:[%s4860_s11 + $0x70] sm:$0xff]  ;;  %v451_v47 = vld [vmem:[%s4860_s11 + $0x78] sm:$0xff] }
  0xc6   : > { %v3781_v45 = vpack.c.bf16 %v465_v43, %v464_v42  ;;  %v466_v48 = vld [vmem:[%s4860_s11 + $0xf0] sm:$0xff]  ;;  %v467_v49 = vld [vmem:[%s4860_s11 + $0xf8] sm:$0xff]  ;;  %v3753_v50 = vpack.c.bf16 %v451_v47, %v450_v46  ;;  %v468_v52 = vld [vmem:[%s4860_s11 + $0x100] sm:$0xff]  ;;  %p4471_p2 = pnand %p4470_p6, %p4464_p5 }
  0xc7   : > { %3732 = vmatpush3.bf16.xpose.msra.mxu0 %v3729_v8  ;;  %v3785_v51 = vpack.c.bf16 %v467_v49, %v466_v48  ;;  %v469_v53 = vld [vmem:[%s4860_s11 + $0x108] sm:$0xff]  ;;  %v484_v54 = vld [vmem:[%s4860_s11 + $0x180] sm:$0xff]  ;;  %v374_v60 = vld [vmem:[%s4853_s20 + $0x10] sm:$0xff] }
  0xc8   : > { %3764 = vmatpush3.bf16.xpose.msra.mxu1 %v3761_v11  ;;  %3734 = vmatprep.subr.bf16.mxu0 %v3733_v16  ;;  %v485_v55 = vld [vmem:[%s4860_s11 + $0x188] sm:$0xff]  ;;  %v3789_v56 = vpack.c.bf16 %v469_v53, %v468_v52  ;;  %v390_v62 = vld [vmem:[%s4853_s20 + $0x90] sm:$0xff]  ;;  %v471_v0 = vld [vmem:[%s4860_s11 + $0x118] sm:$0xff]  ;;  %v646_v5 = vmul.f32 0.088388346, %v374_v60 }
  0xc9   : > { %3766 = vmatprep.subr.bf16.mxu1 %v3765_v17  ;;  %v3821_v57 = vpack.c.bf16 %v485_v55, %v484_v54  ;;  %v373_v58 = vld [vmem:[%s4853_s20 + $0x8] sm:$0xff]  ;;  %v470_v63 = vld [vmem:[%s4860_s11 + $0x110] sm:$0xff]  ;;  %v375_v2 = vld [vmem:[%s4853_s20 + $0x18] sm:$0xff]  ;;  %v662_v8 = vmul.f32 0.088388346, %v390_v62 }
  0xca   : > { %v389_v59 = vld [vmem:[%s4853_s20 + $0x88] sm:$0xff]  ;;  %v645_v61 = vmul.f32 0.088388346, %v373_v58  ;;  %v486_v3 = vld [vmem:[%s4860_s11 + $0x190] sm:$0xff]  ;;  %v487_v4 = vld [vmem:[%s4860_s11 + $0x198] sm:$0xff]  ;;  %v3793_v9 = vpack.c.bf16 %v471_v0, %v470_v63 }
  0xcb   : > { %v661_v1 = vmul.f32 0.088388346, %v389_v59  ;;  %v391_v6 = vld [vmem:[%s4853_s20 + $0x98] sm:$0xff]  ;;  %v376_v7 = vld [vmem:[%s4853_s20 + $0x20] sm:$0xff]  ;;  %v647_v11 = vmul.f32 0.088388346, %v375_v2  ;;  %v3825_v12 = vpack.c.bf16 %v487_v4, %v486_v3 }
  0xcc   : > { %v392_v10 = vld [vmem:[%s4853_s20 + $0xa0] sm:$0xff]  ;;  %v663_v13 = vmul.f32 0.088388346, %v391_v6  ;;  %v648_v14 = vmul.f32 0.088388346, %v376_v7  ;;  %v377_v15 = vld [vmem:[%s4853_s20 + $0x28] sm:$0xff] }
  0xcd   : > { %v472_v18 = vld [vmem:[%s4860_s11 + $0x120] sm:$0xff]  ;;  %v473_v19 = vld [vmem:[%s4860_s11 + $0x128] sm:$0xff]  ;;  %v649_v20 = vmul.f32 0.088388346, %v377_v15  ;;  %v378_v23 = vld [vmem:[%s4853_s20 + $0x30] sm:$0xff] }
  0xce   : > { %v488_v21 = vld [vmem:[%s4860_s11 + $0x1a0] sm:$0xff]  ;;  %v489_v22 = vld [vmem:[%s4860_s11 + $0x1a8] sm:$0xff]  ;;  %v394_v25 = vld [vmem:[%s4853_s20 + $0xb0] sm:$0xff]  ;;  %v650_v31 = vmul.f32 0.088388346, %v378_v23 }
  0xcf   : > { %3736 = vmatpush3.bf16.xpose.msra.mxu0 %v3733_v16  ;;  %v664_v16 = vmul.f32 0.088388346, %v392_v10  ;;  %v395_v28 = vld [vmem:[%s4853_s20 + $0xb8] sm:$0xff]  ;;  %v380_v29 = vld [vmem:[%s4853_s20 + $0x40] sm:$0xff]  ;;  %v3829_v30 = vpack.c.bf16 %v489_v22, %v488_v21  ;;  %v381_v37 = vld [vmem:[%s4853_s20 + $0x48] sm:$0xff] }
  0xd0   : > { %3768 = vmatpush3.bf16.xpose.msra.mxu1 %v3765_v17  ;;  %3738 = vmatprep.subr.bf16.mxu0 %v3737_v26  ;;  %v393_v17 = vld [vmem:[%s4853_s20 + $0xa8] sm:$0xff]  ;;  %v667_v35 = vmul.f32 0.088388346, %v395_v28  ;;  %v652_v36 = vmul.f32 0.088388346, %v380_v29  ;;  %v474_v40 = vld [vmem:[%s4860_s11 + $0x130] sm:$0xff] }
  0xd1   : > { %3770 = vmatprep.subr.bf16.mxu1 %v3769_v27  ;;  %v665_v24 = vmul.f32 0.088388346, %v393_v17  ;;  %v475_v41 = vld [vmem:[%s4860_s11 + $0x138] sm:$0xff]  ;;  %v490_v42 = vld [vmem:[%s4860_s11 + $0x1b0] sm:$0xff]  ;;  %v400_v54 = vld [vmem:[%s4853_s20 + $0xe0] sm:$0xff] }
  0xd2   : > { %v491_v43 = vld [vmem:[%s4860_s11 + $0x1b8] sm:$0xff]  ;;  %v398_v47 = vld [vmem:[%s4853_s20 + $0xd0] sm:$0xff]  ;;  %v3801_v49 = vpack.c.bf16 %v475_v41, %v474_v40  ;;  %v385_v59 = vld [vmem:[%s4853_s20 + $0x68] sm:$0xff]  ;;  %v672_v60 = vmul.f32 0.088388346, %v400_v54 }
  0xd3   : > { %v383_v48 = vld [vmem:[%s4853_s20 + $0x58] sm:$0xff]  ;;  %v3833_v52 = vpack.c.bf16 %v491_v43, %v490_v42  ;;  %v670_v55 = vmul.f32 0.088388346, %v398_v47  ;;  %v476_v62 = vld [vmem:[%s4860_s11 + $0x140] sm:$0xff]  ;;  %v477_v63 = vld [vmem:[%s4860_s11 + $0x148] sm:$0xff] }
  0xd4   : > { %v492_v0 = vld [vmem:[%s4860_s11 + $0x1c0] sm:$0xff]  ;;  %v657_v2 = vmul.f32 0.088388346, %v385_v59  ;;  %v386_v3 = vld [vmem:[%s4853_s20 + $0x70] sm:$0xff]  ;;  %v387_v6 = vld [vmem:[%s4853_s20 + $0x78] sm:$0xff]  ;;  %v3805_v7 = vpack.c.bf16 %v477_v63, %v476_v62 }
  0xd5   : > { %v495_v21 = vld [vmem:[%s4860_s11 + $0x1d8] sm:$0xff]  ;;  %v424_v47 = vld [vmem:[%s4853_s20 + $0x1a0] sm:$0xff]  ;;  %v410_v54 = vld [vmem:[%s4853_s20 + $0x130] sm:$0xff] }
  0xd6   : > { %v407_v43 = vld [vmem:[%s4853_s20 + $0x118] sm:$0xff]  ;;  %v412_v62 = vld [vmem:[%s4853_s20 + $0x140] sm:$0xff] }
  0xd7   : > { %3740 = vmatpush3.bf16.xpose.msra.mxu0 %v3737_v26  ;;  %v379_v26 = vld [vmem:[%s4853_s20 + $0x38] sm:$0xff]  ;;  %v428_v63 = vld [vmem:[%s4853_s20 + $0x1c0] sm:$0xff] }
  0xd8   : > { %3772 = vmatpush3.bf16.xpose.msra.mxu1 %v3769_v27  ;;  %3742 = vmatprep.subr.bf16.mxu0 %v3741_v32  ;;  %v3797_v27 = vpack.c.bf16 %v473_v19, %v472_v18  ;;  %v651_v34 = vmul.f32 0.088388346, %v379_v26  ;;  %v478_v18 = vld [vmem:[%s4860_s11 + $0x150] sm:$0xff]  ;;  %v479_v19 = vld [vmem:[%s4860_s11 + $0x158] sm:$0xff]  ;;  %v496_v26 = vld [vmem:[%s4860_s11 + $0x1e0] sm:$0xff] }
  0xd9   : > { %3774 = vmatprep.subr.bf16.mxu1 %v3773_v33  ;;  %v3809_v22 = vpack.c.bf16 %v479_v19, %v478_v18  ;;  %v411_v59 = vld [vmem:[%s4853_s20 + $0x138] sm:$0xff]  ;;  %v417_v19 = vld [vmem:[%s4853_s20 + $0x168] sm:$0xff] }
  0xdf   : > { %3744 = vmatpush3.bf16.xpose.msra.mxu0 %v3741_v32  ;;  %v396_v32 = vld [vmem:[%s4853_s20 + $0xc0] sm:$0xff] }
  0xe0   : > { %3776 = vmatpush3.bf16.xpose.msra.mxu1 %v3773_v33  ;;  %3746 = vmatprep.subr.bf16.mxu0 %v3745_v38  ;;  %v666_v33 = vmul.f32 0.088388346, %v394_v25  ;;  %v481_v25 = vld [vmem:[%s4860_s11 + $0x168] sm:$0xff] }
  0xe1   : > { %3778 = vmatprep.subr.bf16.mxu1 %v3777_v39 }
  0xe7   : > { %3748 = vmatpush3.bf16.xpose.msra.mxu0 %v3745_v38  ;;  %v668_v38 = vmul.f32 0.088388346, %v396_v32  ;;  %v498_v32 = vld [vmem:[%s4860_s11 + $0x1f0] sm:$0xff] }
  0xe8   : > { %3780 = vmatpush3.bf16.xpose.msra.mxu1 %v3777_v39  ;;  %3750 = vmatprep.subr.bf16.mxu0 %v3749_v44  ;;  %v397_v39 = vld [vmem:[%s4853_s20 + $0xc8] sm:$0xff] }
  0xe9   : > { %3782 = vmatprep.subr.bf16.mxu1 %v3781_v45  ;;  %v669_v46 = vmul.f32 0.088388346, %v397_v39  ;;  %v422_v39 = vld [vmem:[%s4853_s20 + $0x190] sm:$0xff] }
  0xef   : > { %3752 = vmatpush3.bf16.xpose.msra.mxu0 %v3749_v44  ;;  %v653_v44 = vmul.f32 0.088388346, %v381_v37  ;;  %v421_v37 = vld [vmem:[%s4853_s20 + $0x188] sm:$0xff] }
  0xf0   : > { %3784 = vmatpush3.bf16.xpose.msra.mxu1 %v3781_v45  ;;  %3754 = vmatprep.subr.bf16.mxu0 %v3753_v50  ;;  %v382_v45 = vld [vmem:[%s4853_s20 + $0x50] sm:$0xff]  ;;  %v693_v41 = vmul.f32 0.088388346, %v421_v37 }
  0xf1   : > { %3786 = vmatprep.subr.bf16.mxu1 %v3785_v51  ;;  %v654_v53 = vmul.f32 0.088388346, %v382_v45  ;;  %v423_v45 = vld [vmem:[%s4853_s20 + $0x198] sm:$0xff] }
  0xf7   : > { %3756 = vmatpush3.bf16.xpose.msra.mxu0 %v3753_v50  ;;  %v399_v50 = vld [vmem:[%s4853_s20 + $0xd8] sm:$0xff] }
  0xf8   : > { %3788 = vmatpush3.bf16.xpose.msra.mxu1 %v3785_v51  ;;  %3790 = vmatprep.subr.bf16.mxu0 %v3789_v56  ;;  %v384_v51 = vld [vmem:[%s4853_s20 + $0x60] sm:$0xff] }
  0xf9   : > { %3822 = vmatprep.subr.bf16.mxu1 %v3821_v57  ;;  %v656_v58 = vmul.f32 0.088388346, %v384_v51  ;;  %v409_v51 = vld [vmem:[%s4853_s20 + $0x128] sm:$0xff] }
  0xfe   : > { %3310 = vmatmul.mubr.f32.vlgmr.msra.gmra.mrb[0].mxu0 %v645_v61  ;;  %v401_v61 = vld [vmem:[%s4853_s20 + $0xe8] sm:$0xff] }
  0xff   : > { %3366 = vmatmul.mubr.f32.vlgmr.msra.gmra.mrb[0].mxu1 %v661_v1  ;;  %3792 = vmatpush3.bf16.xpose.msra.mxu0 %v3789_v56  ;;  %v655_v56 = vmul.f32 0.088388346, %v383_v48  ;;  %v493_v1 = vld [vmem:[%s4860_s11 + $0x1c8] sm:$0xff]  ;;  %v673_v4 = vmul.f32 0.088388346, %v401_v61  ;;  %v427_v61 = vld [vmem:[%s4853_s20 + $0x1b8] sm:$0xff] }
 0x100   : > { %3824 = vmatpush3.bf16.xpose.msra.mxu1 %v3821_v57  ;;  %3312 = vmatprep.mubr.f32.mxu0 %v646_v5  ;;  %v671_v57 = vmul.f32 0.088388346, %v399_v50  ;;  %v402_v5 = vld [vmem:[%s4853_s20 + $0xf0] sm:$0xff]  ;;  %v3837_v10 = vpack.c.bf16 %v493_v1, %v492_v0  ;;  %v679_v48 = vmul.f32 0.088388346, %v407_v43 }
 0x101   : > { %3368 = vmatprep.mubr.f32.mxu1 %v662_v8  ;;  %3794 = vmatprep.subr.bf16.mxu0 %v3793_v9  ;;  %v403_v8 = vld [vmem:[%s4853_s20 + $0xf8] sm:$0xff]  ;;  %v683_v0 = vmul.f32 0.088388346, %v411_v59  ;;  %v699_v1 = vmul.f32 0.088388346, %v427_v61 }
 0x102   : > { %3313 = vmatmul.mubr.f32.gmra.mrb[2].mxu0 %v647_v11  ;;  %3826 = vmatprep.subr.bf16.mxu1 %v3825_v12  ;;  %v658_v11 = vmul.f32 0.088388346, %v386_v3  ;;  %v675_v15 = vmul.f32 0.088388346, %v403_v8  ;;  %v413_v3 = vld [vmem:[%s4853_s20 + $0x148] sm:$0xff] }
 0x103   : > { %3369 = vmatmul.mubr.f32.gmra.mrb[2].mxu1 %v663_v13  ;;  %3315 = vmatprep.mubr.f32.mxu0 %v648_v14  ;;  %v674_v13 = vmul.f32 0.088388346, %v402_v5  ;;  %v659_v14 = vmul.f32 0.088388346, %v387_v6  ;;  %v429_v5 = vld [vmem:[%s4853_s20 + $0x1c8] sm:$0xff]  ;;  %v414_v6 = vld [vmem:[%s4853_s20 + $0x150] sm:$0xff] }
 0x104   : > { %3371 = vmatprep.mubr.f32.mxu1 %v664_v16  ;;  %v685_v8 = vmul.f32 0.088388346, %v413_v3 }
 0x106   : > { %3316 = vmatmul.mubr.f32.gmra.mrb[4].mxu0 %v649_v20  ;;  %v494_v20 = vld [vmem:[%s4860_s11 + $0x1d0] sm:$0xff] }
 0x107   : > { %3796 = vmatpush3.bf16.xpose.msra.mxu0 %v3793_v9  ;;  %3372 = vmatmul.mubr.f32.gmra.mrb[4].mxu1 %v665_v24  ;;  %v404_v9 = vld [vmem:[%s4853_s20 + $0x100] sm:$0xff]  ;;  %v3841_v23 = vpack.c.bf16 %v495_v21, %v494_v20  ;;  %v433_v21 = vld [vmem:[%s4853_s20 + $0x1e8] sm:$0xff] }
 0x108   : > { %3828 = vmatpush3.bf16.xpose.msra.mxu1 %v3825_v12  ;;  %3798 = vmatprep.subr.bf16.mxu0 %v3797_v27  ;;  %v420_v12 = vld [vmem:[%s4853_s20 + $0x180] sm:$0xff]  ;;  %v676_v16 = vmul.f32 0.088388346, %v404_v9  ;;  %v701_v9 = vmul.f32 0.088388346, %v429_v5 }
 0x109   : > { %3830 = vmatprep.subr.bf16.mxu1 %v3829_v30  ;;  %3318 = vmatprep.mubr.f32.mxu0 %v650_v31  ;;  %v692_v17 = vmul.f32 0.088388346, %v420_v12  ;;  %v480_v24 = vld [vmem:[%s4860_s11 + $0x160] sm:$0xff]  ;;  %v483_v31 = vld [vmem:[%s4860_s11 + $0x178] sm:$0xff] }
 0x10a   : > { %3374 = vmatprep.mubr.f32.mxu1 %v666_v33  ;;  %3319 = vmatmul.mubr.f32.gmra.mrb[6].mxu0 %v651_v34  ;;  %v3813_v28 = vpack.c.bf16 %v481_v25, %v480_v24  ;;  %v499_v33 = vld [vmem:[%s4860_s11 + $0x1f8] sm:$0xff]  ;;  %v689_v24 = vmul.f32 0.088388346, %v417_v19  ;;  %v705_v25 = vmul.f32 0.088388346, %v433_v21 }
 0x10b   : > { %3375 = vmatmul.mubr.f32.gmra.mrb[6].mxu1 %v667_v35  ;;  %3321 = vmatprep.mubr.f32.mxu0 %v652_v36  ;;  %v3849_v35 = vpack.c.bf16 %v499_v33, %v498_v32  ;;  %v405_v36 = vld [vmem:[%s4853_s20 + $0x108] sm:$0xff]  ;;  %v5010_v33 = vld [vmem:[#allocation8] sm:$0xff] }
 0x10c   : > { %3377 = vmatprep.mubr.f32.mxu1 %v668_v38  ;;  %v406_v38 = vld [vmem:[%s4853_s20 + $0x110] sm:$0xff]  ;;  %v677_v40 = vmul.f32 0.088388346, %v405_v36  ;;  %v5008_v32 = vld [vmem:[#allocation8 + $0x8] sm:$0xff] }
 0x10d   : > { %v678_v42 = vmul.f32 0.088388346, %v406_v38 }
 0x10e   : > { %3322 = vmatmul.mubr.f32.gmra.mrb[8].mxu0 %v653_v44  ;;  %v694_v44 = vmul.f32 0.088388346, %v422_v39 }
 0x10f   : > { %3800 = vmatpush3.bf16.xpose.msra.mxu0 %v3797_v27  ;;  %3378 = vmatmul.mubr.f32.gmra.mrb[8].mxu1 %v669_v46  ;;  %v497_v27 = vld [vmem:[%s4860_s11 + $0x1e8] sm:$0xff]  ;;  %v408_v46 = vld [vmem:[%s4853_s20 + $0x120] sm:$0xff] }
 0x110   : > { %3832 = vmatpush3.bf16.xpose.msra.mxu1 %v3829_v30  ;;  %3802 = vmatprep.subr.bf16.mxu0 %v3801_v49  ;;  %v3845_v29 = vpack.c.bf16 %v497_v27, %v496_v26  ;;  %v482_v30 = vld [vmem:[%s4860_s11 + $0x170] sm:$0xff]  ;;  %v680_v50 = vmul.f32 0.088388346, %v408_v46  ;;  %v419_v27 = vld [vmem:[%s4853_s20 + $0x178] sm:$0xff] }
 0x111   : > { %3834 = vmatprep.subr.bf16.mxu1 %v3833_v52  ;;  %3324 = vmatprep.mubr.f32.mxu0 %v654_v53  ;;  %v3817_v34 = vpack.c.bf16 %v483_v31, %v482_v30  ;;  %v425_v53 = vld [vmem:[%s4853_s20 + $0x1a8] sm:$0xff]  ;;  %v691_v30 = vmul.f32 0.088388346, %v419_v27  ;;  %v5096_v27 = vld [vmem:[#allocation8 + $0x40] sm:$0xff] }
 0x112   : > { %3380 = vmatprep.mubr.f32.mxu1 %v670_v55  ;;  %3325 = vmatmul.mubr.f32.gmra.mrb[10].mxu0 %v655_v56  ;;  %v426_v55 = vld [vmem:[%s4853_s20 + $0x1b0] sm:$0xff]  ;;  %v681_v56 = vmul.f32 0.088388346, %v409_v51 }
 0x113   : > { %3381 = vmatmul.mubr.f32.gmra.mrb[10].mxu1 %v671_v57  ;;  %3327 = vmatprep.mubr.f32.mxu0 %v656_v58  ;;  %v697_v57 = vmul.f32 0.088388346, %v425_v53  ;;  %v682_v58 = vmul.f32 0.088388346, %v410_v54  ;;  %v5040_v54 = vld [vmem:[#allocation8 + $0x28] sm:$0xff] }
 0x114   : > { %3383 = vmatprep.mubr.f32.mxu1 %v672_v60  ;;  %v698_v60 = vmul.f32 0.088388346, %v426_v55 }
 0x116   : > { %3328 = vmatmul.mubr.f32.gmra.mrb[12].mxu0 %v657_v2  ;;  %v684_v2 = vmul.f32 0.088388346, %v412_v62 }
 0x117   : > { %3804 = vmatpush3.bf16.xpose.msra.mxu0 %v3801_v49  ;;  %3384 = vmatmul.mubr.f32.gmra.mrb[12].mxu1 %v673_v4  ;;  %v695_v49 = vmul.f32 0.088388346, %v423_v45  ;;  %v700_v4 = vmul.f32 0.088388346, %v428_v63 }
 0x118   : > { %3836 = vmatpush3.bf16.xpose.msra.mxu1 %v3833_v52  ;;  %3806 = vmatprep.subr.bf16.mxu0 %v3805_v7  ;;  %v696_v52 = vmul.f32 0.088388346, %v424_v47 }
 0x119   : > { %3838 = vmatprep.subr.bf16.mxu1 %v3837_v10  ;;  %3330 = vmatprep.mubr.f32.mxu0 %v658_v11  ;;  %v415_v11 = vld [vmem:[%s4853_s20 + $0x158] sm:$0xff] }
 0x11a   : > { %3386 = vmatprep.mubr.f32.mxu1 %v674_v13  ;;  %3331 = vmatmul.mubr.f32.gmra.mrb[14].mxu0 %v659_v14  ;;  %v431_v13 = vld [vmem:[%s4853_s20 + $0x1d8] sm:$0xff]  ;;  %v416_v14 = vld [vmem:[%s4853_s20 + $0x160] sm:$0xff] }
 0x11b   : > { %3387 = vmatmul.mubr.f32.gmra.mrb[14].mxu1 %v675_v15  ;;  %3421 = vmatprep.mubr.f32.mxu0 %v676_v16  ;;  %v432_v15 = vld [vmem:[%s4853_s20 + $0x1e0] sm:$0xff]  ;;  %v687_v16 = vmul.f32 0.088388346, %v415_v11  ;;  %v688_v18 = vmul.f32 0.088388346, %v416_v14 }
 0x11c   : > { %3477 = vmatprep.mubr.f32.mxu1 %v692_v17  ;;  %v703_v17 = vmul.f32 0.088388346, %v431_v13  ;;  %v704_v20 = vmul.f32 0.088388346, %v432_v15 }
 0x11f   : > { %3808 = vmatpush3.bf16.xpose.msra.mxu0 %v3805_v7  ;;  %v430_v7 = vld [vmem:[%s4853_s20 + $0x1d0] sm:$0xff] }
 0x120   : > { %3840 = vmatpush3.bf16.xpose.msra.mxu1 %v3837_v10  ;;  %3810 = vmatprep.subr.bf16.mxu0 %v3809_v22  ;;  %v686_v10 = vmul.f32 0.088388346, %v414_v6  ;;  %v702_v12 = vmul.f32 0.088388346, %v430_v7 }
 0x121   : > { %3842 = vmatprep.subr.bf16.mxu1 %v3841_v23 }
 0x127   : > { %3812 = vmatpush3.bf16.xpose.msra.mxu0 %v3809_v22  ;;  %v418_v22 = vld [vmem:[%s4853_s20 + $0x170] sm:$0xff] }
 0x128   : > { %3844 = vmatpush3.bf16.xpose.msra.mxu1 %v3841_v23  ;;  %3814 = vmatprep.subr.bf16.mxu0 %v3813_v28  ;;  %v434_v23 = vld [vmem:[%s4853_s20 + $0x1f0] sm:$0xff]  ;;  %v690_v26 = vmul.f32 0.088388346, %v418_v22 }
 0x129   : > { %3846 = vmatprep.subr.bf16.mxu1 %v3845_v29 }
 0x12f   : > { %3816 = vmatpush3.bf16.xpose.msra.mxu0 %v3813_v28  ;;  %v706_v28 = vmul.f32 0.088388346, %v434_v23 }
 0x130   : > { %3848 = vmatpush3.bf16.xpose.msra.mxu1 %v3845_v29  ;;  %3818 = vmatprep.subr.bf16.mxu0 %v3817_v34  ;;  %v435_v29 = vld [vmem:[%s4853_s20 + $0x1f8] sm:$0xff] }
 0x131   : > { %3850 = vmatprep.subr.bf16.mxu1 %v3849_v35  ;;  %v707_v31 = vmul.f32 0.088388346, %v435_v29 }
 0x137   : > { %3820 = vmatpush3.bf16.xpose.msra.mxu0 %v3817_v34 }
 0x138   : > { %3852 = vmatpush3.bf16.xpose.msra.mxu1 %v3849_v35 }
 0x13e   : > { %3422 = vmatmul.mubr.f32.vlgmr.msra.gmra.mrb[16].mxu0 %v677_v40  ;;  %v5020_v40 = vld [vmem:[#allocation8 + $0x18] sm:$0xff] }
 0x13f   : > { %3478 = vmatmul.mubr.f32.vlgmr.msra.gmra.mrb[16].mxu1 %v693_v41  ;;  %3424 = vmatprep.mubr.f32.mxu0 %v678_v42 }
 0x140   : > { %3480 = vmatprep.mubr.f32.mxu1 %v694_v44 }
 0x142   : > { %3425 = vmatmul.mubr.f32.gmra.mrb[18].mxu0 %v679_v48 }
 0x143   : > { %3481 = vmatmul.mubr.f32.gmra.mrb[18].mxu1 %v695_v49  ;;  %3427 = vmatprep.mubr.f32.mxu0 %v680_v50 }
 0x144   : > { %3483 = vmatprep.mubr.f32.mxu1 %v696_v52  ;;  %v5036_v52 = vld [vmem:[#allocation8 + $0x10] sm:$0xff] }
 0x146   : > { %3428 = vmatmul.mubr.f32.gmra.mrb[20].mxu0 %v681_v56 }
 0x147   : > { %3484 = vmatmul.mubr.f32.gmra.mrb[20].mxu1 %v697_v57  ;;  %3430 = vmatprep.mubr.f32.mxu0 %v682_v58 }
 0x148   : > { %3486 = vmatprep.mubr.f32.mxu1 %v698_v60 }
 0x14a   : > { %3431 = vmatmul.mubr.f32.gmra.mrb[22].mxu0 %v683_v0 }
 0x14b   : > { %3487 = vmatmul.mubr.f32.gmra.mrb[22].mxu1 %v699_v1  ;;  %3433 = vmatprep.mubr.f32.mxu0 %v684_v2  ;;  %v5056_v2 = vld [vmem:[#allocation8 + $0x20] sm:$0xff] }
 0x14c   : > { %3489 = vmatprep.mubr.f32.mxu1 %v700_v4  ;;  %v5060_v4 = vld [vmem:[#allocation8 + $0x38] sm:$0xff] }
 0x14e   : > { %3434 = vmatmul.mubr.f32.gmra.mrb[24].mxu0 %v685_v8 }
 0x14f   : > { %3490 = vmatmul.mubr.f32.gmra.mrb[24].mxu1 %v701_v9  ;;  %3436 = vmatprep.mubr.f32.mxu0 %v686_v10 }
 0x150   : > { %3492 = vmatprep.mubr.f32.mxu1 %v702_v12 }
 0x152   : > { %3437 = vmatmul.mubr.f32.gmra.mrb[26].mxu0 %v687_v16  ;;  %v5076_v16 = vld [vmem:[#allocation8 + $0x30] sm:$0xff] }
 0x153   : > { %3493 = vmatmul.mubr.f32.gmra.mrb[26].mxu1 %v703_v17  ;;  %3439 = vmatprep.mubr.f32.mxu0 %v688_v18  ;;  %v5080_v18 = vld [vmem:[#allocation8 + $0x48] sm:$0xff] }
 0x154   : > { %3495 = vmatprep.mubr.f32.mxu1 %v704_v20 }
 0x156   : > { %3440 = vmatmul.mubr.f32.gmra.mrb[28].mxu0 %v689_v24 }
 0x157   : > { %3496 = vmatmul.mubr.f32.gmra.mrb[28].mxu1 %v705_v25  ;;  %3442 = vmatprep.mubr.f32.mxu0 %v690_v26 }
 0x158   : > { %3498 = vmatprep.mubr.f32.mxu1 %v706_v28  ;;  %v5100_v28 = vld [vmem:[#allocation8 + $0x58] sm:$0xff] }
 0x15a   : > { %3443 = vmatmul.mubr.f32.gmra.mrb[30].mxu0 %v691_v30 }
 0x15b   : > { %3499 = vmatmul.mubr.f32.gmra.mrb[30].mxu1 %v707_v31 }
 0x1d1   : > { %v3311_v34 = vpop.f32.mrb[0].mxu0 }
 0x1d2   : > { %v5013_v35 = vadd.f32 %v3311_v34, %v5008_v32  ;;  %v774_v36 = vpop.f32.mrb[1].mxu0  ;;  %v3367_v37 = vpop.f32.mrb[0].mxu1 }
 0x1d3   : > { %v5016_v38 = vadd.f32 %v774_v36, %v5010_v33  ;;  %v919_v39 = vpop.f32.mrb[1].mxu1  ;;  %v5023_v42 = vadd.f32 %v3367_v37, %v5008_v32  ;;  %v5116_v36 = vld [vmem:[#allocation8 + $0x50] sm:$0xff]  ;;  %v5120_v37 = vld [vmem:[#allocation8 + $0x68] sm:$0xff] }
 0x1d4   : > { %1290 = vmax.xlane.f32.xlu1 %v5013_v35  ;;  %v5026_v45 = vadd.f32 %v919_v39, %v5010_v33 }
 0x1d5   : > { %1288 = vmax.xlane.f32.xlu0 %v5016_v38  ;;  %v3314_v41 = vpop.f32.mrb[2].mxu0 }
 0x1d6   : > { %v3370_v43 = vpop.f32.mrb[2].mxu1  ;;  %v784_v44 = vpop.f32.mrb[3].mxu0  ;;  %v5033_v48 = vadd.f32 %v3314_v41, %v5020_v40 }
 0x1d7   : > { %v929_v46 = vpop.f32.mrb[3].mxu1  ;;  %v5030_v47 = vadd.f32 %v3370_v43, %v5020_v40  ;;  %v5046_v59 = vadd.f32 %v784_v44, %v5036_v52 }
 0x1d8   : > { %1322 = vmax.xlane.f32.xlu1 %v5023_v42  ;;  %v5043_v56 = vadd.f32 %v929_v46, %v5036_v52  ;;  %v5136_v46 = vld [vmem:[#allocation8 + $0x60] sm:$0xff] }
 0x1d9   : > { %1320 = vmax.xlane.f32.xlu0 %v5026_v45  ;;  %v3317_v49 = vpop.f32.mrb[4].mxu0 }
 0x1da   : > { %v3373_v50 = vpop.f32.mrb[4].mxu1  ;;  %v794_v51 = vpop.f32.mrb[5].mxu0  ;;  %v5053_v62 = vadd.f32 %v3317_v49, %v5040_v54  ;;  %v5140_v49 = vld [vmem:[#allocation8 + $0x78] sm:$0xff] }
 0x1db   : > { %v939_v53 = vpop.f32.mrb[5].mxu1  ;;  %v5050_v61 = vadd.f32 %v3373_v50, %v5040_v54  ;;  %v5066_v9 = vadd.f32 %v794_v51, %v5056_v2 }
 0x1dc   : > { %1326 = vmax.xlane.f32.xlu1 %v5030_v47  ;;  %v5063_v6 = vadd.f32 %v939_v53, %v5056_v2 }
 0x1dd   : > { %1294 = vmax.xlane.f32.xlu0 %v5033_v48  ;;  %v3320_v55 = vpop.f32.mrb[6].mxu0 }
 0x1de   : > { %v3376_v57 = vpop.f32.mrb[6].mxu1  ;;  %v804_v58 = vpop.f32.mrb[7].mxu0  ;;  %v5073_v12 = vadd.f32 %v3320_v55, %v5060_v4 }
 0x1df   : > { %v949_v60 = vpop.f32.mrb[7].mxu1  ;;  %v5070_v11 = vadd.f32 %v3376_v57, %v5060_v4  ;;  %v5086_v23 = vadd.f32 %v804_v58, %v5076_v16  ;;  %v5156_v57 = vld [vmem:[#allocation8 + $0x70] sm:$0xff] }
 0x1e0   : > { %1324 = vmax.xlane.f32.xlu1 %v5043_v56  ;;  %v5083_v20 = vadd.f32 %v949_v60, %v5076_v16 }
 0x1e1   : > { %1292 = vmax.xlane.f32.xlu0 %v5046_v59  ;;  %v3323_v63 = vpop.f32.mrb[8].mxu0 }
 0x1e2   : > { %v3379_v0 = vpop.f32.mrb[8].mxu1  ;;  %v814_v1 = vpop.f32.mrb[9].mxu0  ;;  %v5093_v26 = vadd.f32 %v3323_v63, %v5080_v18 }
 0x1e3   : > { %v959_v3 = vpop.f32.mrb[9].mxu1  ;;  %v5090_v25 = vadd.f32 %v3379_v0, %v5080_v18  ;;  %v5106_v30 = vadd.f32 %v814_v1, %v5096_v27 }
 0x1e4   : > { %1330 = vmax.xlane.f32.xlu1 %v5050_v61  ;;  %v5103_v29 = vadd.f32 %v959_v3, %v5096_v27 }
 0x1e5   : > { %1298 = vmax.xlane.f32.xlu0 %v5053_v62  ;;  %v3326_v5 = vpop.f32.mrb[10].mxu0 }
 0x1e6   : > { %v3382_v7 = vpop.f32.mrb[10].mxu1  ;;  %v824_v8 = vpop.f32.mrb[11].mxu0  ;;  %v5113_v34 = vadd.f32 %v3326_v5, %v5100_v28 }
 0x1e7   : > { %v969_v10 = vpop.f32.mrb[11].mxu1  ;;  %v5110_v31 = vadd.f32 %v3382_v7, %v5100_v28  ;;  %v5126_v41 = vadd.f32 %v824_v8, %v5116_v36 }
 0x1e8   : > { %1328 = vmax.xlane.f32.xlu1 %v5063_v6  ;;  %v5123_v39 = vadd.f32 %v969_v10, %v5116_v36 }
 0x1e9   : > { %1296 = vmax.xlane.f32.xlu0 %v5066_v9  ;;  %v3329_v13 = vpop.f32.mrb[12].mxu0 }
 0x1ea   : > { %v3385_v14 = vpop.f32.mrb[12].mxu1  ;;  %v834_v15 = vpop.f32.mrb[13].mxu0  ;;  %v5133_v44 = vadd.f32 %v3329_v13, %v5120_v37 }
 0x1eb   : > { %v979_v17 = vpop.f32.mrb[13].mxu1  ;;  %v5130_v43 = vadd.f32 %v3385_v14, %v5120_v37  ;;  %v5146_v51 = vadd.f32 %v834_v15, %v5136_v46 }
 0x1ec   : > { %1334 = vmax.xlane.f32.xlu1 %v5070_v11  ;;  %v5143_v50 = vadd.f32 %v979_v17, %v5136_v46 }
 0x1ed   : > { %1302 = vmax.xlane.f32.xlu0 %v5073_v12  ;;  %v3332_v19 = vpop.f32.mrb[14].mxu0 }
 0x1ee   : > { %v3388_v21 = vpop.f32.mrb[14].mxu1  ;;  %v844_v22 = vpop.f32.mrb[15].mxu0  ;;  %v5153_v55 = vadd.f32 %v3332_v19, %v5140_v49 }
 0x1ef   : > { %v989_v24 = vpop.f32.mrb[15].mxu1  ;;  %v5150_v53 = vadd.f32 %v3388_v21, %v5140_v49  ;;  %v5164_v60 = vadd.f32 %v844_v22, %v5156_v57 }
 0x1f0   : > { %1332 = vmax.xlane.f32.xlu1 %v5083_v20  ;;  %v5161_v58 = vadd.f32 %v989_v24, %v5156_v57 }
 0x1f1   : > { %1300 = vmax.xlane.f32.xlu0 %v5086_v23  ;;  %5974 = vst [vmem:[#allocation22_spill] sm:$0xff] %v5164_v60 }
 0x1f4   : > { %1338 = vmax.xlane.f32.xlu1 %v5090_v25 }
 0x1f5   : > { %1306 = vmax.xlane.f32.xlu0 %v5093_v26 }
 0x1f8   : > { %1336 = vmax.xlane.f32.xlu1 %v5103_v29 }
 0x1f9   : > { %1304 = vmax.xlane.f32.xlu0 %v5106_v30 }
 0x1fc   : > { %1342 = vmax.xlane.f32.xlu1 %v5110_v31 }
 0x1fd   : > { %1310 = vmax.xlane.f32.xlu0 %v5113_v34 }
 0x200   : > { %1340 = vmax.xlane.f32.xlu1 %v5123_v39 }
 0x201   : > { %1308 = vmax.xlane.f32.xlu0 %v5126_v41 }
 0x204   : > { %1346 = vmax.xlane.f32.xlu1 %v5130_v43 }
 0x205   : > { %1314 = vmax.xlane.f32.xlu0 %v5133_v44 }
 0x208   : > { %1344 = vmax.xlane.f32.xlu1 %v5143_v50 }
 0x209   : > { %1312 = vmax.xlane.f32.xlu0 %v5146_v51 }
 0x20c   : > { %1350 = vmax.xlane.f32.xlu1 %v5150_v53 }
 0x20d   : > { %1318 = vmax.xlane.f32.xlu0 %v5153_v55 }
 0x210   : > { %1348 = vmax.xlane.f32.xlu1 %v5161_v58 }
 0x211   : > { %v3423_v63 = vpop.f32.mrb[16].mxu0  ;;  %1316 = vmax.xlane.f32.xlu0 %v5164_v60 }
 0x212   : > { %v5169_v0 = vadd.f32 %v3423_v63, %v5008_v32  ;;  %v3479_v1 = vpop.f32.mrb[16].mxu1  ;;  %v1064_v3 = vpop.f32.mrb[17].mxu0 }
 0x213   : > { %v5172_v5 = vadd.f32 %v3479_v1, %v5008_v32  ;;  %v1209_v7 = vpop.f32.mrb[17].mxu1  ;;  %v5177_v14 = vadd.f32 %v1064_v3, %v5010_v33 }
 0x214   : > { %5975 = vst [vmem:[#allocation23_spill] sm:$0xff] %v5169_v0  ;;  %v5180_v15 = vadd.f32 %v1209_v7, %v5010_v33 }
 0x215   : > { %5976 = vst [vmem:[#allocation24_spill] sm:$0xff] %v5172_v5  ;;  %1386 = vmax.xlane.f32.xlu1 %v5172_v5  ;;  %1354 = vmax.xlane.f32.xlu0 %v5169_v0  ;;  %v3426_v8 = vpop.f32.mrb[18].mxu0  ;;  %5977 = vst [vmem:[#allocation25_spill] sm:$0xff] %v5177_v14 }
 0x216   : > { %v3482_v10 = vpop.f32.mrb[18].mxu1  ;;  %v1074_v13 = vpop.f32.mrb[19].mxu0  ;;  %5978 = vst [vmem:[#allocation26_spill] sm:$0xff] %v5180_v15  ;;  %v5184_v32 = vadd.f32 %v3426_v8, %v5020_v40 }
 0x217   : > { %v1219_v17 = vpop.f32.mrb[19].mxu1  ;;  %v5187_v19 = vadd.f32 %v3482_v10, %v5020_v40  ;;  %v5193_v7 = vadd.f32 %v1074_v13, %v5036_v52 }
 0x218   : > { %5979 = vst [vmem:[#allocation27_spill] sm:$0xff] %v5184_v32  ;;  %v5196_v8 = vadd.f32 %v1219_v17, %v5036_v52 }
 0x219   : > { %1384 = vmax.xlane.f32.xlu1 %v5180_v15  ;;  %5980 = vst [vmem:[#allocation28_spill] sm:$0xff] %v5187_v19  ;;  %1352 = vmax.xlane.f32.xlu0 %v5177_v14  ;;  %v3429_v21 = vpop.f32.mrb[20].mxu0  ;;  %5981 = vst [vmem:[#allocation29_spill] sm:$0xff] %v5193_v7 }
 0x21a   : > { %v3485_v22 = vpop.f32.mrb[20].mxu1  ;;  %v1084_v24 = vpop.f32.mrb[21].mxu0  ;;  %5982 = vst [vmem:[#allocation30_spill] sm:$0xff] %v5196_v8  ;;  %v5200_v10 = vadd.f32 %v3429_v21, %v5040_v54 }
 0x21b   : > { %v1229_v63 = vpop.f32.mrb[21].mxu1  ;;  %v5203_v14 = vadd.f32 %v3485_v22, %v5040_v54 }
 0x21c   : > { %5983 = vst [vmem:[#allocation31_spill] sm:$0xff] %v5200_v10  ;;  %v5212_v21 = vadd.f32 %v1229_v63, %v5056_v2 }
 0x21d   : > { %1390 = vmax.xlane.f32.xlu1 %v5187_v19  ;;  %1358 = vmax.xlane.f32.xlu0 %v5184_v32  ;;  %v3432_v33 = vpop.f32.mrb[22].mxu0  ;;  %5984 = vst [vmem:[#allocation32_spill] sm:$0xff] %v5203_v14 }
 0x21e   : > { %v3488_v1 = vpop.f32.mrb[22].mxu1  ;;  %v1094_v3 = vpop.f32.mrb[23].mxu0  ;;  %5986 = vst [vmem:[#allocation34_spill] sm:$0xff] %v5212_v21  ;;  %v5216_v22 = vadd.f32 %v3432_v33, %v5060_v4 }
 0x21f   : > { %v1239_v40 = vpop.f32.mrb[23].mxu1 }
 0x220   : > { %v5228_v33 = vadd.f32 %v1239_v40, %v5076_v16 }
 0x221   : > { %1388 = vmax.xlane.f32.xlu1 %v5196_v8  ;;  %1356 = vmax.xlane.f32.xlu0 %v5193_v7  ;;  %v3435_v32 = vpop.f32.mrb[24].mxu0  ;;  %v5209_v8 = vadd.f32 %v1084_v24, %v5056_v2  ;;  %v5219_v7 = vadd.f32 %v3488_v1, %v5060_v4 }
 0x222   : > { %v3491_v19 = vpop.f32.mrb[24].mxu1  ;;  %v1104_v15 = vpop.f32.mrb[25].mxu0  ;;  %v5232_v1 = vadd.f32 %v3435_v32, %v5080_v18 }
 0x223   : > { %v1249_v0 = vpop.f32.mrb[25].mxu1  ;;  %5985 = vst [vmem:[#allocation33_spill] sm:$0xff] %v5209_v8 }
 0x225   : > { %1394 = vmax.xlane.f32.xlu1 %v5203_v14  ;;  %1362 = vmax.xlane.f32.xlu0 %v5200_v10  ;;  %v3438_v52 = vpop.f32.mrb[26].mxu0 }
 0x226   : > { %v3494_v13 = vpop.f32.mrb[26].mxu1  ;;  %v1114_v17 = vpop.f32.mrb[27].mxu0  ;;  %v5248_v32 = vadd.f32 %v3438_v52, %v5100_v28 }
 0x227   : > { %v1259_v54 = vpop.f32.mrb[27].mxu1 }
 0x229   : > { %1392 = vmax.xlane.f32.xlu1 %v5212_v21  ;;  %1360 = vmax.xlane.f32.xlu0 %v5209_v8  ;;  %v3441_v10 = vpop.f32.mrb[28].mxu0  ;;  %v5225_v21 = vadd.f32 %v1094_v3, %v5076_v16  ;;  %v5235_v8 = vadd.f32 %v3491_v19, %v5080_v18  ;;  %v5241_v3 = vadd.f32 %v1104_v15, %v5096_v27 }
 0x22a   : > { %v3497_v14 = vpop.f32.mrb[28].mxu1  ;;  %v1124_v5 = vpop.f32.mrb[29].mxu0  ;;  %v5244_v16 = vadd.f32 %v1249_v0, %v5096_v27  ;;  %v5251_v18 = vadd.f32 %v3494_v13, %v5100_v28  ;;  %v5257_v15 = vadd.f32 %v1114_v17, %v5116_v36  ;;  %v5260_v27 = vadd.f32 %v1259_v54, %v5116_v36 }
 0x22b   : > { %v1269_v60 = vpop.f32.mrb[29].mxu1  ;;  %v5264_v0 = vadd.f32 %v3441_v10, %v5120_v37  ;;  %v5267_v28 = vadd.f32 %v3497_v14, %v5120_v37  ;;  %v5273_v19 = vadd.f32 %v1124_v5, %v5136_v46 }
 0x22c   : > { %v5276_v36 = vadd.f32 %v1269_v60, %v5136_v46 }
 0x22d   : > { %1398 = vmax.xlane.f32.xlu1 %v5219_v7  ;;  %1366 = vmax.xlane.f32.xlu0 %v5216_v22  ;;  %v3444_v2 = vpop.f32.mrb[30].mxu0 }
 0x22e   : > { %v3500_v24 = vpop.f32.mrb[30].mxu1  ;;  %v1134_v63 = vpop.f32.mrb[31].mxu0  ;;  %v5280_v40 = vadd.f32 %v3444_v2, %v5140_v49 }
 0x22f   : > { %v1279_v4 = vpop.f32.mrb[31].mxu1  ;;  %v5283_v37 = vadd.f32 %v3500_v24, %v5140_v49  ;;  %v5289_v5 = vadd.f32 %v1134_v63, %v5156_v57 }
 0x230   : > { %v5292_v46 = vadd.f32 %v1279_v4, %v5156_v57 }
 0x231   : > { %1396 = vmax.xlane.f32.xlu1 %v5228_v33  ;;  %1364 = vmax.xlane.f32.xlu0 %v5225_v21 }
 0x235   : > { %1402 = vmax.xlane.f32.xlu1 %v5235_v8  ;;  %1370 = vmax.xlane.f32.xlu0 %v5232_v1 }
 0x239   : > { %1400 = vmax.xlane.f32.xlu1 %v5244_v16  ;;  %1368 = vmax.xlane.f32.xlu0 %v5241_v3 }
 0x23d   : > { %1406 = vmax.xlane.f32.xlu1 %v5251_v18  ;;  %1374 = vmax.xlane.f32.xlu0 %v5248_v32 }
 0x241   : > { %1404 = vmax.xlane.f32.xlu1 %v5260_v27  ;;  %1372 = vmax.xlane.f32.xlu0 %v5257_v15 }
 0x245   : > { %1410 = vmax.xlane.f32.xlu1 %v5267_v28  ;;  %1378 = vmax.xlane.f32.xlu0 %v5264_v0 }
 0x249   : > { %1408 = vmax.xlane.f32.xlu1 %v5276_v36  ;;  %1376 = vmax.xlane.f32.xlu0 %v5273_v19 }
 0x24d   : > { %1414 = vmax.xlane.f32.xlu1 %v5283_v37  ;;  %1382 = vmax.xlane.f32.xlu0 %v5280_v40 }
 0x251   : > { %1412 = vmax.xlane.f32.xlu1 %v5292_v46  ;;  %1380 = vmax.xlane.f32.xlu0 %v5289_v5 }
 0x261   : > { %v1291_v60 = vpop.xlane.xlu1 %1290 }
 0x262   : > { %v1417_v49 = vsub.f32 %v5013_v35, %v1291_v60  ;;  %v1289_v14 = vpop.xlane.xlu0 %1288 }
 0x263   : > { %v1416_v10 = vsub.f32 %v5016_v38, %v1289_v14 }
 0x264   : > { %v1482_v52 = vmul.f32 1.442695, %v1417_v49 }
 0x265   : > { %v1480_v13 = vmul.f32 1.442695, %v1416_v10  ;;  %v1323_v17 = vpop.xlane.xlu1 %1322 }
 0x266   : > { %4057 = vpow2.f32 %v1482_v52  ;;  %v1433_v54 = vsub.f32 %v5023_v42, %v1323_v17  ;;  %v1321_v2 = vpop.xlane.xlu0 %1320 }
 0x267   : > { %v1432_v57 = vsub.f32 %v5026_v45, %v1321_v2  ;;  %4059 = vpow2.f32 %v1480_v13 }
 0x268   : > { %v1514_v24 = vmul.f32 1.442695, %v1433_v54  ;;  %v501_v54 = vld [vmem:[%s4867_s6 + $0x8] sm:$0xff] }
 0x269   : > { %v1327_v63 = vpop.xlane.xlu1 %1326  ;;  %v1512_v4 = vmul.f32 1.442695, %v1432_v57 }
 0x26a   : > { %4061 = vpow2.f32 %v1514_v24  ;;  %v1435_v35 = vsub.f32 %v5030_v47, %v1327_v63  ;;  %v1295_v60 = vpop.xlane.xlu0 %1294 }
 0x26b   : > { %v1419_v38 = vsub.f32 %v5033_v48, %v1295_v60  ;;  %4063 = vpow2.f32 %v1512_v4  ;;  %v500_v48 = vld [vmem:[%s4867_s6] sm:$0xff]  ;;  %v502_v4 = vld [vmem:[%s4867_s6 + $0x10] sm:$0xff] }
 0x26c   : > { %v1518_v10 = vmul.f32 1.442695, %v1435_v35  ;;  %v3853_v24 = vpack.c.bf16 %v501_v54, %v500_v48  ;;  %v503_v35 = vld [vmem:[%s4867_s6 + $0x18] sm:$0xff]  ;;  %v516_v60 = vld [vmem:[%s4867_s6 + $0x80] sm:$0xff] }
 0x26d   : > { %v1486_v49 = vmul.f32 1.442695, %v1419_v38  ;;  %v1325_v14 = vpop.xlane.xlu1 %1324 }
 0x26e   : > { %v1434_v42 = vsub.f32 %v5043_v56, %v1325_v14  ;;  %v1293_v52 = vpop.xlane.xlu0 %1292  ;;  %3854 = vmatprep.subr.bf16.mxu0 %v3853_v24  ;;  %v517_v14 = vld [vmem:[%s4867_s6 + $0x88] sm:$0xff] }
 0x26f   : > { %4065 = vpow2.f32 %v1486_v49  ;;  %v1418_v45 = vsub.f32 %v5046_v59, %v1293_v52  ;;  %v3857_v49 = vpack.c.bf16 %v503_v35, %v502_v4  ;;  %3856 = vmatpush3.bf16.msra.mxu0 %v3853_v24 }
 0x270   : > { %v5304_v13 = vpop.eup %4057  ;;  %4067 = vpow2.f32 %v1518_v10  ;;  %v1516_v56 = vmul.f32 1.442695, %v1434_v42  ;;  %v504_v10 = vld [vmem:[%s4867_s6 + $0x20] sm:$0xff]  ;;  %v505_v42 = vld [vmem:[%s4867_s6 + $0x28] sm:$0xff] }
 0x271   : > { %v1484_v47 = vmul.f32 1.442695, %v1418_v45  ;;  %v1331_v17 = vpop.xlane.xlu1 %1330  ;;  %1610 = vadd.xlane.f32.xlu0 %v5304_v13  ;;  %v5310_v59 = vpop.eup %4059  ;;  %v3885_v45 = vpack.c.bf16 %v517_v14, %v516_v60  ;;  %3858 = vmatprep.subr.bf16.mxu0 %v3857_v49 }
 0x272   : > { %v1437_v2 = vsub.f32 %v5050_v61, %v1331_v17  ;;  %v1299_v57 = vpop.xlane.xlu0 %1298 }
 0x273   : > { %4069 = vpow2.f32 %v1484_v47  ;;  %v1421_v63 = vsub.f32 %v5053_v62, %v1299_v57  ;;  %v518_v47 = vld [vmem:[%s4867_s6 + $0x90] sm:$0xff]  ;;  %v519_v62 = vld [vmem:[%s4867_s6 + $0x98] sm:$0xff]  ;;  %3886 = vmatprep.subr.bf16.mxu1 %v3885_v45  ;;  %3860 = vmatpush3.bf16.msra.mxu0 %v3857_v49 }
 0x274   : > { %v5316_v38 = vpop.eup %4061  ;;  %4071 = vpow2.f32 %v1516_v56  ;;  %v1522_v17 = vmul.f32 1.442695, %v1437_v2  ;;  %v3889_v57 = vpack.c.bf16 %v519_v62, %v518_v47  ;;  %3888 = vmatpush3.bf16.msra.mxu1 %v3885_v45  ;;  %v520_v45 = vld [vmem:[%s4867_s6 + $0xa0] sm:$0xff] }
 0x275   : > { %5987 = vst [vmem:[#allocation35_spill] sm:$0xff] %v5316_v38  ;;  %v1490_v61 = vmul.f32 1.442695, %v1421_v63  ;;  %1642 = vadd.xlane.f32.xlu1 %v5316_v38  ;;  %v1329_v52 = vpop.xlane.xlu1 %1328  ;;  %1608 = vadd.xlane.f32.xlu0 %v5310_v59  ;;  %v3861_v63 = vpack.c.bf16 %v505_v42, %v504_v10  ;;  %v5327_v35 = vpop.eup %4063 }
 0x276   : > { %v1436_v48 = vsub.f32 %v5063_v6, %v1329_v52  ;;  %v1297_v54 = vpop.xlane.xlu0 %1296  ;;  %3890 = vmatprep.subr.bf16.mxu1 %v3889_v57  ;;  %v506_v52 = vld [vmem:[%s4867_s6 + $0x30] sm:$0xff] }
 0x277   : > { %4073 = vpow2.f32 %v1490_v61  ;;  %v1420_v4 = vsub.f32 %v5066_v9, %v1297_v54  ;;  %3862 = vmatprep.subr.bf16.mxu0 %v3861_v63 }
 0x278   : > { %4075 = vpow2.f32 %v1522_v17  ;;  %v1520_v6 = vmul.f32 1.442695, %v1436_v48  ;;  %3892 = vmatpush3.bf16.msra.mxu1 %v3889_v57  ;;  %3864 = vmatpush3.bf16.msra.mxu0 %v3861_v63  ;;  %v521_v17 = vld [vmem:[%s4867_s6 + $0xa8] sm:$0xff]  ;;  %v522_v63 = vld [vmem:[%s4867_s6 + $0xb0] sm:$0xff] }
 0x279   : > { %v5329_v38 = vpop.eup %4065  ;;  %v1488_v60 = vmul.f32 1.442695, %v1420_v4  ;;  %v1335_v14 = vpop.xlane.xlu1 %1334  ;;  %1640 = vadd.xlane.f32.xlu1 %v5327_v35  ;;  %v3893_v54 = vpack.c.bf16 %v521_v17, %v520_v45 }
 0x27a   : > { %v1439_v9 = vsub.f32 %v5070_v11, %v1335_v14  ;;  %1614 = vadd.xlane.f32.xlu0 %v5329_v38  ;;  %v1303_v56 = vpop.xlane.xlu0 %1302  ;;  %v5335_v24 = vpop.eup %4067  ;;  %v507_v11 = vld [vmem:[%s4867_s6 + $0x38] sm:$0xff]  ;;  %v508_v14 = vld [vmem:[%s4867_s6 + $0x40] sm:$0xff] }
 0x27b   : > { %4077 = vpow2.f32 %v1488_v60  ;;  %v1423_v2 = vsub.f32 %v5073_v12, %v1303_v56  ;;  %v3865_v62 = vpack.c.bf16 %v507_v11, %v506_v52  ;;  %3894 = vmatprep.subr.bf16.mxu1 %v3893_v54 }
 0x27c   : > { %4079 = vpow2.f32 %v1520_v6  ;;  %v1526_v47 = vmul.f32 1.442695, %v1439_v9  ;;  %v509_v6 = vld [vmem:[%s4867_s6 + $0x48] sm:$0xff]  ;;  %3896 = vmatpush3.bf16.msra.mxu1 %v3893_v54 }
 0x27d   : > { %v5337_v10 = vpop.eup %4069  ;;  %v1494_v42 = vmul.f32 1.442695, %v1423_v2  ;;  %v1333_v61 = vpop.xlane.xlu1 %1332  ;;  %1646 = vadd.xlane.f32.xlu1 %v5335_v24  ;;  %3866 = vmatprep.subr.bf16.mxu0 %v3865_v62  ;;  %v3869_v2 = vpack.c.bf16 %v509_v6, %v508_v14 }
 0x27e   : > { %v1438_v49 = vsub.f32 %v5083_v20, %v1333_v61  ;;  %1612 = vadd.xlane.f32.xlu0 %v5337_v10  ;;  %v1301_v12 = vpop.xlane.xlu0 %1300  ;;  %v5347_v57 = vpop.eup %4071  ;;  %3868 = vmatpush3.bf16.msra.mxu0 %v3865_v62  ;;  %v524_v62 = vld [vmem:[%s4867_s6 + $0xc0] sm:$0xff] }
 0x27f   : > { %4081 = vpow2.f32 %v1494_v42  ;;  %v1422_v48 = vsub.f32 %v5086_v23, %v1301_v12  ;;  %v523_v42 = vld [vmem:[%s4867_s6 + $0xb8] sm:$0xff]  ;;  %3870 = vmatprep.subr.bf16.mxu0 %v3869_v2 }
 0x280   : > { %4083 = vpow2.f32 %v1526_v47  ;;  %v1524_v9 = vmul.f32 1.442695, %v1438_v49  ;;  %v3897_v52 = vpack.c.bf16 %v523_v42, %v522_v63  ;;  %v510_v49 = vld [vmem:[%s4867_s6 + $0x50] sm:$0xff]  ;;  %v511_v12 = vld [vmem:[%s4867_s6 + $0x58] sm:$0xff] }
 0x281   : > { %v5349_v4 = vpop.eup %4073  ;;  %v1492_v20 = vmul.f32 1.442695, %v1422_v48  ;;  %v1339_v60 = vpop.xlane.xlu1 %1338  ;;  %1644 = vadd.xlane.f32.xlu1 %v5347_v57  ;;  %v3873_v54 = vpack.c.bf16 %v511_v12, %v510_v49 }
 0x282   : > { %v1441_v56 = vsub.f32 %v5090_v25, %v1339_v60  ;;  %1618 = vadd.xlane.f32.xlu0 %v5349_v4  ;;  %v1307_v23 = vpop.xlane.xlu0 %1306  ;;  %v5359_v11 = vpop.eup %4075  ;;  %3898 = vmatprep.subr.bf16.mxu1 %v3897_v52 }
 0x283   : > { %4085 = vpow2.f32 %v1492_v20  ;;  %v1425_v61 = vsub.f32 %v5093_v26, %v1307_v23  ;;  %3872 = vmatpush3.bf16.msra.mxu0 %v3869_v2  ;;  %v525_v20 = vld [vmem:[%s4867_s6 + $0xc8] sm:$0xff]  ;;  %3900 = vmatpush3.bf16.msra.mxu1 %v3897_v52  ;;  %v526_v2 = vld [vmem:[%s4867_s6 + $0xd0] sm:$0xff] }
 0x284   : > { %4087 = vpow2.f32 %v1524_v9  ;;  %v1530_v17 = vmul.f32 1.442695, %v1441_v56  ;;  %v3901_v14 = vpack.c.bf16 %v525_v20, %v524_v62  ;;  %3874 = vmatprep.subr.bf16.mxu0 %v3873_v54  ;;  %v512_v56 = vld [vmem:[%s4867_s6 + $0x60] sm:$0xff]  ;;  %v513_v23 = vld [vmem:[%s4867_s6 + $0x68] sm:$0xff] }
 0x285   : > { %v5361_v45 = vpop.eup %4077  ;;  %v1498_v25 = vmul.f32 1.442695, %v1425_v61  ;;  %v1337_v47 = vpop.xlane.xlu1 %1336  ;;  %1650 = vadd.xlane.f32.xlu1 %v5359_v11  ;;  %v3877_v52 = vpack.c.bf16 %v513_v23, %v512_v56 }
 0x286   : > { %v1440_v26 = vsub.f32 %v5103_v29, %v1337_v47  ;;  %1616 = vadd.xlane.f32.xlu0 %v5361_v45  ;;  %v1305_v48 = vpop.xlane.xlu0 %1304  ;;  %v5371_v6 = vpop.eup %4079  ;;  %3902 = vmatprep.subr.bf16.mxu1 %v3901_v14 }
 0x287   : > { %4089 = vpow2.f32 %v1498_v25  ;;  %v1424_v60 = vsub.f32 %v5106_v30, %v1305_v48  ;;  %3876 = vmatpush3.bf16.msra.mxu0 %v3873_v54  ;;  %v527_v25 = vld [vmem:[%s4867_s6 + $0xd8] sm:$0xff]  ;;  %3904 = vmatpush3.bf16.msra.mxu1 %v3901_v14  ;;  %v528_v54 = vld [vmem:[%s4867_s6 + $0xe0] sm:$0xff] }
 0x288   : > { %4091 = vpow2.f32 %v1530_v17  ;;  %v1528_v42 = vmul.f32 1.442695, %v1440_v26  ;;  %v3905_v49 = vpack.c.bf16 %v527_v25, %v526_v2  ;;  %3878 = vmatprep.subr.bf16.mxu0 %v3877_v52  ;;  %v514_v26 = vld [vmem:[%s4867_s6 + $0x70] sm:$0xff]  ;;  %v515_v48 = vld [vmem:[%s4867_s6 + $0x78] sm:$0xff] }
 0x289   : > { %v5373_v63 = vpop.eup %4081  ;;  %v1496_v29 = vmul.f32 1.442695, %v1424_v60  ;;  %v1343_v9 = vpop.xlane.xlu1 %1342  ;;  %1648 = vadd.xlane.f32.xlu1 %v5371_v6  ;;  %v3881_v14 = vpack.c.bf16 %v515_v48, %v514_v26 }
 0x28a   : > { %v1443_v30 = vsub.f32 %v5110_v31, %v1343_v9  ;;  %1622 = vadd.xlane.f32.xlu0 %v5373_v63  ;;  %v1311_v61 = vpop.xlane.xlu0 %1310  ;;  %v5383_v12 = vpop.eup %4083  ;;  %3906 = vmatprep.subr.bf16.mxu1 %v3905_v49 }
 0x28b   : > { %4093 = vpow2.f32 %v1496_v29  ;;  %v1427_v47 = vsub.f32 %v5113_v34, %v1311_v61  ;;  %3880 = vmatpush3.bf16.msra.mxu0 %v3877_v52  ;;  %v529_v29 = vld [vmem:[%s4867_s6 + $0xe8] sm:$0xff]  ;;  %3908 = vmatpush3.bf16.msra.mxu1 %v3905_v49  ;;  %v531_v61 = vld [vmem:[%s4867_s6 + $0xf8] sm:$0xff] }
 0x28c   : > { %4095 = vpow2.f32 %v1528_v42  ;;  %v1534_v20 = vmul.f32 1.442695, %v1443_v30  ;;  %v3909_v56 = vpack.c.bf16 %v529_v29, %v528_v54  ;;  %3882 = vmatprep.subr.bf16.mxu0 %v3881_v14  ;;  %v530_v30 = vld [vmem:[%s4867_s6 + $0xf0] sm:$0xff] }
 0x28d   : > { %v5385_v62 = vpop.eup %4085  ;;  %v1502_v31 = vmul.f32 1.442695, %v1427_v47  ;;  %v1341_v17 = vpop.xlane.xlu1 %1340  ;;  %1654 = vadd.xlane.f32.xlu1 %v5383_v12  ;;  %v3913_v47 = vpack.c.bf16 %v531_v61, %v530_v30 }
 0x28e   : > { %v1442_v34 = vsub.f32 %v5123_v39, %v1341_v17  ;;  %1620 = vadd.xlane.f32.xlu0 %v5385_v62  ;;  %v1309_v60 = vpop.xlane.xlu0 %1308  ;;  %v5395_v23 = vpop.eup %4087  ;;  %3910 = vmatprep.subr.bf16.mxu1 %v3909_v56 }
 0x28f   : > { %4097 = vpow2.f32 %v1502_v31  ;;  %v1426_v9 = vsub.f32 %v5126_v41, %v1309_v60  ;;  %3884 = vmatpush3.bf16.msra.mxu0 %v3881_v14  ;;  %3912 = vmatpush3.bf16.msra.mxu1 %v3909_v56 }
 0x290   : > { %4099 = vpow2.f32 %v1534_v20  ;;  %v1532_v52 = vmul.f32 1.442695, %v1442_v34  ;;  %3914 = vmatprep.subr.bf16.mxu1 %v3913_v47 }
 0x291   : > { %v5397_v2 = vpop.eup %4089  ;;  %v1500_v42 = vmul.f32 1.442695, %v1426_v9  ;;  %v1347_v39 = vpop.xlane.xlu1 %1346  ;;  %1652 = vadd.xlane.f32.xlu1 %v5395_v23 }
 0x292   : > { %v1445_v25 = vsub.f32 %v5130_v43, %v1347_v39  ;;  %1626 = vadd.xlane.f32.xlu0 %v5397_v2  ;;  %v1315_v41 = vpop.xlane.xlu0 %1314  ;;  %v5405_v31 = vpop.eup %4091 }
 0x293   : > { %4101 = vpow2.f32 %v1500_v42  ;;  %v1429_v49 = vsub.f32 %v5133_v44, %v1315_v41  ;;  %3916 = vmatpush3.bf16.msra.mxu1 %v3913_v47  ;;  %v5988_v41 = vld [vmem:[#allocation22_spill] sm:$0xff] }
 0x294   : > { %4103 = vpow2.f32 %v1532_v52  ;;  %v1538_v43 = vmul.f32 1.442695, %v1445_v25 }
 0x295   : > { %v5407_v17 = vpop.eup %4093  ;;  %v1506_v26 = vmul.f32 1.442695, %v1429_v49  ;;  %v1345_v48 = vpop.xlane.xlu1 %1344  ;;  %1658 = vadd.xlane.f32.xlu1 %v5405_v31 }
 0x296   : > { %v1444_v54 = vsub.f32 %v5143_v50, %v1345_v48  ;;  %1624 = vadd.xlane.f32.xlu0 %v5407_v17  ;;  %v1313_v20 = vpop.xlane.xlu0 %1312  ;;  %v5413_v34 = vpop.eup %4095 }
 0x297   : > { %4105 = vpow2.f32 %v1506_v26  ;;  %v1428_v44 = vsub.f32 %v5146_v51, %v1313_v20 }
 0x298   : > { %4107 = vpow2.f32 %v1538_v43  ;;  %v1536_v9 = vmul.f32 1.442695, %v1444_v54 }
 0x299   : > { %v5415_v60 = vpop.eup %4097  ;;  %v1504_v14 = vmul.f32 1.442695, %v1428_v44  ;;  %v1351_v29 = vpop.xlane.xlu1 %1350  ;;  %1656 = vadd.xlane.f32.xlu1 %v5413_v34  ;;  %v5990_v44 = vld [vmem:[#allocation23_spill] sm:$0xff] }
 0x29a   : > { %v1447_v56 = vsub.f32 %v5150_v53, %v1351_v29  ;;  %1630 = vadd.xlane.f32.xlu0 %v5415_v60  ;;  %v1319_v50 = vpop.xlane.xlu0 %1318  ;;  %v5421_v51 = vpop.eup %4099 }
 0x29b   : > { %4109 = vpow2.f32 %v1504_v14  ;;  %v1431_v42 = vsub.f32 %v5153_v55, %v1319_v50 }
 0x29c   : > { %4111 = vpow2.f32 %v1536_v9  ;;  %v1542_v52 = vmul.f32 1.442695, %v1447_v56 }
 0x29d   : > { %v5423_v39 = vpop.eup %4101  ;;  %v1510_v30 = vmul.f32 1.442695, %v1431_v42  ;;  %v1349_v61 = vpop.xlane.xlu1 %1348  ;;  %1662 = vadd.xlane.f32.xlu1 %v5421_v51 }
 0x29e   : > { %v1446_v25 = vsub.f32 %v5161_v58, %v1349_v61  ;;  %1628 = vadd.xlane.f32.xlu0 %v5423_v39  ;;  %v1317_v53 = vpop.xlane.xlu0 %1316  ;;  %v5429_v49 = vpop.eup %4103  ;;  %v5989_v58 = vld [vmem:[#allocation24_spill] sm:$0xff]  ;;  %v5992_v61 = vld [vmem:[#allocation26_spill] sm:$0xff] }
 0x29f   : > { %4113 = vpow2.f32 %v1510_v30  ;;  %v1430_v47 = vsub.f32 %v5988_v41, %v1317_v53 }
 0x2a0   : > { %4115 = vpow2.f32 %v1542_v52  ;;  %v1540_v48 = vmul.f32 1.442695, %v1446_v25  ;;  %v5993_v25 = vld [vmem:[#allocation25_spill] sm:$0xff] }
 0x2a1   : > { %v5431_v55 = vpop.eup %4105  ;;  %v1508_v26 = vmul.f32 1.442695, %v1430_v47  ;;  %1660 = vadd.xlane.f32.xlu1 %v5429_v49 }
 0x2a2   : > { %v1387_v43 = vpop.xlane.xlu1 %1386  ;;  %1634 = vadd.xlane.f32.xlu0 %v5431_v55  ;;  %v1355_v54 = vpop.xlane.xlu0 %1354 }
 0x2a3   : > { %4117 = vpow2.f32 %v1508_v26  ;;  %v1465_v20 = vsub.f32 %v5989_v58, %v1387_v43  ;;  %v1449_v14 = vsub.f32 %v5990_v44, %v1355_v54  ;;  %v5437_v29 = vpop.eup %4107  ;;  %v5996_v58 = vld [vmem:[#allocation28_spill] sm:$0xff]  ;;  %v5997_v44 = vld [vmem:[#allocation27_spill] sm:$0xff] }
 0x2a4   : > { %5991 = vst [vmem:[#allocation22_spill] sm:$0xff] %v5437_v29  ;;  %4119 = vpow2.f32 %v1540_v48 }
 0x2a5   : > { %v5439_v9 = vpop.eup %4109  ;;  %v1546_v56 = vmul.f32 1.442695, %v1449_v14  ;;  %1666 = vadd.xlane.f32.xlu1 %v5437_v29  ;;  %v1578_v50 = vmul.f32 1.442695, %v1465_v20 }
 0x2a6   : > { %v1385_v42 = vpop.xlane.xlu1 %1384  ;;  %1632 = vadd.xlane.f32.xlu0 %v5439_v9  ;;  %v1353_v30 = vpop.xlane.xlu0 %1352 }
 0x2a7   : > { %v1464_v52 = vsub.f32 %v5992_v61, %v1385_v42  ;;  %v1448_v53 = vsub.f32 %v5993_v25, %v1353_v30  ;;  %v5445_v41 = vpop.eup %4111  ;;  %4121 = vpow2.f32 %v1546_v56  ;;  %v6000_v25 = vld [vmem:[#allocation30_spill] sm:$0xff] }
 0x2a8   : > { %5994 = vst [vmem:[#allocation24_spill] sm:$0xff] %v5445_v41  ;;  %4123 = vpow2.f32 %v1578_v50 }
 0x2a9   : > { %v5447_v47 = vpop.eup %4113  ;;  %v1544_v26 = vmul.f32 1.442695, %v1448_v53  ;;  %1664 = vadd.xlane.f32.xlu1 %v5445_v41  ;;  %v1576_v43 = vmul.f32 1.442695, %v1464_v52 }
 0x2aa   : > { %5995 = vst [vmem:[#allocation23_spill] sm:$0xff] %v5447_v47  ;;  %v1391_v48 = vpop.xlane.xlu1 %1390  ;;  %1638 = vadd.xlane.f32.xlu0 %v5447_v47  ;;  %v1359_v54 = vpop.xlane.xlu0 %1358  ;;  %v533_v47 = vld [vmem:[%s4867_s6 + $0x108] sm:$0xff] }
 0x2ab   : > { %v1467_v20 = vsub.f32 %v5996_v58, %v1391_v48  ;;  %v1451_v14 = vsub.f32 %v5997_v44, %v1359_v54  ;;  %v5453_v42 = vpop.eup %4115  ;;  %4125 = vpow2.f32 %v1544_v26  ;;  %v6001_v48 = vld [vmem:[#allocation29_spill] sm:$0xff] }
 0x2ac   : > { %5998 = vst [vmem:[#allocation26_spill] sm:$0xff] %v5453_v42  ;;  %4127 = vpow2.f32 %v1576_v43 }
 0x2ad   : > { %v5455_v30 = vpop.eup %4117  ;;  %v1550_v56 = vmul.f32 1.442695, %v1451_v14  ;;  %1670 = vadd.xlane.f32.xlu1 %v5453_v42  ;;  %v1582_v50 = vmul.f32 1.442695, %v1467_v20  ;;  %v532_v42 = vld [vmem:[%s4867_s6 + $0x100] sm:$0xff] }
 0x2ae   : > { %5999 = vst [vmem:[#allocation25_spill] sm:$0xff] %v5455_v30  ;;  %v1389_v61 = vpop.xlane.xlu1 %1388  ;;  %1636 = vadd.xlane.f32.xlu0 %v5455_v30  ;;  %v1357_v52 = vpop.xlane.xlu0 %1356  ;;  %v6004_v30 = vld [vmem:[#allocation32_spill] sm:$0xff] }
 0x2af   : > { %v1466_v53 = vsub.f32 %v6000_v25, %v1389_v61  ;;  %v1450_v54 = vsub.f32 %v6001_v48, %v1357_v52  ;;  %v5461_v58 = vpop.eup %4119  ;;  %4129 = vpow2.f32 %v1550_v56  ;;  %v6005_v52 = vld [vmem:[#allocation31_spill] sm:$0xff]  ;;  %v5473_v48 = vpack.c.bf16 %v533_v47, %v532_v42 }
 0x2b0   : > { %6002 = vst [vmem:[#allocation28_spill] sm:$0xff] %v5461_v58  ;;  %4131 = vpow2.f32 %v1582_v50  ;;  %v548_v50 = vld [vmem:[%s4867_s6 + $0x180] sm:$0xff] }
 0x2b1   : > { %v1548_v26 = vmul.f32 1.442695, %v1450_v54  ;;  %1668 = vadd.xlane.f32.xlu1 %v5461_v58  ;;  %v5464_v44 = vpop.eup %4121  ;;  %v1580_v43 = vmul.f32 1.442695, %v1466_v53  ;;  %3918 = vmatprep.subr.bf16.mxu0 %v5473_v48 }
 0x2b2   : > { %6003 = vst [vmem:[#allocation27_spill] sm:$0xff] %v5464_v44  ;;  %v1395_v20 = vpop.xlane.xlu1 %1394  ;;  %v1363_v14 = vpop.xlane.xlu0 %1362  ;;  %1674 = vadd.xlane.f32.xlu0 %v5464_v44 }
 0x2b3   : > { %v1469_v61 = vsub.f32 %v6004_v30, %v1395_v20  ;;  %v1453_v25 = vsub.f32 %v6005_v52, %v1363_v14  ;;  %v5471_v56 = vpop.eup %4123  ;;  %4133 = vpow2.f32 %v1548_v26  ;;  %v549_v30 = vld [vmem:[%s4867_s6 + $0x188] sm:$0xff]  ;;  %v6007_v20 = vld [vmem:[#allocation34_spill] sm:$0xff]  ;;  %v6008_v26 = vld [vmem:[#allocation33_spill] sm:$0xff] }
 0x2b4   : > { %6006 = vst [vmem:[#allocation30_spill] sm:$0xff] %v5471_v56  ;;  %4135 = vpow2.f32 %v1580_v43  ;;  %v5486_v52 = vpack.c.bf16 %v549_v30, %v548_v50 }
 0x2b5   : > { %v1554_v54 = vmul.f32 1.442695, %v1453_v25  ;;  %1706 = vadd.xlane.f32.xlu1 %v5471_v56  ;;  %v5477_v53 = vpop.eup %4125  ;;  %v1586_v58 = vmul.f32 1.442695, %v1469_v61 }
 0x2b6   : > { %v1393_v29 = vpop.xlane.xlu1 %1392  ;;  %v1361_v41 = vpop.xlane.xlu0 %1360  ;;  %1672 = vadd.xlane.f32.xlu0 %v5477_v53  ;;  %3950 = vmatprep.subr.bf16.mxu1 %v5486_v52 }
 0x2b7   : > { %v1468_v14 = vsub.f32 %v6007_v20, %v1393_v29  ;;  %v1452_v47 = vsub.f32 %v6008_v26, %v1361_v41  ;;  %v5484_v42 = vpop.eup %4127  ;;  %4137 = vpow2.f32 %v1554_v54 }
 0x2b8   : > { %4139 = vpow2.f32 %v1586_v58 }
 0x2b9   : > { %v1552_v25 = vmul.f32 1.442695, %v1452_v47  ;;  %1704 = vadd.xlane.f32.xlu1 %v5484_v42  ;;  %v5489_v43 = vpop.eup %4129  ;;  %v1584_v61 = vmul.f32 1.442695, %v1468_v14 }
 0x2ba   : > { %v1399_v56 = vpop.xlane.xlu1 %1398  ;;  %v1367_v44 = vpop.xlane.xlu0 %1366  ;;  %1678 = vadd.xlane.f32.xlu0 %v5489_v43 }
 0x2bb   : > { %v1471_v29 = vsub.f32 %v5219_v7, %v1399_v56  ;;  %v1455_v41 = vsub.f32 %v5216_v22, %v1367_v44  ;;  %v5495_v54 = vpop.eup %4131  ;;  %4141 = vpow2.f32 %v1552_v25 }
 0x2bc   : > { %4143 = vpow2.f32 %v1584_v61 }
 0x2bd   : > { %v1558_v50 = vmul.f32 1.442695, %v1455_v41  ;;  %1710 = vadd.xlane.f32.xlu1 %v5495_v54  ;;  %v5498_v30 = vpop.eup %4133  ;;  %v1590_v58 = vmul.f32 1.442695, %v1471_v29 }
 0x2be   : > { %v1397_v20 = vpop.xlane.xlu1 %1396  ;;  %v1365_v14 = vpop.xlane.xlu0 %1364  ;;  %1676 = vadd.xlane.f32.xlu0 %v5498_v30 }
 0x2bf   : > { %v1470_v26 = vsub.f32 %v5228_v33, %v1397_v20  ;;  %v1454_v7 = vsub.f32 %v5225_v21, %v1365_v14  ;;  %v5503_v56 = vpop.eup %4135  ;;  %4145 = vpow2.f32 %v1558_v50 }
 0x2c0   : > { %4147 = vpow2.f32 %v1590_v58 }
 0x2c1   : > { %v1556_v22 = vmul.f32 1.442695, %v1454_v7  ;;  %1708 = vadd.xlane.f32.xlu1 %v5503_v56  ;;  %v5506_v44 = vpop.eup %4137  ;;  %v1588_v47 = vmul.f32 1.442695, %v1470_v26 }
 0x2c2   : > { %v1403_v25 = vpop.xlane.xlu1 %1402  ;;  %v1371_v61 = vpop.xlane.xlu0 %1370  ;;  %1682 = vadd.xlane.f32.xlu0 %v5506_v44 }
 0x2c3   : > { %v1473_v29 = vsub.f32 %v5235_v8, %v1403_v25  ;;  %v1457_v33 = vsub.f32 %v5232_v1, %v1371_v61  ;;  %v5511_v41 = vpop.eup %4139  ;;  %4149 = vpow2.f32 %v1556_v22 }
 0x2c4   : > { %4151 = vpow2.f32 %v1588_v47 }
 0x2c5   : > { %v1562_v21 = vmul.f32 1.442695, %v1457_v33  ;;  %1714 = vadd.xlane.f32.xlu1 %v5511_v41  ;;  %v5514_v50 = vpop.eup %4141  ;;  %v1594_v20 = vmul.f32 1.442695, %v1473_v29 }
 0x2c6   : > { %v1401_v58 = vpop.xlane.xlu1 %1400  ;;  %v1369_v14 = vpop.xlane.xlu0 %1368  ;;  %1680 = vadd.xlane.f32.xlu0 %v5514_v50 }
 0x2c7   : > { %v1472_v26 = vsub.f32 %v5244_v16, %v1401_v58  ;;  %v1456_v8 = vsub.f32 %v5241_v3, %v1369_v14  ;;  %v5519_v7 = vpop.eup %4143  ;;  %4153 = vpow2.f32 %v1562_v21 }
 0x2c8   : > { %4155 = vpow2.f32 %v1594_v20 }
 0x2c9   : > { %v1560_v1 = vmul.f32 1.442695, %v1456_v8  ;;  %1712 = vadd.xlane.f32.xlu1 %v5519_v7  ;;  %v5522_v22 = vpop.eup %4145  ;;  %v1592_v25 = vmul.f32 1.442695, %v1472_v26 }
 0x2ca   : > { %v1407_v47 = vpop.xlane.xlu1 %1406  ;;  %v1375_v61 = vpop.xlane.xlu0 %1374  ;;  %1686 = vadd.xlane.f32.xlu0 %v5522_v22 }
 0x2cb   : > { %v1475_v29 = vsub.f32 %v5251_v18, %v1407_v47  ;;  %v1459_v16 = vsub.f32 %v5248_v32, %v1375_v61  ;;  %v5527_v33 = vpop.eup %4147  ;;  %4157 = vpow2.f32 %v1560_v1 }
 0x2cc   : > { %4159 = vpow2.f32 %v1592_v25 }
 0x2cd   : > { %v1566_v3 = vmul.f32 1.442695, %v1459_v16  ;;  %1718 = vadd.xlane.f32.xlu1 %v5527_v33  ;;  %v5530_v21 = vpop.eup %4149  ;;  %v1598_v58 = vmul.f32 1.442695, %v1475_v29 }
 0x2ce   : > { %v1405_v20 = vpop.xlane.xlu1 %1404  ;;  %v1373_v14 = vpop.xlane.xlu0 %1372  ;;  %1684 = vadd.xlane.f32.xlu0 %v5530_v21 }
 0x2cf   : > { %v1474_v26 = vsub.f32 %v5260_v27, %v1405_v20  ;;  %v1458_v18 = vsub.f32 %v5257_v15, %v1373_v14  ;;  %v5535_v8 = vpop.eup %4151  ;;  %4161 = vpow2.f32 %v1566_v3 }
 0x2d0   : > { %4163 = vpow2.f32 %v1598_v58 }
 0x2d1   : > { %v1564_v32 = vmul.f32 1.442695, %v1458_v18  ;;  %1716 = vadd.xlane.f32.xlu1 %v5535_v8  ;;  %v5538_v1 = vpop.eup %4153  ;;  %v1596_v47 = vmul.f32 1.442695, %v1474_v26 }
 0x2d2   : > { %v1411_v25 = vpop.xlane.xlu1 %1410  ;;  %v1379_v61 = vpop.xlane.xlu0 %1378  ;;  %1690 = vadd.xlane.f32.xlu0 %v5538_v1 }
 0x2d3   : > { %v1477_v29 = vsub.f32 %v5267_v28, %v1411_v25  ;;  %v1461_v27 = vsub.f32 %v5264_v0, %v1379_v61  ;;  %v5543_v16 = vpop.eup %4155  ;;  %4165 = vpow2.f32 %v1564_v32 }
 0x2d4   : > { %6009 = vst [vmem:[#allocation29_spill] sm:$0xff] %v5543_v16  ;;  %4167 = vpow2.f32 %v1596_v47 }
 0x2d5   : > { %v1570_v15 = vmul.f32 1.442695, %v1461_v27  ;;  %1722 = vadd.xlane.f32.xlu1 %v5543_v16  ;;  %v5546_v3 = vpop.eup %4157  ;;  %v1602_v20 = vmul.f32 1.442695, %v1477_v29 }
 0x2d6   : > { %v1409_v58 = vpop.xlane.xlu1 %1408  ;;  %v1377_v14 = vpop.xlane.xlu0 %1376  ;;  %1688 = vadd.xlane.f32.xlu0 %v5546_v3 }
 0x2d7   : > { %v1476_v26 = vsub.f32 %v5276_v36, %v1409_v58  ;;  %v1460_v28 = vsub.f32 %v5273_v19, %v1377_v14  ;;  %v5551_v18 = vpop.eup %4159  ;;  %4169 = vpow2.f32 %v1570_v15 }
 0x2d8   : > { %4171 = vpow2.f32 %v1602_v20 }
 0x2d9   : > { %v1568_v0 = vmul.f32 1.442695, %v1460_v28  ;;  %1720 = vadd.xlane.f32.xlu1 %v5551_v18  ;;  %v5554_v32 = vpop.eup %4161  ;;  %v1600_v25 = vmul.f32 1.442695, %v1476_v26 }
 0x2da   : > { %6010 = vst [vmem:[#allocation32_spill] sm:$0xff] %v5554_v32  ;;  %v1415_v47 = vpop.xlane.xlu1 %1414  ;;  %v1383_v61 = vpop.xlane.xlu0 %1382  ;;  %1694 = vadd.xlane.f32.xlu0 %v5554_v32  ;;  %v550_v32 = vld [vmem:[%s4867_s6 + $0x190] sm:$0xff] }
 0x2db   : > { %v5557_v29 = vpop.eup %4163  ;;  %4173 = vpow2.f32 %v1568_v0  ;;  %v1479_v15 = vsub.f32 %v5283_v37, %v1415_v47  ;;  %v1463_v26 = vsub.f32 %v5280_v40, %v1383_v61 }
 0x2dc   : > { %6011 = vst [vmem:[#allocation31_spill] sm:$0xff] %v5557_v29  ;;  %4175 = vpow2.f32 %v1600_v25 }
 0x2dd   : > { %1726 = vadd.xlane.f32.xlu1 %v5557_v29  ;;  %v5560_v19 = vpop.eup %4165  ;;  %v1606_v25 = vmul.f32 1.442695, %v1479_v15 }
 0x2de   : > { %6012 = vst [vmem:[#allocation34_spill] sm:$0xff] %v5560_v19  ;;  %v1413_v36 = vpop.xlane.xlu1 %1412  ;;  %v1381_v27 = vpop.xlane.xlu0 %1380  ;;  %1692 = vadd.xlane.f32.xlu0 %v5560_v19  ;;  %v551_v19 = vld [vmem:[%s4867_s6 + $0x198] sm:$0xff] }
 0x2df   : > { %v1478_v58 = vsub.f32 %v5292_v46, %v1413_v36  ;;  %v1462_v20 = vsub.f32 %v5289_v5, %v1381_v27  ;;  %v5566_v14 = vpop.eup %4167  ;;  %v1574_v46 = vmul.f32 1.442695, %v1463_v26 }
 0x2e0   : > { %6013 = vst [vmem:[#allocation33_spill] sm:$0xff] %v5566_v14 }
 0x2e1   : > { %v1604_v28 = vmul.f32 1.442695, %v1478_v58  ;;  %v1572_v0 = vmul.f32 1.442695, %v1462_v20  ;;  %1724 = vadd.xlane.f32.xlu1 %v5566_v14  ;;  %v5570_v29 = vpop.eup %4169 }
 0x2e2   : > { %6014 = vst [vmem:[#allocation36_spill] sm:$0xff] %v5570_v29  ;;  %1698 = vadd.xlane.f32.xlu0 %v5570_v29  ;;  %v5573_v37 = vpop.eup %4171 }
 0x2e3   : > { %4177 = vpow2.f32 %v1604_v28  ;;  %6015 = vst [vmem:[#allocation37_spill] sm:$0xff] %v5573_v37 }
 0x2e4   : > { %4179 = vpow2.f32 %v1572_v0 }
 0x2e5   : > { %1730 = vadd.xlane.f32.xlu1 %v5573_v37  ;;  %v5576_v5 = vpop.eup %4173  ;;  %4181 = vpow2.f32 %v1606_v25  ;;  %v535_v37 = vld [vmem:[%s4867_s6 + $0x118] sm:$0xff] }
 0x2e6   : > { %6016 = vst [vmem:[#allocation38_spill] sm:$0xff] %v5576_v5  ;;  %1696 = vadd.xlane.f32.xlu0 %v5576_v5  ;;  %v5579_v40 = vpop.eup %4175  ;;  %4183 = vpow2.f32 %v1574_v46 }
 0x2e7   : > { %6017 = vst [vmem:[#allocation39_spill] sm:$0xff] %v5579_v40 }
 0x2e9   : > { %1728 = vadd.xlane.f32.xlu1 %v5579_v40  ;;  %v596_v40 = vld [vmem:[%s4874_s0 + $0x80] sm:$0xff] }
 0x2ea   : > { %vm1944_vm2 = vcmp.ge.s32.totalorder %v596_v40, 2576980378  ;;  %v3953_v40 = vpack.c.bf16 %v551_v19, %v550_v32 }
 0x2ed   : > { %v5582_v47 = vpop.eup %4177 }
 0x2ee   : > { %6018 = vst [vmem:[#allocation40_spill] sm:$0xff] %v5582_v47  ;;  %v5584_v61 = vpop.eup %4179  ;;  %1732 = vadd.xlane.f32.xlu1 %v5582_v47  ;;  %v581_v47 = vld [vmem:[%s4874_s0 + $0x8] sm:$0xff] }
 0x2ef   : > { %6019 = vst [vmem:[#allocation41_spill] sm:$0xff] %v5584_v61  ;;  %1700 = vadd.xlane.f32.xlu0 %v5584_v61  ;;  %v5588_v36 = vpop.eup %4181  ;;  %vm1929_vm1 = vcmp.ge.s32.totalorder %v581_v47, 2576980378  ;;  %v552_v47 = vld [vmem:[%s4867_s6 + $0x1a0] sm:$0xff] }
 0x2f0   : > { %6020 = vst [vmem:[#allocation42_spill] sm:$0xff] %v5588_v36  ;;  %v5590_v27 = vpop.eup %4183 }
 0x2f1   : > { %6021 = vst [vmem:[#allocation43_spill] sm:$0xff] %v5590_v27 }
 0x2f2   : > { %1734 = vadd.xlane.f32.xlu1 %v5588_v36  ;;  %v580_v36 = vld [vmem:[%s4874_s0] sm:$0xff] }
 0x2f3   : > { %1702 = vadd.xlane.f32.xlu0 %v5590_v27  ;;  %vm1928_vm0 = vcmp.ge.s32.totalorder %v580_v36, 2576980378 }
 0x2fe   : > { %v1611_v15 = vpop.xlane.xlu0 %1610 }
 0x2ff   : > { %4185 = vrcp.f32 %v1611_v15 }
 0x302   : > { %v1643_v58 = vpop.xlane.xlu1 %1642  ;;  %v1609_v20 = vpop.xlane.xlu0 %1608 }
 0x303   : > { %4187 = vrcp.f32 %v1643_v58 }
 0x304   : > { %4189 = vrcp.f32 %v1609_v20 }
 0x306   : > { %v1641_v26 = vpop.xlane.xlu1 %1640 }
 0x307   : > { %4191 = vrcp.f32 %v1641_v26  ;;  %v1615_v28 = vpop.xlane.xlu0 %1614 }
 0x308   : > { %4193 = vrcp.f32 %v1615_v28  ;;  %v534_v28 = vld [vmem:[%s4867_s6 + $0x110] sm:$0xff] }
 0x309   : > { %v4186_v25 = vpop.eup %4185  ;;  %v3921_v14 = vpack.c.bf16 %v535_v37, %v534_v28  ;;  %v583_v28 = vld [vmem:[%s4874_s0 + $0x18] sm:$0xff] }
 0x30a   : > { %v1647_v0 = vpop.xlane.xlu1 %1646  ;;  %v1865_v61 = vmul.f32 1.1111112, %v4186_v25  ;;  %v597_v25 = vld [vmem:[%s4874_s0 + $0x88] sm:$0xff]  ;;  %vm1931_vm5 = vcmp.ge.s32.totalorder %v583_v28, 2576980378 }
 0x30b   : > { %4195 = vrcp.f32 %v1647_v0  ;;  %v1613_v46 = vpop.xlane.xlu0 %1612  ;;  %vm1945_vm3 = vcmp.ge.s32.totalorder %v597_v25, 2576980378 }
 0x30c   : > { %4197 = vrcp.f32 %v1613_v46  ;;  %v1993_v5 = vmul.f32 %v5304_v13, %v1865_v61  ;;  %v582_v61 = vld [vmem:[%s4874_s0 + $0x10] sm:$0xff] }
 0x30d   : > { %v4188_v27 = vpop.eup %4187  ;;  %vm1930_vm4 = vcmp.ge.s32.totalorder %v582_v61, 2576980378 }
 0x30e   : > { %v4190_v15 = vpop.eup %4189  ;;  %v1645_v58 = vpop.xlane.xlu1 %1644  ;;  %v1881_v0 = vmul.f32 1.1111112, %v4188_v27 }
 0x30f   : > { %v1864_v20 = vmul.f32 1.1111112, %v4190_v15  ;;  %4199 = vrcp.f32 %v1645_v58  ;;  %v1619_v26 = vpop.xlane.xlu0 %1618 }
 0x310   : > { %4201 = vrcp.f32 %v1619_v26 }
 0x311   : > { %v4192_v29 = vpop.eup %4191  ;;  %v1992_v46 = vmul.f32 %v5310_v59, %v1864_v20  ;;  %v536_v59 = vld [vmem:[%s4867_s6 + $0x120] sm:$0xff]  ;;  %v537_v20 = vld [vmem:[%s4867_s6 + $0x128] sm:$0xff] }
 0x312   : > { %v1880_v15 = vmul.f32 1.1111112, %v4192_v29  ;;  %v1651_v58 = vpop.xlane.xlu1 %1650  ;;  %v4194_v16 = vpop.eup %4193  ;;  %v6022_v29 = vld [vmem:[#allocation35_spill] sm:$0xff] }
 0x313   : > { %4203 = vrcp.f32 %v1651_v58  ;;  %3533 = vmatprep.mubr.msk.f32.mxu0 %vm1928_vm0, %v1992_v46  ;;  %v1617_v27 = vpop.xlane.xlu0 %1616  ;;  %v2009_v37 = vmul.f32 %v6022_v29, %v1881_v0  ;;  %v1867_v46 = vmul.f32 1.1111112, %v4194_v16  ;;  %v539_v29 = vld [vmem:[%s4867_s6 + $0x138] sm:$0xff] }
 0x314   : > { %v2008_v26 = vmul.f32 %v5327_v35, %v1880_v15  ;;  %3534 = vmatmul.mubr.msk.f32.vlgmr.msra.gmra.mrb[32].mxu0 %vm1929_vm1, %v1993_v5  ;;  %4205 = vrcp.f32 %v1617_v27  ;;  %v3925_v5 = vpack.c.bf16 %v537_v20, %v536_v59  ;;  %v553_v15 = vld [vmem:[%s4867_s6 + $0x1a8] sm:$0xff]  ;;  %v538_v27 = vld [vmem:[%s4867_s6 + $0x130] sm:$0xff]  ;;  %v599_v59 = vld [vmem:[%s4874_s0 + $0x98] sm:$0xff] }
 0x315   : > { %v4196_v13 = vpop.eup %4195  ;;  %3920 = vmatpush3.bf16.msra.mxu0 %v5473_v48  ;;  %v598_v48 = vld [vmem:[%s4874_s0 + $0x90] sm:$0xff]  ;;  %v3957_v25 = vpack.c.bf16 %v553_v15, %v552_v47  ;;  %v1995_v20 = vmul.f32 %v5329_v38, %v1867_v46  ;;  %vm1947_vm7 = vcmp.ge.s32.totalorder %v599_v59, 2576980378  ;;  %v584_v15 = vld [vmem:[%s4874_s0 + $0x20] sm:$0xff] }
 0x316   : > { %v4198_v36 = vpop.eup %4197  ;;  %3589 = vmatprep.mubr.msk.f32.mxu1 %vm1944_vm2, %v2008_v26  ;;  %v1649_v35 = vpop.xlane.xlu1 %1648  ;;  %3922 = vmatprep.subr.bf16.mxu0 %v3921_v14  ;;  %v1883_v32 = vmul.f32 1.1111112, %v4196_v13  ;;  %vm1946_vm6 = vcmp.ge.s32.totalorder %v598_v48, 2576980378  ;;  %vm1932_vm8 = vcmp.ge.s32.totalorder %v584_v15, 2576980378 }
 0x317   : > { %v1866_v58 = vmul.f32 1.1111112, %v4198_v36  ;;  %4207 = vrcp.f32 %v1649_v35  ;;  %3590 = vmatmul.mubr.msk.f32.vlgmr.msra.gmra.mrb[32].mxu1 %vm1945_vm3, %v2009_v37  ;;  %v1623_v0 = vpop.xlane.xlu0 %1622  ;;  %v3929_v36 = vpack.c.bf16 %v539_v29, %v538_v27  ;;  %v554_v35 = vld [vmem:[%s4867_s6 + $0x1b0] sm:$0xff] }
 0x318   : > { %3952 = vmatpush3.bf16.msra.mxu1 %v5486_v52  ;;  %4209 = vrcp.f32 %v1623_v0  ;;  %v555_v52 = vld [vmem:[%s4867_s6 + $0x1b8] sm:$0xff]  ;;  %v2011_v46 = vmul.f32 %v5335_v24, %v1883_v32  ;;  %v585_v0 = vld [vmem:[%s4874_s0 + $0x28] sm:$0xff] }
 0x319   : > { %v4200_v16 = vpop.eup %4199  ;;  %v1994_v19 = vmul.f32 %v5337_v10, %v1866_v58  ;;  %3924 = vmatpush3.bf16.msra.mxu0 %v3921_v14  ;;  %3954 = vmatprep.subr.bf16.mxu1 %v3953_v40  ;;  %v540_v14 = vld [vmem:[%s4867_s6 + $0x140] sm:$0xff]  ;;  %v541_v58 = vld [vmem:[%s4867_s6 + $0x148] sm:$0xff]  ;;  %v3961_v61 = vpack.c.bf16 %v555_v52, %v554_v35  ;;  %v543_v32 = vld [vmem:[%s4867_s6 + $0x158] sm:$0xff]  ;;  %vm1933_vm9 = vcmp.ge.s32.totalorder %v585_v0, 2576980378 }
 0x31a   : > { %v1882_v26 = vmul.f32 1.1111112, %v4200_v16  ;;  %v1655_v37 = vpop.xlane.xlu1 %1654  ;;  %3926 = vmatprep.subr.bf16.mxu0 %v3925_v5  ;;  %v4202_v13 = vpop.eup %4201  ;;  %v3933_v29 = vpack.c.bf16 %v541_v58, %v540_v14  ;;  %v556_v16 = vld [vmem:[%s4867_s6 + $0x1c0] sm:$0xff]  ;;  %v601_v35 = vld [vmem:[%s4874_s0 + $0xa8] sm:$0xff]  ;;  %v558_v58 = vld [vmem:[%s4867_s6 + $0x1d0] sm:$0xff] }
 0x31b   : > { %4211 = vrcp.f32 %v1655_v37  ;;  %3536 = vmatprep.mubr.msk.f32.mxu0 %vm1930_vm4, %v1994_v19  ;;  %v1621_v10 = vpop.xlane.xlu0 %1620  ;;  %vm1949_vm11 = vcmp.ge.s32.totalorder %v601_v35, 2576980378 }
 0x31c   : > { %v2010_v47 = vmul.f32 %v5347_v57, %v1882_v26  ;;  %4213 = vrcp.f32 %v1621_v10  ;;  %3537 = vmatmul.mubr.msk.f32.gmra.mrb[34].mxu0 %vm1931_vm5, %v1995_v20  ;;  %3956 = vmatpush3.bf16.msra.mxu1 %v3953_v40  ;;  %v1869_v57 = vmul.f32 1.1111112, %v4202_v13  ;;  %v557_v40 = vld [vmem:[%s4867_s6 + $0x1c8] sm:$0xff]  ;;  %v600_v20 = vld [vmem:[%s4874_s0 + $0xa0] sm:$0xff] }
 0x31d   : > { %v4204_v38 = vpop.eup %4203  ;;  %3928 = vmatpush3.bf16.msra.mxu0 %v3925_v5  ;;  %3958 = vmatprep.subr.bf16.mxu1 %v3957_v25  ;;  %v542_v5 = vld [vmem:[%s4867_s6 + $0x150] sm:$0xff]  ;;  %v3965_v59 = vpack.c.bf16 %v557_v40, %v556_v16  ;;  %vm1948_vm10 = vcmp.ge.s32.totalorder %v600_v20, 2576980378 }
 0x31e   : > { %v4206_v27 = vpop.eup %4205  ;;  %3592 = vmatprep.mubr.msk.f32.mxu1 %vm1946_vm6, %v2010_v47  ;;  %v1653_v28 = vpop.xlane.xlu1 %1652  ;;  %3930 = vmatprep.subr.bf16.mxu0 %v3929_v36  ;;  %v1885_v26 = vmul.f32 1.1111112, %v4204_v38  ;;  %v1997_v52 = vmul.f32 %v5349_v4, %v1869_v57  ;;  %v3937_v14 = vpack.c.bf16 %v543_v32, %v542_v5  ;;  %v545_v38 = vld [vmem:[%s4867_s6 + $0x168] sm:$0xff]  ;;  %v586_v57 = vld [vmem:[%s4874_s0 + $0x30] sm:$0xff]  ;;  %v547_v5 = vld [vmem:[%s4867_s6 + $0x178] sm:$0xff] }
 0x31f   : > { %v1868_v19 = vmul.f32 1.1111112, %v4206_v27  ;;  %4215 = vrcp.f32 %v1653_v28  ;;  %3593 = vmatmul.mubr.msk.f32.gmra.mrb[34].mxu1 %vm1947_vm7, %v2011_v46  ;;  %v1627_v24 = vpop.xlane.xlu0 %1626  ;;  %v587_v28 = vld [vmem:[%s4874_s0 + $0x38] sm:$0xff]  ;;  %vm1934_vm12 = vcmp.ge.s32.totalorder %v586_v57, 2576980378  ;;  %v602_v32 = vld [vmem:[%s4874_s0 + $0xb0] sm:$0xff] }
 0x320   : > { %3960 = vmatpush3.bf16.msra.mxu1 %v3957_v25  ;;  %4217 = vrcp.f32 %v1627_v24  ;;  %v559_v25 = vld [vmem:[%s4867_s6 + $0x1d8] sm:$0xff]  ;;  %v2013_v27 = vmul.f32 %v5359_v11, %v1885_v26  ;;  %vm1935_vm13 = vcmp.ge.s32.totalorder %v587_v28, 2576980378  ;;  %vm1950_vm14 = vcmp.ge.s32.totalorder %v602_v32, 2576980378  ;;  %v589_v57 = vld [vmem:[%s4874_s0 + $0x48] sm:$0xff] }
 0x321   : > { %v4208_v48 = vpop.eup %4207  ;;  %v1996_v37 = vmul.f32 %v5361_v45, %v1868_v19  ;;  %3932 = vmatpush3.bf16.msra.mxu0 %v3929_v36  ;;  %3962 = vmatprep.subr.bf16.mxu1 %v3961_v61  ;;  %v544_v36 = vld [vmem:[%s4867_s6 + $0x160] sm:$0xff]  ;;  %v3969_v15 = vpack.c.bf16 %v559_v25, %v558_v58  ;;  %v562_v25 = vld [vmem:[%s4867_s6 + $0x1f0] sm:$0xff]  ;;  %vm1937_vm1 = vcmp.ge.s32.totalorder %v589_v57, 2576980378 }
 0x322   : > { %v1884_v13 = vmul.f32 1.1111112, %v4208_v48  ;;  %v1659_v10 = vpop.xlane.xlu1 %1658  ;;  %3934 = vmatprep.subr.bf16.mxu0 %v3933_v29  ;;  %v4210_v47 = vpop.eup %4209  ;;  %v3941_v40 = vpack.c.bf16 %v545_v38, %v544_v36  ;;  %v560_v19 = vld [vmem:[%s4867_s6 + $0x1e0] sm:$0xff] }
 0x323   : > { %4219 = vrcp.f32 %v1659_v10  ;;  %3539 = vmatprep.mubr.msk.f32.mxu0 %vm1932_vm8, %v1996_v37  ;;  %v1625_v45 = vpop.xlane.xlu0 %1624  ;;  %v603_v37 = vld [vmem:[%s4874_s0 + $0xb8] sm:$0xff]  ;;  %v588_v36 = vld [vmem:[%s4874_s0 + $0x40] sm:$0xff] }
 0x324   : > { %v2012_v46 = vmul.f32 %v5371_v6, %v1884_v13  ;;  %4221 = vrcp.f32 %v1625_v45  ;;  %3540 = vmatmul.mubr.msk.f32.gmra.mrb[36].mxu0 %vm1933_vm9, %v1997_v52  ;;  %3964 = vmatpush3.bf16.msra.mxu1 %v3961_v61  ;;  %v1871_v6 = vmul.f32 1.1111112, %v4210_v47  ;;  %v561_v61 = vld [vmem:[%s4867_s6 + $0x1e8] sm:$0xff]  ;;  %v563_v47 = vld [vmem:[%s4867_s6 + $0x1f8] sm:$0xff]  ;;  %vm1951_vm15 = vcmp.ge.s32.totalorder %v603_v37, 2576980378 }
 0x325   : > { %v4212_v4 = vpop.eup %4211  ;;  %3936 = vmatpush3.bf16.msra.mxu0 %v3933_v29  ;;  %3966 = vmatprep.subr.bf16.mxu1 %v3965_v59  ;;  %v546_v29 = vld [vmem:[%s4867_s6 + $0x170] sm:$0xff]  ;;  %v3973_v52 = vpack.c.bf16 %v561_v61, %v560_v19  ;;  %v3977_v38 = vpack.c.bf16 %v563_v47, %v562_v25  ;;  %vm1936_vm0 = vcmp.ge.s32.totalorder %v588_v36, 2576980378 }
 0x326   : > { %v4214_v16 = vpop.eup %4213  ;;  %3595 = vmatprep.mubr.msk.f32.mxu1 %vm1948_vm10, %v2012_v46  ;;  %v1657_v0 = vpop.xlane.xlu1 %1656  ;;  %3938 = vmatprep.subr.bf16.mxu0 %v3937_v14  ;;  %v1887_v48 = vmul.f32 1.1111112, %v4212_v4  ;;  %v1999_v35 = vmul.f32 %v5373_v63, %v1871_v6  ;;  %v3945_v58 = vpack.c.bf16 %v547_v5, %v546_v29 }
 0x327   : > { %v1870_v24 = vmul.f32 1.1111112, %v4214_v16  ;;  %4223 = vrcp.f32 %v1657_v0  ;;  %3596 = vmatmul.mubr.msk.f32.gmra.mrb[36].mxu1 %vm1949_vm11, %v2013_v27  ;;  %v1631_v11 = vpop.xlane.xlu0 %1630  ;;  %v605_v0 = vld [vmem:[%s4874_s0 + $0xc8] sm:$0xff] }
 0x328   : > { %3968 = vmatpush3.bf16.msra.mxu1 %v3965_v59  ;;  %4225 = vrcp.f32 %v1631_v11  ;;  %vm1953_vm3 = vcmp.ge.s32.totalorder %v605_v0, 2576980378  ;;  %v6023_v0 = vld [vmem:[#allocation24_spill] sm:$0xff] }
 0x329   : > { %v4216_v20 = vpop.eup %4215  ;;  %v1998_v26 = vmul.f32 %v5385_v62, %v1870_v24  ;;  %3940 = vmatpush3.bf16.msra.mxu0 %v3937_v14  ;;  %3970 = vmatprep.subr.bf16.mxu1 %v3969_v15  ;;  %v2015_v14 = vmul.f32 %v5383_v12, %v1887_v48 }
 0x32a   : > { %v1886_v13 = vmul.f32 1.1111112, %v4216_v20  ;;  %v1663_v10 = vpop.xlane.xlu1 %1662  ;;  %3942 = vmatprep.subr.bf16.mxu0 %v3941_v40  ;;  %v4218_v45 = vpop.eup %4217 }
 0x32b   : > { %4227 = vrcp.f32 %v1663_v10  ;;  %3542 = vmatprep.mubr.msk.f32.mxu0 %vm1934_vm12, %v1998_v26  ;;  %v1629_v59 = vpop.xlane.xlu0 %1628  ;;  %v1873_v4 = vmul.f32 1.1111112, %v4218_v45  ;;  %v591_v26 = vld [vmem:[%s4874_s0 + $0x58] sm:$0xff] }
 0x32c   : > { %v2014_v62 = vmul.f32 %v5395_v23, %v1886_v13  ;;  %4229 = vrcp.f32 %v1629_v59  ;;  %3543 = vmatmul.mubr.msk.f32.gmra.mrb[38].mxu0 %vm1935_vm13, %v1999_v35  ;;  %3972 = vmatpush3.bf16.msra.mxu1 %v3969_v15  ;;  %v604_v15 = vld [vmem:[%s4874_s0 + $0xc0] sm:$0xff]  ;;  %vm1939_vm5 = vcmp.ge.s32.totalorder %v591_v26, 2576980378 }
 0x32d   : > { %v4220_v63 = vpop.eup %4219  ;;  %3944 = vmatpush3.bf16.msra.mxu0 %v3941_v40  ;;  %3974 = vmatprep.subr.bf16.mxu1 %v3973_v52  ;;  %v2001_v40 = vmul.f32 %v5397_v2, %v1873_v4  ;;  %vm1952_vm2 = vcmp.ge.s32.totalorder %v604_v15, 2576980378  ;;  %v590_v2 = vld [vmem:[%s4874_s0 + $0x50] sm:$0xff]  ;;  %v609_v15 = vld [vmem:[%s4874_s0 + $0xe8] sm:$0xff] }
 0x32e   : > { %v4222_v46 = vpop.eup %4221  ;;  %3598 = vmatprep.mubr.msk.f32.mxu1 %vm1950_vm14, %v2014_v62  ;;  %v1661_v27 = vpop.xlane.xlu1 %1660  ;;  %3946 = vmatprep.subr.bf16.mxu0 %v3945_v58  ;;  %v1889_v16 = vmul.f32 1.1111112, %v4220_v63  ;;  %vm1938_vm4 = vcmp.ge.s32.totalorder %v590_v2, 2576980378  ;;  %vm1957_vm11 = vcmp.ge.s32.totalorder %v609_v15, 2576980378 }
 0x32f   : > { %v1872_v23 = vmul.f32 1.1111112, %v4222_v46  ;;  %4231 = vrcp.f32 %v1661_v27  ;;  %3599 = vmatmul.mubr.msk.f32.gmra.mrb[38].mxu1 %vm1951_vm15, %v2015_v14  ;;  %v1635_v28 = vpop.xlane.xlu0 %1634  ;;  %v592_v14 = vld [vmem:[%s4874_s0 + $0x60] sm:$0xff]  ;;  %v593_v46 = vld [vmem:[%s4874_s0 + $0x68] sm:$0xff] }
 0x330   : > { %3976 = vmatpush3.bf16.msra.mxu1 %v3973_v52  ;;  %4233 = vrcp.f32 %v1635_v28  ;;  %v2017_v5 = vmul.f32 %v5405_v31, %v1889_v16  ;;  %v607_v31 = vld [vmem:[%s4874_s0 + $0xd8] sm:$0xff]  ;;  %vm1940_vm8 = vcmp.ge.s32.totalorder %v592_v14, 2576980378  ;;  %vm1941_vm9 = vcmp.ge.s32.totalorder %v593_v46, 2576980378  ;;  %v612_v14 = vld [vmem:[%s4874_s0 + $0x100] sm:$0xff] }
 0x331   : > { %v4224_v12 = vpop.eup %4223  ;;  %v2000_v6 = vmul.f32 %v5407_v17, %v1872_v23  ;;  %3948 = vmatpush3.bf16.msra.mxu0 %v3945_v58  ;;  %3978 = vmatprep.subr.bf16.mxu1 %v3977_v38  ;;  %vm1955_vm7 = vcmp.ge.s32.totalorder %v607_v31, 2576980378 }
 0x332   : > { %v1888_v19 = vmul.f32 1.1111112, %v4224_v12  ;;  %v1667_v61 = vpop.xlane.xlu1 %1666  ;;  %v4226_v24 = vpop.eup %4225 }
 0x333   : > { %4235 = vrcp.f32 %v1667_v61  ;;  %3545 = vmatprep.mubr.msk.f32.mxu0 %vm1936_vm0, %v2000_v6  ;;  %v1633_v11 = vpop.xlane.xlu0 %1632  ;;  %v1875_v20 = vmul.f32 1.1111112, %v4226_v24  ;;  %v6024_v61 = vld [vmem:[#allocation22_spill] sm:$0xff]  ;;  %vm1960_vm0 = vcmp.ge.s32.totalorder %v612_v14, 2576980378 }
 0x334   : > { %v2016_v29 = vmul.f32 %v5413_v34, %v1888_v19  ;;  %4237 = vrcp.f32 %v1633_v11  ;;  %3546 = vmatmul.mubr.msk.f32.gmra.mrb[40].mxu0 %vm1937_vm1, %v2001_v40  ;;  %3980 = vmatpush3.bf16.msra.mxu1 %v3977_v38  ;;  %v606_v34 = vld [vmem:[%s4874_s0 + $0xd0] sm:$0xff] }
 0x335   : > { %v4228_v17 = vpop.eup %4227  ;;  %v2003_v58 = vmul.f32 %v5415_v60, %v1875_v20  ;;  %vm1954_vm6 = vcmp.ge.s32.totalorder %v606_v34, 2576980378  ;;  %v594_v11 = vld [vmem:[%s4874_s0 + $0x70] sm:$0xff]  ;;  %v611_v34 = vld [vmem:[%s4874_s0 + $0xf8] sm:$0xff] }
 0x336   : > { %v4230_v32 = vpop.eup %4229  ;;  %3601 = vmatprep.mubr.msk.f32.mxu1 %vm1952_vm2, %v2016_v29  ;;  %v1665_v48 = vpop.xlane.xlu1 %1664  ;;  %v1891_v13 = vmul.f32 1.1111112, %v4228_v17  ;;  %vm1942_vm12 = vcmp.ge.s32.totalorder %v594_v11, 2576980378  ;;  %v610_v20 = vld [vmem:[%s4874_s0 + $0xf0] sm:$0xff] }
 0x337   : > { %v1874_v37 = vmul.f32 1.1111112, %v4230_v32  ;;  %4239 = vrcp.f32 %v1665_v48  ;;  %3602 = vmatmul.mubr.msk.f32.gmra.mrb[40].mxu1 %vm1953_vm3, %v2017_v5  ;;  %v1639_v52 = vpop.xlane.xlu0 %1638  ;;  %v595_v5 = vld [vmem:[%s4874_s0 + $0x78] sm:$0xff]  ;;  %vm1958_vm14 = vcmp.ge.s32.totalorder %v610_v20, 2576980378 }
 0x338   : > { %4241 = vrcp.f32 %v1639_v52  ;;  %v2019_v63 = vmul.f32 %v5421_v51, %v1891_v13  ;;  %vm1943_vm13 = vcmp.ge.s32.totalorder %v595_v5, 2576980378  ;;  %vm1959_vm15 = vcmp.ge.s32.totalorder %v611_v34, 2576980378  ;;  %v630_v5 = vld [vmem:[%s4874_s0 + $0x190] sm:$0xff]  ;;  %v631_v20 = vld [vmem:[%s4874_s0 + $0x198] sm:$0xff] }
 0x339   : > { %v4232_v35 = vpop.eup %4231  ;;  %v2002_v10 = vmul.f32 %v5423_v39, %v1874_v37  ;;  %v6025_v37 = vld [vmem:[#allocation25_spill] sm:$0xff] }
 0x33a   : > { %v1890_v25 = vmul.f32 1.1111112, %v4232_v35  ;;  %v1671_v47 = vpop.xlane.xlu1 %1670  ;;  %v4234_v45 = vpop.eup %4233  ;;  %v6026_v35 = vld [vmem:[#allocation23_spill] sm:$0xff] }
 0x33b   : > { %4243 = vrcp.f32 %v1671_v47  ;;  %3548 = vmatprep.mubr.msk.f32.mxu0 %vm1938_vm4, %v2002_v10  ;;  %v1637_v59 = vpop.xlane.xlu0 %1636  ;;  %v1877_v36 = vmul.f32 1.1111112, %v4234_v45 }
 0x33c   : > { %v2018_v62 = vmul.f32 %v5429_v49, %v1890_v25  ;;  %4245 = vrcp.f32 %v1637_v59  ;;  %3549 = vmatmul.mubr.msk.f32.gmra.mrb[42].mxu0 %vm1939_vm5, %v2003_v58  ;;  %v608_v49 = vld [vmem:[%s4874_s0 + $0xe0] sm:$0xff]  ;;  %v6027_v25 = vld [vmem:[#allocation28_spill] sm:$0xff] }
 0x33d   : > { %v4236_v39 = vpop.eup %4235  ;;  %v2005_v51 = vmul.f32 %v5431_v55, %v1877_v36  ;;  %vm1956_vm10 = vcmp.ge.s32.totalorder %v608_v49, 2576980378  ;;  %v6028_v59 = vld [vmem:[#allocation26_spill] sm:$0xff] }
 0x33e   : > { %v4238_v60 = vpop.eup %4237  ;;  %3604 = vmatprep.mubr.msk.f32.mxu1 %vm1954_vm6, %v2018_v62  ;;  %v1669_v38 = vpop.xlane.xlu1 %1668  ;;  %v1893_v23 = vmul.f32 1.1111112, %v4236_v39  ;;  %vm1978_vm6 = vcmp.ge.s32.totalorder %v630_v5, 2576980378  ;;  %v636_v5 = vld [vmem:[%s4874_s0 + $0x1c0] sm:$0xff] }
 0x33f   : > { %v1876_v4 = vmul.f32 1.1111112, %v4238_v60  ;;  %4247 = vrcp.f32 %v1669_v38  ;;  %3605 = vmatmul.mubr.msk.f32.gmra.mrb[42].mxu1 %vm1955_vm7, %v2019_v63  ;;  %v1675_v27 = vpop.xlane.xlu0 %1674  ;;  %v613_v38 = vld [vmem:[%s4874_s0 + $0x108] sm:$0xff]  ;;  %vm1979_vm7 = vcmp.ge.s32.totalorder %v631_v20, 2576980378 }
 0x340   : > { %4249 = vrcp.f32 %v1675_v27  ;;  %v2021_v24 = vmul.f32 %v6024_v61, %v1893_v23  ;;  %v628_v27 = vld [vmem:[%s4874_s0 + $0x180] sm:$0xff]  ;;  %v629_v23 = vld [vmem:[%s4874_s0 + $0x188] sm:$0xff]  ;;  %vm1961_vm1 = vcmp.ge.s32.totalorder %v613_v38, 2576980378 }
 0x341   : > { %v4240_v57 = vpop.eup %4239  ;;  %v2004_v28 = vmul.f32 %v5439_v9, %v1876_v4  ;;  %vm1976_vm2 = vcmp.ge.s32.totalorder %v628_v27, 2576980378  ;;  %vm1977_vm3 = vcmp.ge.s32.totalorder %v629_v23, 2576980378  ;;  %v637_v20 = vld [vmem:[%s4874_s0 + $0x1c8] sm:$0xff] }
 0x342   : > { %v1892_v12 = vmul.f32 1.1111112, %v4240_v57  ;;  %v1707_v16 = vpop.xlane.xlu1 %1706  ;;  %v4242_v6 = vpop.eup %4241 }
 0x343   : > { %3551 = vmatprep.mubr.msk.f32.mxu0 %vm1940_vm8, %v2004_v28  ;;  %4251 = vrcp.f32 %v1707_v16  ;;  %v1673_v19 = vpop.xlane.xlu0 %1672  ;;  %v1879_v29 = vmul.f32 1.1111112, %v4242_v6 }
 0x344   : > { %v2020_v40 = vmul.f32 %v6023_v0, %v1892_v12  ;;  %3552 = vmatmul.mubr.msk.f32.gmra.mrb[44].mxu0 %vm1941_vm9, %v2005_v51  ;;  %4253 = vrcp.f32 %v1673_v19  ;;  %v6029_v12 = vld [vmem:[#allocation27_spill] sm:$0xff]  ;;  %v6030_v19 = vld [vmem:[#allocation30_spill] sm:$0xff] }
 0x345   : > { %v4244_v9 = vpop.eup %4243  ;;  %v2007_v13 = vmul.f32 %v6026_v35, %v1879_v29 }
 0x346   : > { %v4246_v55 = vpop.eup %4245  ;;  %3607 = vmatprep.mubr.msk.f32.mxu1 %vm1956_vm10, %v2020_v40  ;;  %v1705_v17 = vpop.xlane.xlu1 %1704  ;;  %v1895_v26 = vmul.f32 1.1111112, %v4244_v9 }
 0x347   : > { %v1878_v2 = vmul.f32 1.1111112, %v4246_v55  ;;  %4255 = vrcp.f32 %v1705_v17  ;;  %3608 = vmatmul.mubr.msk.f32.gmra.mrb[44].mxu1 %vm1957_vm11, %v2021_v24  ;;  %v1679_v32 = vpop.xlane.xlu0 %1678  ;;  %v614_v24 = vld [vmem:[%s4874_s0 + $0x110] sm:$0xff] }
 0x348   : > { %4257 = vrcp.f32 %v1679_v32  ;;  %v2023_v62 = vmul.f32 %v6028_v59, %v1895_v26  ;;  %vm1962_vm4 = vcmp.ge.s32.totalorder %v614_v24, 2576980378  ;;  %v632_v59 = vld [vmem:[%s4874_s0 + $0x1a0] sm:$0xff] }
 0x349   : > { %v4248_v48 = vpop.eup %4247  ;;  %v2006_v52 = vmul.f32 %v6025_v37, %v1878_v2  ;;  %vm1980_vm10 = vcmp.ge.s32.totalorder %v632_v59, 2576980378  ;;  %v6032_v59 = vld [vmem:[#allocation34_spill] sm:$0xff] }
 0x34a   : > { %v1894_v10 = vmul.f32 1.1111112, %v4248_v48  ;;  %v1711_v31 = vpop.xlane.xlu1 %1710  ;;  %v4250_v58 = vpop.eup %4249 }
 0x34b   : > { %3554 = vmatprep.mubr.msk.f32.mxu0 %vm1942_vm12, %v2006_v52  ;;  %4259 = vrcp.f32 %v1711_v31  ;;  %v1677_v45 = vpop.xlane.xlu0 %1676  ;;  %v1897_v36 = vmul.f32 1.1111112, %v4250_v58  ;;  %v616_v58 = vld [vmem:[%s4874_s0 + $0x120] sm:$0xff] }
 0x34c   : > { %v2022_v47 = vmul.f32 %v6027_v25, %v1894_v10  ;;  %3555 = vmatmul.mubr.msk.f32.gmra.mrb[46].mxu0 %vm1943_vm13, %v2007_v13  ;;  %4261 = vrcp.f32 %v1677_v45  ;;  %vm1964_vm8 = vcmp.ge.s32.totalorder %v616_v58, 2576980378 }
 0x34d   : > { %v4252_v39 = vpop.eup %4251  ;;  %v2025_v16 = vmul.f32 %v6029_v12, %v1897_v36 }
 0x34e   : > { %3610 = vmatprep.mubr.msk.f32.mxu1 %vm1958_vm14, %v2022_v47  ;;  %v1709_v63 = vpop.xlane.xlu1 %1708  ;;  %v4254_v60 = vpop.eup %4253  ;;  %v1913_v57 = vmul.f32 1.1111112, %v4252_v39 }
 0x34f   : > { %4263 = vrcp.f32 %v1709_v63  ;;  %3611 = vmatmul.mubr.msk.f32.gmra.mrb[46].mxu1 %vm1959_vm15, %v2023_v62  ;;  %v1896_v46 = vmul.f32 1.1111112, %v4254_v60  ;;  %v1683_v4 = vpop.xlane.xlu0 %1682  ;;  %v633_v63 = vld [vmem:[%s4874_s0 + $0x1a8] sm:$0xff] }
 0x350   : > { %4265 = vrcp.f32 %v1683_v4  ;;  %v2041_v9 = vmul.f32 %v6030_v19, %v1913_v57  ;;  %vm1981_vm11 = vcmp.ge.s32.totalorder %v633_v63, 2576980378  ;;  %v618_v57 = vld [vmem:[%s4874_s0 + $0x130] sm:$0xff] }
 0x351   : > { %v4256_v49 = vpop.eup %4255  ;;  %v2024_v28 = vmul.f32 %v5477_v53, %v1896_v46  ;;  %vm1966_vm12 = vcmp.ge.s32.totalorder %v618_v57, 2576980378  ;;  %v6033_v63 = vld [vmem:[#allocation32_spill] sm:$0xff] }
 0x352   : > { %v1912_v15 = vmul.f32 1.1111112, %v4256_v49  ;;  %v1715_v51 = vpop.xlane.xlu1 %1714  ;;  %v4258_v6 = vpop.eup %4257 }
 0x353   : > { %4267 = vrcp.f32 %v1715_v51  ;;  %3645 = vmatprep.mubr.msk.f32.mxu0 %vm1960_vm0, %v2024_v28  ;;  %v1681_v40 = vpop.xlane.xlu0 %1680  ;;  %v1899_v55 = vmul.f32 1.1111112, %v4258_v6  ;;  %v634_v51 = vld [vmem:[%s4874_s0 + $0x1b0] sm:$0xff]  ;;  %v635_v6 = vld [vmem:[%s4874_s0 + $0x1b8] sm:$0xff] }
 0x354   : > { %v2040_v0 = vmul.f32 %v5484_v42, %v1912_v15  ;;  %4269 = vrcp.f32 %v1681_v40  ;;  %3646 = vmatmul.mubr.msk.f32.vlgmr.msra.gmra.mrb[48].mxu0 %vm1961_vm1, %v2025_v16  ;;  %v615_v42 = vld [vmem:[%s4874_s0 + $0x118] sm:$0xff]  ;;  %vm1982_vm14 = vcmp.ge.s32.totalorder %v634_v51, 2576980378  ;;  %vm1983_vm15 = vcmp.ge.s32.totalorder %v635_v6, 2576980378  ;;  %v640_v51 = vld [vmem:[%s4874_s0 + $0x1e0] sm:$0xff] }
 0x355   : > { %v4260_v53 = vpop.eup %4259  ;;  %vm1963_vm5 = vcmp.ge.s32.totalorder %v615_v42, 2576980378  ;;  %v2027_v52 = vmul.f32 %v5489_v43, %v1899_v55  ;;  %v620_v55 = vld [vmem:[%s4874_s0 + $0x140] sm:$0xff]  ;;  %v641_v6 = vld [vmem:[%s4874_s0 + $0x1e8] sm:$0xff] }
 0x356   : > { %3701 = vmatprep.mubr.msk.f32.mxu1 %vm1976_vm2, %v2040_v0  ;;  %v1713_v61 = vpop.xlane.xlu1 %1712  ;;  %v4262_v11 = vpop.eup %4261  ;;  %v1915_v32 = vmul.f32 1.1111112, %v4260_v53  ;;  %vm1968_vm0 = vcmp.ge.s32.totalorder %v620_v55, 2576980378  ;;  %vm1984_vm2 = vcmp.ge.s32.totalorder %v636_v5, 2576980378 }
 0x357   : > { %4271 = vrcp.f32 %v1713_v61  ;;  %3702 = vmatmul.mubr.msk.f32.vlgmr.msra.gmra.mrb[48].mxu1 %vm1977_vm3, %v2041_v9  ;;  %v1898_v29 = vmul.f32 1.1111112, %v4262_v11  ;;  %v1687_v17 = vpop.xlane.xlu0 %1686  ;;  %vm1985_vm3 = vcmp.ge.s32.totalorder %v637_v20, 2576980378  ;;  %v6041_v20 = vld [vmem:[#allocation41_spill] sm:$0xff] }
 0x358   : > { %4273 = vrcp.f32 %v1687_v17  ;;  %v2043_v10 = vmul.f32 %v5495_v54, %v1915_v32 }
 0x359   : > { %v4264_v2 = vpop.eup %4263  ;;  %v2026_v48 = vmul.f32 %v5498_v30, %v1898_v29 }
 0x35a   : > { %v1914_v26 = vmul.f32 1.1111112, %v4264_v2  ;;  %v1719_v37 = vpop.xlane.xlu1 %1718  ;;  %v4266_v34 = vpop.eup %4265 }
 0x35b   : > { %4275 = vrcp.f32 %v1719_v37  ;;  %3648 = vmatprep.mubr.msk.f32.mxu0 %vm1962_vm4, %v2026_v48  ;;  %v1685_v13 = vpop.xlane.xlu0 %1684  ;;  %v1901_v25 = vmul.f32 1.1111112, %v4266_v34 }
 0x35c   : > { %v2042_v35 = vmul.f32 %v5503_v56, %v1914_v26  ;;  %4277 = vrcp.f32 %v1685_v13  ;;  %3649 = vmatmul.mubr.msk.f32.gmra.mrb[50].mxu0 %vm1963_vm5, %v2027_v52  ;;  %v617_v56 = vld [vmem:[%s4874_s0 + $0x128] sm:$0xff]  ;;  %v6031_v13 = vld [vmem:[#allocation29_spill] sm:$0xff] }
 0x35d   : > { %v4268_v30 = vpop.eup %4267  ;;  %vm1965_vm9 = vcmp.ge.s32.totalorder %v617_v56, 2576980378  ;;  %v2029_v36 = vmul.f32 %v5506_v44, %v1901_v25  ;;  %v638_v25 = vld [vmem:[%s4874_s0 + $0x1d0] sm:$0xff] }
 0x35e   : > { %3704 = vmatprep.mubr.msk.f32.mxu1 %vm1978_vm6, %v2042_v35  ;;  %v1717_v31 = vpop.xlane.xlu1 %1716  ;;  %v4270_v43 = vpop.eup %4269  ;;  %v1917_v39 = vmul.f32 1.1111112, %v4268_v30  ;;  %vm1986_vm6 = vcmp.ge.s32.totalorder %v638_v25, 2576980378 }
 0x35f   : > { %4279 = vrcp.f32 %v1717_v31  ;;  %3705 = vmatmul.mubr.msk.f32.gmra.mrb[50].mxu1 %vm1979_vm7, %v2043_v10  ;;  %v1900_v47 = vmul.f32 1.1111112, %v4270_v43  ;;  %v1691_v45 = vpop.xlane.xlu0 %1690  ;;  %v622_v31 = vld [vmem:[%s4874_s0 + $0x150] sm:$0xff] }
 0x360   : > { %4281 = vrcp.f32 %v1691_v45  ;;  %v2045_v27 = vmul.f32 %v5511_v41, %v1917_v39  ;;  %vm1970_vm4 = vcmp.ge.s32.totalorder %v622_v31, 2576980378  ;;  %v639_v45 = vld [vmem:[%s4874_s0 + $0x1d8] sm:$0xff] }
 0x361   : > { %v4272_v62 = vpop.eup %4271  ;;  %v2028_v54 = vmul.f32 %v5514_v50, %v1900_v47  ;;  %vm1987_vm7 = vcmp.ge.s32.totalorder %v639_v45, 2576980378 }
 0x362   : > { %v1916_v14 = vmul.f32 1.1111112, %v4272_v62  ;;  %v1723_v60 = vpop.xlane.xlu1 %1722  ;;  %v4274_v38 = vpop.eup %4273 }
 0x363   : > { %4283 = vrcp.f32 %v1723_v60  ;;  %3651 = vmatprep.mubr.msk.f32.mxu0 %vm1964_vm8, %v2028_v54  ;;  %v1689_v4 = vpop.xlane.xlu0 %1688  ;;  %v1903_v23 = vmul.f32 1.1111112, %v4274_v38 }
 0x364   : > { %v2044_v46 = vmul.f32 %v5519_v7, %v1916_v14  ;;  %4285 = vrcp.f32 %v1689_v4  ;;  %3652 = vmatmul.mubr.msk.f32.gmra.mrb[52].mxu0 %vm1965_vm9, %v2029_v36  ;;  %v619_v7 = vld [vmem:[%s4874_s0 + $0x138] sm:$0xff]  ;;  %v6035_v4 = vld [vmem:[#allocation31_spill] sm:$0xff] }
 0x365   : > { %v4276_v50 = vpop.eup %4275  ;;  %vm1967_vm13 = vcmp.ge.s32.totalorder %v619_v7, 2576980378  ;;  %v2031_v19 = vmul.f32 %v5522_v22, %v1903_v23  ;;  %v6034_v36 = vld [vmem:[#allocation33_spill] sm:$0xff]  ;;  %v625_v7 = vld [vmem:[%s4874_s0 + $0x168] sm:$0xff] }
 0x366   : > { %3707 = vmatprep.mubr.msk.f32.mxu1 %vm1980_vm10, %v2044_v46  ;;  %v1721_v49 = vpop.xlane.xlu1 %1720  ;;  %v4278_v44 = vpop.eup %4277  ;;  %v1919_v16 = vmul.f32 1.1111112, %v4276_v50  ;;  %vm1973_vm9 = vcmp.ge.s32.totalorder %v625_v7, 2576980378  ;;  %vm1988_vm10 = vcmp.ge.s32.totalorder %v640_v51, 2576980378 }
 0x367   : > { %4287 = vrcp.f32 %v1721_v49  ;;  %3708 = vmatmul.mubr.msk.f32.gmra.mrb[52].mxu1 %vm1981_vm11, %v2045_v27  ;;  %v1902_v28 = vmul.f32 1.1111112, %v4278_v44  ;;  %v1695_v15 = vpop.xlane.xlu0 %1694  ;;  %v624_v49 = vld [vmem:[%s4874_s0 + $0x160] sm:$0xff]  ;;  %vm1989_vm11 = vcmp.ge.s32.totalorder %v641_v6, 2576980378 }
 0x368   : > { %4289 = vrcp.f32 %v1695_v15  ;;  %v2047_v24 = vmul.f32 %v5527_v33, %v1919_v16  ;;  %vm1972_vm8 = vcmp.ge.s32.totalorder %v624_v49, 2576980378 }
 0x369   : > { %v4280_v12 = vpop.eup %4279  ;;  %v2030_v41 = vmul.f32 %v5530_v21, %v1902_v28 }
 0x36a   : > { %v1918_v0 = vmul.f32 1.1111112, %v4280_v12  ;;  %v1727_v40 = vpop.xlane.xlu1 %1726  ;;  %v4282_v9 = vpop.eup %4281 }
 0x36b   : > { %4291 = vrcp.f32 %v1727_v40  ;;  %3654 = vmatprep.mubr.msk.f32.mxu0 %vm1966_vm12, %v2030_v41  ;;  %v1693_v61 = vpop.xlane.xlu0 %1692  ;;  %v1905_v42 = vmul.f32 1.1111112, %v4282_v9  ;;  %v6036_v41 = vld [vmem:[#allocation38_spill] sm:$0xff] }
 0x36c   : > { %v2046_v53 = vmul.f32 %v5535_v8, %v1918_v0  ;;  %4293 = vrcp.f32 %v1693_v61  ;;  %3655 = vmatmul.mubr.msk.f32.gmra.mrb[54].mxu0 %vm1967_vm13, %v2031_v19  ;;  %v621_v8 = vld [vmem:[%s4874_s0 + $0x148] sm:$0xff]  ;;  %v6037_v19 = vld [vmem:[#allocation36_spill] sm:$0xff] }
 0x36d   : > { %v4284_v21 = vpop.eup %4283  ;;  %vm1969_vm1 = vcmp.ge.s32.totalorder %v621_v8, 2576980378  ;;  %v2033_v37 = vmul.f32 %v5538_v1, %v1905_v42 }
 0x36e   : > { %3710 = vmatprep.mubr.msk.f32.mxu1 %vm1982_vm14, %v2046_v53  ;;  %v1725_v11 = vpop.xlane.xlu1 %1724  ;;  %v4286_v22 = vpop.eup %4285  ;;  %v1921_v32 = vmul.f32 1.1111112, %v4284_v21  ;;  %v6038_v53 = vld [vmem:[#allocation39_spill] sm:$0xff] }
 0x36f   : > { %4295 = vrcp.f32 %v1725_v11  ;;  %3711 = vmatmul.mubr.msk.f32.gmra.mrb[54].mxu1 %vm1983_vm15, %v2047_v24  ;;  %v1904_v29 = vmul.f32 1.1111112, %v4286_v22  ;;  %v1699_v17 = vpop.xlane.xlu0 %1698  ;;  %v6039_v24 = vld [vmem:[#allocation37_spill] sm:$0xff]  ;;  %v642_v11 = vld [vmem:[%s4874_s0 + $0x1f0] sm:$0xff] }
 0x370   : > { %4297 = vrcp.f32 %v1699_v17  ;;  %v2049_v10 = vmul.f32 %v6031_v13, %v1921_v32  ;;  %v626_v22 = vld [vmem:[%s4874_s0 + $0x170] sm:$0xff]  ;;  %vm1990_vm12 = vcmp.ge.s32.totalorder %v642_v11, 2576980378  ;;  %v6043_v13 = vld [vmem:[#allocation43_spill] sm:$0xff] }
 0x371   : > { %v4288_v2 = vpop.eup %4287  ;;  %v2032_v33 = vmul.f32 %v5546_v3, %v1904_v29  ;;  %v6040_v17 = vld [vmem:[#allocation40_spill] sm:$0xff]  ;;  %vm1974_vm13 = vcmp.ge.s32.totalorder %v626_v22, 2576980378 }
 0x372   : > { %v1920_v48 = vmul.f32 1.1111112, %v4288_v2  ;;  %v1731_v26 = vpop.xlane.xlu1 %1730  ;;  %v4290_v52 = vpop.eup %4289  ;;  %v643_v2 = vld [vmem:[%s4874_s0 + $0x1f8] sm:$0xff] }
 0x373   : > { %4299 = vrcp.f32 %v1731_v26  ;;  %3657 = vmatprep.mubr.msk.f32.mxu0 %vm1968_vm0, %v2032_v33  ;;  %v1697_v35 = vpop.xlane.xlu0 %1696  ;;  %v1907_v58 = vmul.f32 1.1111112, %v4290_v52  ;;  %vm1991_vm14 = vcmp.ge.s32.totalorder %v643_v2, 2576980378 }
 0x374   : > { %v2048_v34 = vmul.f32 %v5551_v18, %v1920_v48  ;;  %4301 = vrcp.f32 %v1697_v35  ;;  %3658 = vmatmul.mubr.msk.f32.gmra.mrb[56].mxu0 %vm1969_vm1, %v2033_v37  ;;  %v623_v18 = vld [vmem:[%s4874_s0 + $0x158] sm:$0xff] }
 0x375   : > { %v4292_v3 = vpop.eup %4291  ;;  %vm1971_vm5 = vcmp.ge.s32.totalorder %v623_v18, 2576980378  ;;  %v2035_v54 = vmul.f32 %v6033_v63, %v1907_v58  ;;  %v627_v48 = vld [vmem:[%s4874_s0 + $0x178] sm:$0xff] }
 0x376   : > { %3713 = vmatprep.mubr.msk.f32.mxu1 %vm1984_vm2, %v2048_v34  ;;  %v1729_v30 = vpop.xlane.xlu1 %1728  ;;  %v4294_v1 = vpop.eup %4293  ;;  %v1923_v47 = vmul.f32 1.1111112, %v4292_v3  ;;  %v6042_v34 = vld [vmem:[#allocation42_spill] sm:$0xff]  ;;  %vm1975_vm15 = vcmp.ge.s32.totalorder %v627_v48, 2576980378 }
 0x377   : > { %4303 = vrcp.f32 %v1729_v30  ;;  %3714 = vmatmul.mubr.msk.f32.gmra.mrb[56].mxu1 %vm1985_vm3, %v2049_v10  ;;  %v1906_v43 = vmul.f32 1.1111112, %v4294_v1 }
 0x378   : > { %v2051_v27 = vmul.f32 %v6035_v4, %v1923_v47 }
 0x379   : > { %v4296_v56 = vpop.eup %4295  ;;  %v2034_v62 = vmul.f32 %v6032_v59, %v1906_v43 }
 0x37a   : > { %v1922_v39 = vmul.f32 1.1111112, %v4296_v56  ;;  %v4298_v60 = vpop.eup %4297 }
 0x37b   : > { %v1733_v14 = vpop.xlane.xlu1 %1732  ;;  %3660 = vmatprep.mubr.msk.f32.mxu0 %vm1970_vm4, %v2034_v62  ;;  %v1909_v44 = vmul.f32 1.1111112, %v4298_v60 }
 0x37c   : > { %v2050_v38 = vmul.f32 %v6034_v36, %v1922_v39  ;;  %4305 = vrcp.f32 %v1733_v14  ;;  %v1701_v46 = vpop.xlane.xlu0 %1700  ;;  %3661 = vmatmul.mubr.msk.f32.gmra.mrb[58].mxu0 %vm1971_vm5, %v2035_v54 }
 0x37d   : > { %4307 = vrcp.f32 %v1701_v46  ;;  %v4300_v50 = vpop.eup %4299  ;;  %v2037_v9 = vmul.f32 %v6037_v19, %v1909_v44 }
 0x37e   : > { %3716 = vmatprep.mubr.msk.f32.mxu1 %vm1986_vm6, %v2050_v38  ;;  %v4302_v57 = vpop.eup %4301  ;;  %v1925_v16 = vmul.f32 1.1111112, %v4300_v50 }
 0x37f   : > { %v1735_v23 = vpop.xlane.xlu1 %1734  ;;  %3717 = vmatmul.mubr.msk.f32.gmra.mrb[58].mxu1 %vm1987_vm7, %v2051_v27  ;;  %v1908_v28 = vmul.f32 1.1111112, %v4302_v57 }
 0x380   : > { %4309 = vrcp.f32 %v1735_v23  ;;  %v1703_v15 = vpop.xlane.xlu0 %1702  ;;  %v2053_v21 = vmul.f32 %v6039_v24, %v1925_v16 }
 0x381   : > { %v4304_v12 = vpop.eup %4303  ;;  %4311 = vrcp.f32 %v1703_v15  ;;  %v2036_v0 = vmul.f32 %v6036_v41, %v1908_v28 }
 0x382   : > { %v1924_v40 = vmul.f32 1.1111112, %v4304_v12 }
 0x383   : > { %3663 = vmatprep.mubr.msk.f32.mxu0 %vm1972_vm8, %v2036_v0 }
 0x384   : > { %v2052_v61 = vmul.f32 %v6038_v53, %v1924_v40  ;;  %3664 = vmatmul.mubr.msk.f32.gmra.mrb[60].mxu0 %vm1973_vm9, %v2037_v9 }
 0x386   : > { %v4306_v55 = vpop.eup %4305  ;;  %3719 = vmatprep.mubr.msk.f32.mxu1 %vm1988_vm10, %v2052_v61 }
 0x387   : > { %v4308_v42 = vpop.eup %4307  ;;  %v1926_v8 = vmul.f32 1.1111112, %v4306_v55  ;;  %3720 = vmatmul.mubr.msk.f32.gmra.mrb[60].mxu1 %vm1989_vm11, %v2053_v21 }
 0x388   : > { %v1910_v29 = vmul.f32 1.1111112, %v4308_v42 }
 0x389   : > { %v2054_v5 = vmul.f32 %v6040_v17, %v1926_v8 }
 0x38a   : > { %v4310_v32 = vpop.eup %4309  ;;  %v2038_v33 = vmul.f32 %v6041_v20, %v1910_v29 }
 0x38b   : > { %v4312_v26 = vpop.eup %4311  ;;  %v1927_v37 = vmul.f32 1.1111112, %v4310_v32  ;;  %3722 = vmatprep.mubr.msk.f32.mxu1 %vm1990_vm12, %v2054_v5 }
 0x38c   : > { %v1911_v52 = vmul.f32 1.1111112, %v4312_v26  ;;  %3666 = vmatprep.mubr.msk.f32.mxu0 %vm1974_vm13, %v2038_v33 }
 0x38d   : > { %v2055_v35 = vmul.f32 %v6042_v34, %v1927_v37 }
 0x38e   : > { %v2039_v10 = vmul.f32 %v6043_v13, %v1911_v52 }
 0x38f   : > { %3723 = vmatmul.mubr.msk.f32.gmra.mrb[62].mxu1 %vm1991_vm14, %v2055_v35 }
 0x390   : > { %3667 = vmatmul.mubr.msk.f32.gmra.mrb[62].mxu0 %vm1975_vm15, %v2039_v10 }
 0x3e7   : > { %v3535_v3 = vpop.f32.mrb[32].mxu0 }
 0x3e8   : > { %2701 = vst [vmem:[%s5768_s30 + $0x8] sm:$0xff] %v3535_v3  ;;  %v2186_v30 = vpop.f32.mrb[33].mxu0 }
 0x3e9   : > { %2700 = vst [vmem:[%s5768_s30] sm:$0xff] %v2186_v30 }
 0x3ea   : > { %v3591_v31 = vpop.f32.mrb[32].mxu1 }
 0x3eb   : > { %2717 = vst [vmem:[%s5768_s30 + $0x88] sm:$0xff] %v3591_v31  ;;  %v2331_v1 = vpop.f32.mrb[33].mxu1 }
 0x3ec   : > { %2716 = vst [vmem:[%s5768_s30 + $0x80] sm:$0xff] %v2331_v1 }
 0x3ef   : > { %v3538_v58 = vpop.f32.mrb[34].mxu0 }
 0x3f0   : > { %2703 = vst [vmem:[%s5768_s30 + $0x18] sm:$0xff] %v3538_v58  ;;  %v2196_v18 = vpop.f32.mrb[35].mxu0 }
 0x3f1   : > { %2702 = vst [vmem:[%s5768_s30 + $0x10] sm:$0xff] %v2196_v18 }
 0x3f2   : > { %v3594_v43 = vpop.f32.mrb[34].mxu1 }
 0x3f3   : > { %2719 = vst [vmem:[%s5768_s30 + $0x98] sm:$0xff] %v3594_v43  ;;  %v2341_v25 = vpop.f32.mrb[35].mxu1 }
 0x3f4   : > { %2718 = vst [vmem:[%s5768_s30 + $0x90] sm:$0xff] %v2341_v25 }
 0x3f7   : > { %v3541_v56 = vpop.f32.mrb[36].mxu0 }
 0x3f8   : > { %2705 = vst [vmem:[%s5768_s30 + $0x28] sm:$0xff] %v3541_v56  ;;  %v2206_v47 = vpop.f32.mrb[37].mxu0 }
 0x3f9   : > { %2704 = vst [vmem:[%s5768_s30 + $0x20] sm:$0xff] %v2206_v47 }
 0x3fa   : > { %v3597_v45 = vpop.f32.mrb[36].mxu1 }
 0x3fb   : > { %2721 = vst [vmem:[%s5768_s30 + $0xa8] sm:$0xff] %v3597_v45  ;;  %v2351_v59 = vpop.f32.mrb[37].mxu1 }
 0x3fc   : > { %2720 = vst [vmem:[%s5768_s30 + $0xa0] sm:$0xff] %v2351_v59 }
 0x3ff   : > { %v3544_v62 = vpop.f32.mrb[38].mxu0 }
 0x400   : > { %2707 = vst [vmem:[%s5768_s30 + $0x38] sm:$0xff] %v3544_v62  ;;  %v2216_v39 = vpop.f32.mrb[39].mxu0 }
 0x401   : > { %2706 = vst [vmem:[%s5768_s30 + $0x30] sm:$0xff] %v2216_v39 }
 0x402   : > { %v3600_v63 = vpop.f32.mrb[38].mxu1 }
 0x403   : > { %2723 = vst [vmem:[%s5768_s30 + $0xb8] sm:$0xff] %v3600_v63  ;;  %v2361_v54 = vpop.f32.mrb[39].mxu1 }
 0x404   : > { %2722 = vst [vmem:[%s5768_s30 + $0xb0] sm:$0xff] %v2361_v54 }
 0x407   : > { %v3547_v14 = vpop.f32.mrb[40].mxu0 }
 0x408   : > { %2709 = vst [vmem:[%s5768_s30 + $0x48] sm:$0xff] %v3547_v14  ;;  %v2226_v60 = vpop.f32.mrb[41].mxu0 }
 0x409   : > { %2708 = vst [vmem:[%s5768_s30 + $0x40] sm:$0xff] %v2226_v60 }
 0x40a   : > { %v3603_v36 = vpop.f32.mrb[40].mxu1 }
 0x40b   : > { %2725 = vst [vmem:[%s5768_s30 + $0xc8] sm:$0xff] %v3603_v36  ;;  %v2371_v38 = vpop.f32.mrb[41].mxu1 }
 0x40c   : > { %2724 = vst [vmem:[%s5768_s30 + $0xc0] sm:$0xff] %v2371_v38 }
 0x40f   : > { %v3550_v46 = vpop.f32.mrb[42].mxu0 }
 0x410   : > { %2711 = vst [vmem:[%s5768_s30 + $0x58] sm:$0xff] %v3550_v46  ;;  %v2236_v4 = vpop.f32.mrb[43].mxu0 }
 0x411   : > { %2710 = vst [vmem:[%s5768_s30 + $0x50] sm:$0xff] %v2236_v4 }
 0x412   : > { %v3606_v27 = vpop.f32.mrb[42].mxu1 }
 0x413   : > { %2727 = vst [vmem:[%s5768_s30 + $0xd8] sm:$0xff] %v3606_v27  ;;  %v2381_v50 = vpop.f32.mrb[43].mxu1 }
 0x414   : > { %2726 = vst [vmem:[%s5768_s30 + $0xd0] sm:$0xff] %v2381_v50 }
 0x417   : > { %v3553_v49 = vpop.f32.mrb[44].mxu0 }
 0x418   : > { %2713 = vst [vmem:[%s5768_s30 + $0x68] sm:$0xff] %v3553_v49  ;;  %v2246_v57 = vpop.f32.mrb[45].mxu0 }
 0x419   : > { %2712 = vst [vmem:[%s5768_s30 + $0x60] sm:$0xff] %v2246_v57 }
 0x41a   : > { %v3609_v44 = vpop.f32.mrb[44].mxu1 }
 0x41b   : > { %2729 = vst [vmem:[%s5768_s30 + $0xe8] sm:$0xff] %v3609_v44  ;;  %v2391_v23 = vpop.f32.mrb[45].mxu1 }
 0x41c   : > { %2728 = vst [vmem:[%s5768_s30 + $0xe0] sm:$0xff] %v2391_v23 }
 0x41f   : > { %v3556_v7 = vpop.f32.mrb[46].mxu0 }
 0x420   : > { %2715 = vst [vmem:[%s5768_s30 + $0x78] sm:$0xff] %v3556_v7  ;;  %v2256_v28 = vpop.f32.mrb[47].mxu0 }
 0x421   : > { %2714 = vst [vmem:[%s5768_s30 + $0x70] sm:$0xff] %v2256_v28 }
 0x422   : > { %v3612_v15 = vpop.f32.mrb[46].mxu1 }
 0x423   : > { %2731 = vst [vmem:[%s5768_s30 + $0xf8] sm:$0xff] %v3612_v15  ;;  %v2401_v51 = vpop.f32.mrb[47].mxu1 }
 0x424   : > { %2730 = vst [vmem:[%s5768_s30 + $0xf0] sm:$0xff] %v2401_v51 }
 0x427   : > { %v3647_v12 = vpop.f32.mrb[48].mxu0 }
 0x428   : > { %2733 = vst [vmem:[%s5768_s30 + $0x108] sm:$0xff] %v3647_v12  ;;  %v2476_v16 = vpop.f32.mrb[49].mxu0 }
 0x429   : > { %2732 = vst [vmem:[%s5768_s30 + $0x100] sm:$0xff] %v2476_v16 }
 0x42a   : > { %v3703_v6 = vpop.f32.mrb[48].mxu1 }
 0x42b   : > { %2749 = vst [vmem:[%s5768_s30 + $0x188] sm:$0xff] %v3703_v6  ;;  %v2621_v41 = vpop.f32.mrb[49].mxu1 }
 0x42c   : > { %2748 = vst [vmem:[%s5768_s30 + $0x180] sm:$0xff] %v2621_v41 }
 0x42f   : > { %v3650_v0 = vpop.f32.mrb[50].mxu0 }
 0x430   : > { %2735 = vst [vmem:[%s5768_s30 + $0x118] sm:$0xff] %v3650_v0  ;;  %v2486_v40 = vpop.f32.mrb[51].mxu0 }
 0x431   : > { %2734 = vst [vmem:[%s5768_s30 + $0x110] sm:$0xff] %v2486_v40 }
 0x432   : > { %v3706_v19 = vpop.f32.mrb[50].mxu1 }
 0x433   : > { %2751 = vst [vmem:[%s5768_s30 + $0x198] sm:$0xff] %v3706_v19  ;;  %v2631_v9 = vpop.f32.mrb[51].mxu1 }
 0x434   : > { %2750 = vst [vmem:[%s5768_s30 + $0x190] sm:$0xff] %v2631_v9 }
 0x437   : > { %v3653_v53 = vpop.f32.mrb[52].mxu0 }
 0x438   : > { %2737 = vst [vmem:[%s5768_s30 + $0x128] sm:$0xff] %v3653_v53  ;;  %v2496_v61 = vpop.f32.mrb[53].mxu0 }
 0x439   : > { %2736 = vst [vmem:[%s5768_s30 + $0x120] sm:$0xff] %v2496_v61 }
 0x43a   : > { %v3709_v24 = vpop.f32.mrb[52].mxu1 }
 0x43b   : > { %2753 = vst [vmem:[%s5768_s30 + $0x1a8] sm:$0xff] %v3709_v24  ;;  %v2641_v21 = vpop.f32.mrb[53].mxu1 }
 0x43c   : > { %2752 = vst [vmem:[%s5768_s30 + $0x1a0] sm:$0xff] %v2641_v21 }
 0x43f   : > { %v3656_v11 = vpop.f32.mrb[54].mxu0 }
 0x440   : > { %2739 = vst [vmem:[%s5768_s30 + $0x138] sm:$0xff] %v3656_v11  ;;  %v2506_v55 = vpop.f32.mrb[55].mxu0 }
 0x441   : > { %2738 = vst [vmem:[%s5768_s30 + $0x130] sm:$0xff] %v2506_v55 }
 0x442   : > { %v3712_v22 = vpop.f32.mrb[54].mxu1 }
 0x443   : > { %2755 = vst [vmem:[%s5768_s30 + $0x1b8] sm:$0xff] %v3712_v22  ;;  %v2651_v42 = vpop.f32.mrb[55].mxu1 }
 0x444   : > { %2754 = vst [vmem:[%s5768_s30 + $0x1b0] sm:$0xff] %v2651_v42 }
 0x447   : > { %v3659_v8 = vpop.f32.mrb[56].mxu0 }
 0x448   : > { %2741 = vst [vmem:[%s5768_s30 + $0x148] sm:$0xff] %v3659_v8  ;;  %v2516_v29 = vpop.f32.mrb[57].mxu0 }
 0x449   : > { %2740 = vst [vmem:[%s5768_s30 + $0x140] sm:$0xff] %v2516_v29 }
 0x44a   : > { %v3715_v17 = vpop.f32.mrb[56].mxu1 }
 0x44b   : > { %2757 = vst [vmem:[%s5768_s30 + $0x1c8] sm:$0xff] %v3715_v17  ;;  %v2661_v5 = vpop.f32.mrb[57].mxu1 }
 0x44c   : > { %2756 = vst [vmem:[%s5768_s30 + $0x1c0] sm:$0xff] %v2661_v5 }
 0x44f   : > { %v3662_v2 = vpop.f32.mrb[58].mxu0 }
 0x450   : > { %2743 = vst [vmem:[%s5768_s30 + $0x158] sm:$0xff] %v3662_v2  ;;  %v2526_v32 = vpop.f32.mrb[59].mxu0 }
 0x451   : > { %2742 = vst [vmem:[%s5768_s30 + $0x150] sm:$0xff] %v2526_v32 }
 0x452   : > { %v3718_v20 = vpop.f32.mrb[58].mxu1 }
 0x453   : > { %2759 = vst [vmem:[%s5768_s30 + $0x1d8] sm:$0xff] %v3718_v20  ;;  %v2671_v33 = vpop.f32.mrb[59].mxu1 }
 0x454   : > { %2758 = vst [vmem:[%s5768_s30 + $0x1d0] sm:$0xff] %v2671_v33 }
 0x457   : > { %v3665_v48 = vpop.f32.mrb[60].mxu0 }
 0x458   : > { %2745 = vst [vmem:[%s5768_s30 + $0x168] sm:$0xff] %v3665_v48  ;;  %v2536_v26 = vpop.f32.mrb[61].mxu0 }
 0x459   : > { %2744 = vst [vmem:[%s5768_s30 + $0x160] sm:$0xff] %v2536_v26 }
 0x45a   : > { %v3721_v37 = vpop.f32.mrb[60].mxu1 }
 0x45b   : > { %2761 = vst [vmem:[%s5768_s30 + $0x1e8] sm:$0xff] %v3721_v37  ;;  %v2681_v52 = vpop.f32.mrb[61].mxu1 }
 0x45c   : > { %2760 = vst [vmem:[%s5768_s30 + $0x1e0] sm:$0xff] %v2681_v52 }
 0x462   : > { %v3724_v34 = vpop.f32.mrb[62].mxu1 }
 0x463   : > { %2763 = vst [vmem:[%s5768_s30 + $0x1f8] sm:$0xff] %v3724_v34  ;;  %v3668_v35 = vpop.f32.mrb[62].mxu0  ;;  %v2691_v13 = vpop.f32.mrb[63].mxu1 }
 0x464   : > { %2747 = vst [vmem:[%s5768_s30 + $0x178] sm:$0xff] %v3668_v35  ;;  %2762 = vst [vmem:[%s5768_s30 + $0x1f0] sm:$0xff] %v2691_v13  ;;  %v2546_v10 = vpop.f32.mrb[63].mxu0 }
 0x465   : > { %2746 = vst [vmem:[%s5768_s30 + $0x170] sm:$0xff] %v2546_v10 }
 0x466   : > { %4474 = shalt.err (!%p4471_p2)
}
 0x467   : > { %s4475_s15 = scalar_lea.hbm %s5835_s24, 8192  ;;  %s4479_s9 = scalar_lea.hbm %s5892_s5, 16384 }
 0x468   : > { %p4476_p0 = scmp.ne.s32.totalorder %s5835_s24, %s4475_s15  ;;  %p4480_p13 = scmp.lt.u32.totalorder %s5835_s24, %s5892_s5 }
 0x469   : > { %p4481_p10 = scmp.lt.u32.totalorder %s4479_s9, %s4475_s15  ;;  %p4483_p7 = scmp.lt.u32.totalorder %s4475_s15, %s5835_s24 }
 0x46a   : > { %p4477_p12 = pnand %p4476_p0, %p6044_p1 }
 0x46b   : > { %p4482_p9 = por %p4481_p10, %p4480_p13 }
 0x46c   : > { %p4478_p8 = pneg %p4477_p12 }
 0x46d   : > { %p4484_p3 = por %p4483_p7, %p4482_p9 }
 0x46f   : > { %p4485_p5 = pnand %p4484_p3, %p4478_p8 }
 0x471   : > { %4488 = shalt.err (!%p4485_p5)
}
 0x472   : > { %s4549_s1 = smov 128   ;;  %s4550_s29 = smov 8  }
 0x473   : > { %3993 = dma.vmem_to_hbm [thread:$0]  (%p6044_p1), %s5837_s21, 8192, %s5835_s24, %s5845_s27, %s4549_s1, %s4549_s1, %s4550_s29  }
 0x474 PF: > { %s6045_s10 = sld [smem:[#allocation21_spill]]  ;;  %s6046_s20 = sld [smem:[#allocation18_spill]] }
 0x475   : > { %s2793_s2 = sand.u32 1, %s4527_s18  }
 0x476   : > { %s2794_s11 = scalar_lea.sflag [#allocation4], %s2793_s2 }
 0x47a   : > { %p6047_p11 = scmp.ne.s32.totalorder %s6045_s10, 0  ;;  %p6048_p4 = scmp.ge.s32.totalorder %s6046_s20, 2 }
 0x47c   : > { %p4013_p6 = pnand %p6048_p4, %p6047_p11 }
 0x47e   : > { %4522 = dma.done.wait (!%p4013_p6), %s2794_s11, 8192  }
 0x47f   : > { %4524 = vsyncadd (!%p4013_p6), %s2794_s11, 4294959104  ;;  %s6049_s21 = sld [smem:[#allocation19_spill]]  ;;  %s6050_s6 = sld [smem:[#allocation17_spill]] }
 0x480   : > { %s6051_s20 = sld [smem:[#allocation20_spill]]  ;;  %s6052_s18 = smov %s4531_s19 }
 0x485   : > { %p22_p2 = scmp.ge.s32.totalorder %s6049_s21, 4   ;;  %s6053_s19 = smov %s6050_s6 }
 0x487   :  { %24 = sbr.rel (!%p22_p2) target bundleno = 12 (0xc), region = 124 }
 0x48e   :  { %2799 = vsyncpa [#allocation3], 1 }
 0x48f   :  { %2801 = vsyncpa [#allocation3 + $0x1], 1 }
 0x490   :  { %2802 = vsyncpa [#allocation6], 1 }
 0x491   :  { %2804 = vsyncpa [#allocation6 + $0x1], 1 }
 0x492   :  { %2805 = vsyncpa [#allocation9], 1 }
 0x493   :  { %2806 = vsyncpa [#allocation4], 1 }
 0x494   :  { %2808 = vsyncpa [#allocation4 + $0x1], 1 }

</bundles_post_ra>
